<compile_context>
chip_gen: v7x
topology: tpu7x:2x2x1
jax: 0.10.0
libtpu: 0.0.40
codegen_flags: <defaults>
</compile_context>

<pallas_src>
import jax
import jax.numpy as jnp
import numpy as np
from jax.experimental import pallas as pl
from jax.experimental.pallas import tpu as pltpu

# Per-image flattened layouts (power-of-two row strides -> static tap offsets).
_S1, _L1 = 32, 1024          # conv1 stage: padded 32x32 input, row stride 32
_S2, _L2 = 16, 256           # pool1/conv2 stage: 16x16 slab (valid 14x14)
_XPAD = _L1 + 256            # input slab width incl. conv1 tap over-read pad
_APAD = _L2 + 128            # pooled1 slab width incl. conv2 tap over-read pad
assert _XPAD >= _L1 + 4 * _S1 + 4        # conv1 tap windows stay in bounds
assert _APAD >= _L2 + 4 * _S2 + 4        # conv2 tap windows stay in bounds
assert 9 * _S2 + 9 + 4 * _S2 + 4 < _L2   # valid conv2 outputs never touch pad


# ---------------------------------------------------------------------------
# Fused per-image LeNet5 kernel (one grid step = one image)
# ---------------------------------------------------------------------------
def _lenet5_kernel(xf_ref, w1_ref, b1_ref, w2_ref, b2_ref, w3_ref, b3_ref,
                   wf1_ref, bf1_ref, wf2_ref, bf2_ref, t1_ref, t2_ref,
                   out_ref, im1_ref, a1_ref, im2_ref):
    f32 = jnp.float32
    bf16 = jnp.bfloat16

    # ---- conv1 (1 -> 6): im2col (25 shifted windows) + one MXU matmul ------
    for ki in range(5):
        for kj in range(5):
            t = ki * 5 + kj
            d = ki * _S1 + kj
            im1_ref[t:t + 1, :] = xf_ref[0, :, d:d + _L1]      # (1, 1024)
    pre1 = jnp.dot(w1_ref[...], im1_ref[...].astype(bf16),
                   preferred_element_type=f32)                  # (6, 1024)
    act1 = jnp.tanh(pre1 + b1_ref[...])

    # ---- pool1: tanh -> 2x2 avg-pool -> compact 16-stride layout -----------
    p1 = jnp.dot(act1.astype(bf16), t1_ref[...],
                 preferred_element_type=f32)                    # (6, 256)
    a1_ref[:, :_L2] = p1
    a1_ref[:, _L2:] = jnp.zeros((6, _APAD - _L2), f32)          # zero tap pad

    # ---- conv2 (6 -> 16): K-stacked im2col (K=150) + one MXU matmul --------
    for ki in range(5):
        for kj in range(5):
            t = ki * 5 + kj
            d = ki * _S2 + kj
            im2_ref[t * 6:(t + 1) * 6, :] = a1_ref[:, d:d + _L2]  # (6, 256)
    pre2 = jnp.dot(w2_ref[...], im2_ref[...].astype(bf16),
                   preferred_element_type=f32)                  # (16, 256)
    act2 = jnp.tanh(pre2 + b2_ref[...])

    # ---- pool2 fused with conv3 patch gather: the 5x5 pooled map is exactly
    #      conv3's receptive field, so T2 (256, 25) emits patch[c, tap] -------
    patch = jnp.dot(act2.astype(bf16), t2_ref[...],
                    preferred_element_type=f32).astype(bf16)    # (16, 25)

    # ---- conv3 (16 -> 120) at its SINGLE valid output position -------------
    # 25 taps x (120,16)@(16,1): ~48K MACs total (64x less than computing all
    # positions); K-stacking further is not worth a relayout at this size.
    pre3 = b3_ref[...]                                          # (120, 1)
    for t in range(25):
        w_t = w3_ref[:, t * 16:(t + 1) * 16]                    # (120, 16)
        pre3 = pre3 + jnp.dot(w_t, patch[:, t:t + 1],
                              preferred_element_type=f32)
    a3 = jnp.tanh(pre3)                                         # (120, 1)

    # ---- fc1 + tanh, fc2 ----------------------------------------------------
    h4 = jnp.tanh(jnp.dot(wf1_ref[...], a3.astype(bf16),
                          preferred_element_type=f32) + bf1_ref[...])  # (84,1)
    logits = jnp.dot(wf2_ref[...], h4.astype(bf16),
                     preferred_element_type=f32) + bf2_ref[...]        # (10,1)
    out_ref[0] = logits


# ---------------------------------------------------------------------------
# Per-image constant pooling matrices (built once, host-side numpy)
# ---------------------------------------------------------------------------
def _pool_matrix(in_img, in_row, out_img, out_row, out_hw):
    """T[f, p] = 0.25 iff flat position f is one of the 4 inputs pooled to p."""
    T = np.zeros((in_img, out_img), np.float32)
    for io in range(out_hw):
        for jo in range(out_hw):
            p = io * out_row + jo
            for a in (0, 1):
                for b in (0, 1):
                    f = (2 * io + a) * in_row + (2 * jo + b)
                    T[f, p] = 0.25
    return T


def pack_params(params):
    """One-time packing: lane-dense bf16 weights, column biases, O(1) pool mats."""
    bf16 = jnp.bfloat16
    # conv weights packed so the im2col row order (tap-major, channel-minor)
    # matches the weight column order.
    w1p = params["w1"].reshape(6, 25)                                   # (6,25)
    w2p = jnp.transpose(params["w2"], (0, 2, 3, 1)).reshape(16, 150)    # (16,150)
    w3p = jnp.transpose(params["w3"], (0, 2, 3, 1)).reshape(120, 400)   # (120,400)
    t1 = _pool_matrix(_L1, _S1, _L2, _S2, 14)      # (1024, 256), per image
    t2 = _pool_matrix(_L2, _S2, 25, 5, 5)          # (256, 25) = conv3 im2col
    return {
        "w1p": w1p.astype(bf16), "b1": params["b1"].reshape(6, 1),
        "w2p": w2p.astype(bf16), "b2": params["b2"].reshape(16, 1),
        "w3p": w3p.astype(bf16), "b3": params["b3"].reshape(120, 1),
        "wf1": params["wf1"].astype(bf16), "bf1": params["bf1"].reshape(84, 1),
        "wf2": params["wf2"].astype(bf16), "bf2": params["bf2"].reshape(10, 1),
        "t1": jnp.asarray(t1, bf16),    # 0 / 0.25 are exact in bf16
        "t2": jnp.asarray(t2, bf16),
    }


# ---------------------------------------------------------------------------
# Forward pass: pad/flatten input, one gridded pallas_call
# ---------------------------------------------------------------------------
def lenet5_forward(packed, x):
    N = x.shape[0]
    # (N,1,28,28) -> pad=2 -> (N,32,32) -> per-image flat slab (1, 1280) with
    # zero tail so every conv1 tap window load stays inside this image's block.
    xp = jnp.pad(x[:, 0], ((0, 0), (2, 2), (2, 2)))
    xf = jnp.pad(xp.reshape(N, 1, _L1), ((0, 0), (0, 0), (0, _XPAD - _L1)))

    def const_spec(a):
        zeros = (0,) * a.ndim
        return pl.BlockSpec(a.shape, lambda n, _z=zeros: _z)

    consts = (packed["w1p"], packed["b1"], packed["w2p"], packed["b2"],
              packed["w3p"], packed["b3"], packed["wf1"], packed["bf1"],
              packed["wf2"], packed["bf2"], packed["t1"], packed["t2"])

    out3 = pl.pallas_call(
        _lenet5_kernel,
        grid=(N,),
        out_shape=jax.ShapeDtypeStruct((N, 10, 1), jnp.float32),
        in_specs=[pl.BlockSpec((1, 1, _XPAD), lambda n: (n, 0, 0))]
                 + [const_spec(c) for c in consts],
        out_specs=pl.BlockSpec((1, 10, 1), lambda n: (n, 0, 0)),
        scratch_shapes=[
            pltpu.VMEM((25, _L1), jnp.float32),    # conv1 im2col
            pltpu.VMEM((6, _APAD), jnp.float32),   # pooled1 (+ tap pad)
            pltpu.VMEM((150, _L2), jnp.float32),   # conv2 im2col (K=150)
        ],
        compiler_params=pltpu.CompilerParams(
            dimension_semantics=("parallel",),
            # Real footprint is ~1.5 MiB (scratch ~0.3 MiB + constants ~1 MiB);
            # 8 MiB leaves headroom for double-buffering / compiler temps and
            # fits every generation including v7x (64 MiB physical VMEM).
            vmem_limit_bytes=8 * 1024 * 1024),
    )(xf, *consts)
    return out3[:, :, 0]                           # (N, 10)


# ---------------------------------------------------------------------------
# Parameters + pure-JAX reference
# ---------------------------------------------------------------------------
def init_params(key):
    ks = jax.random.split(key, 10)

    def u(k, shape, fan_in):
        bound = 1.0 / np.sqrt(fan_in)
        return jax.random.uniform(k, shape, jnp.float32, -bound, bound)

    return {
        "w1": u(ks[0], (6, 1, 5, 5), 25),     "b1": u(ks[1], (6,), 25),
        "w2": u(ks[2], (16, 6, 5, 5), 150),   "b2": u(ks[3], (16,), 150),
        "w3": u(ks[4], (120, 16, 5, 5), 400), "b3": u(ks[5], (120,), 400),
        "wf1": u(ks[6], (84, 120), 120),      "bf1": u(ks[7], (84,), 120),
        "wf2": u(ks[8], (10, 84), 84),        "bf2": u(ks[9], (10,), 84),
    }


def lenet5_reference(params, x):
    def conv(x, w, b, pad):
        out = jax.lax.conv_general_dilated(
            x, w, window_strides=(1, 1), padding=[(pad, pad), (pad, pad)],
            dimension_numbers=("NCHW", "OIHW", "NCHW"))
        return jnp.tanh(out + b[None, :, None, None])

    def pool(x):
        s = jax.lax.reduce_window(x, 0.0, jax.lax.add,
                                  (1, 1, 2, 2), (1, 1, 2, 2), "VALID")
        return s / 4.0

    x = conv(x, params["w1"], params["b1"], 2); x = pool(x)
    x = conv(x, params["w2"], params["b2"], 0); x = pool(x)
    x = conv(x, params["w3"], params["b3"], 0)
    x = x.reshape(x.shape[0], -1)
    x = jnp.tanh(x @ params["wf1"].T + params["bf1"])
    return x @ params["wf2"].T + params["bf2"]


if __name__ == "__main__":
    key = jax.random.PRNGKey(0)
    kp, kx = jax.random.split(key)
    params = init_params(kp)
    # LeNet5 geometry requires 28x28 spatial input (conv3 reduces 5x5 -> 1x1).
    x = jax.random.normal(kx, (2, 1, 28, 28), dtype=jnp.float32)

    packed = pack_params(params)
    fwd = jax.jit(lenet5_forward)
    out = jax.block_until_ready(fwd(packed, x))
    assert out.shape == (2, 10) and out.dtype == jnp.float32

    ref = jax.block_until_ready(lenet5_reference(params, x))
    np.testing.assert_allclose(np.asarray(out), np.asarray(ref),
                               rtol=3e-2, atol=3e-2)
    print("KERNEL_OK")
</pallas_src>

<mosaic_0001>
module attributes {stable_mosaic.version = 11 : i64} {
  func.func @_lenet5_kernel(%arg0: i32, %arg1: memref<1x1x1280xf32, #tpu.memory_space<vmem>>, %arg2: memref<6x25xbf16, #tpu.memory_space<vmem>>, %arg3: memref<6x1xf32, #tpu.memory_space<vmem>>, %arg4: memref<16x150xbf16, #tpu.memory_space<vmem>>, %arg5: memref<16x1xf32, #tpu.memory_space<vmem>>, %arg6: memref<120x400xbf16, #tpu.memory_space<vmem>>, %arg7: memref<120x1xf32, #tpu.memory_space<vmem>>, %arg8: memref<84x120xbf16, #tpu.memory_space<vmem>>, %arg9: memref<84x1xf32, #tpu.memory_space<vmem>>, %arg10: memref<10x84xbf16, #tpu.memory_space<vmem>>, %arg11: memref<10x1xf32, #tpu.memory_space<vmem>>, %arg12: memref<1024x256xbf16, #tpu.memory_space<vmem>>, %arg13: memref<256x25xbf16, #tpu.memory_space<vmem>>, %arg14: memref<1x10x1xf32, #tpu.memory_space<vmem>>, %arg15: memref<25x1024xf32, #tpu.memory_space<vmem>>, %arg16: memref<6x384xf32, #tpu.memory_space<vmem>>, %arg17: memref<150x256xf32, #tpu.memory_space<vmem>>) attributes {dimension_semantics = [#tpu.dimension_semantics<parallel>], iteration_bounds = array<i64: 2>, scalar_prefetch = 0 : i64, scratch_operands = 3 : i64, tpu.core_type = #tpu.core_type<tc>, window_params = [{transform_indices = @transform_0, window_bounds = array<i64: 1, 1, 1280>}, {pipeline_mode = #tpu.pipeline_mode<synchronous>, transform_indices = @transform_1, window_bounds = array<i64: 6, 25>}, {pipeline_mode = #tpu.pipeline_mode<synchronous>, transform_indices = @transform_2, window_bounds = array<i64: 6, 1>}, {pipeline_mode = #tpu.pipeline_mode<synchronous>, transform_indices = @transform_3, window_bounds = array<i64: 16, 150>}, {pipeline_mode = #tpu.pipeline_mode<synchronous>, transform_indices = @transform_4, window_bounds = array<i64: 16, 1>}, {pipeline_mode = #tpu.pipeline_mode<synchronous>, transform_indices = @transform_5, window_bounds = array<i64: 120, 400>}, {pipeline_mode = #tpu.pipeline_mode<synchronous>, transform_indices = @transform_6, window_bounds = array<i64: 120, 1>}, {pipeline_mode = #tpu.pipeline_mode<synchronous>, transform_indices = @transform_7, window_bounds = array<i64: 84, 120>}, {pipeline_mode = #tpu.pipeline_mode<synchronous>, transform_indices = @transform_8, window_bounds = array<i64: 84, 1>}, {pipeline_mode = #tpu.pipeline_mode<synchronous>, transform_indices = @transform_9, window_bounds = array<i64: 10, 84>}, {pipeline_mode = #tpu.pipeline_mode<synchronous>, transform_indices = @transform_10, window_bounds = array<i64: 10, 1>}, {pipeline_mode = #tpu.pipeline_mode<synchronous>, transform_indices = @transform_11, window_bounds = array<i64: 1024, 256>}, {pipeline_mode = #tpu.pipeline_mode<synchronous>, transform_indices = @transform_12, window_bounds = array<i64: 256, 25>}, {transform_indices = @transform_13, window_bounds = array<i64: 1, 10, 1>}]} {
    %c0 = arith.constant 0 : index
    %c0_0 = arith.constant 0 : index
    %c0_1 = arith.constant 0 : index
    %0 = vector.load %arg1[%c0, %c0_0, %c0_1] : memref<1x1x1280xf32, #tpu.memory_space<vmem>>, vector<1x1x1024xf32>
    %1 = vector.shape_cast %0 : vector<1x1x1024xf32> to vector<1x1024xf32>
    %c0_2 = arith.constant 0 : index
    %c0_3 = arith.constant 0 : index
    %2 = vector.load %arg15[%c0_2, %c0_3] : memref<25x1024xf32, #tpu.memory_space<vmem>>, vector<1x1024xf32>
    tpu.vector_store %arg15[%c0_2, %c0_3], %1 {strides = array<i32>} : memref<25x1024xf32, #tpu.memory_space<vmem>>, vector<1x1024xf32>,
    %c0_4 = arith.constant 0 : index
    %c0_5 = arith.constant 0 : index
    %c1 = arith.constant 1 : index
    %3 = vector.load %arg1[%c0_4, %c0_5, %c1] : memref<1x1x1280xf32, #tpu.memory_space<vmem>>, vector<1x1x1024xf32>
    %4 = vector.shape_cast %3 : vector<1x1x1024xf32> to vector<1x1024xf32>
    %c1_6 = arith.constant 1 : index
    %c0_7 = arith.constant 0 : index
    %5 = vector.load %arg15[%c1_6, %c0_7] : memref<25x1024xf32, #tpu.memory_space<vmem>>, vector<1x1024xf32>
    tpu.vector_store %arg15[%c1_6, %c0_7], %4 {strides = array<i32>} : memref<25x1024xf32, #tpu.memory_space<vmem>>, vector<1x1024xf32>,
    %c0_8 = arith.constant 0 : index
    %c0_9 = arith.constant 0 : index
    %c2 = arith.constant 2 : index
    %6 = vector.load %arg1[%c0_8, %c0_9, %c2] : memref<1x1x1280xf32, #tpu.memory_space<vmem>>, vector<1x1x1024xf32>
    %7 = vector.shape_cast %6 : vector<1x1x1024xf32> to vector<1x1024xf32>
    %c2_10 = arith.constant 2 : index
    %c0_11 = arith.constant 0 : index
    %8 = vector.load %arg15[%c2_10, %c0_11] : memref<25x1024xf32, #tpu.memory_space<vmem>>, vector<1x1024xf32>
    tpu.vector_store %arg15[%c2_10, %c0_11], %7 {strides = array<i32>} : memref<25x1024xf32, #tpu.memory_space<vmem>>, vector<1x1024xf32>,
    %c0_12 = arith.constant 0 : index
    %c0_13 = arith.constant 0 : index
    %c3 = arith.constant 3 : index
    %9 = vector.load %arg1[%c0_12, %c0_13, %c3] : memref<1x1x1280xf32, #tpu.memory_space<vmem>>, vector<1x1x1024xf32>
    %10 = vector.shape_cast %9 : vector<1x1x1024xf32> to vector<1x1024xf32>
    %c3_14 = arith.constant 3 : index
    %c0_15 = arith.constant 0 : index
    %11 = vector.load %arg15[%c3_14, %c0_15] : memref<25x1024xf32, #tpu.memory_space<vmem>>, vector<1x1024xf32>
    tpu.vector_store %arg15[%c3_14, %c0_15], %10 {strides = array<i32>} : memref<25x1024xf32, #tpu.memory_space<vmem>>, vector<1x1024xf32>,
    %c0_16 = arith.constant 0 : index
    %c0_17 = arith.constant 0 : index
    %c4 = arith.constant 4 : index
    %12 = vector.load %arg1[%c0_16, %c0_17, %c4] : memref<1x1x1280xf32, #tpu.memory_space<vmem>>, vector<1x1x1024xf32>
    %13 = vector.shape_cast %12 : vector<1x1x1024xf32> to vector<1x1024xf32>
    %c4_18 = arith.constant 4 : index
    %c0_19 = arith.constant 0 : index
    %14 = vector.load %arg15[%c4_18, %c0_19] : memref<25x1024xf32, #tpu.memory_space<vmem>>, vector<1x1024xf32>
    tpu.vector_store %arg15[%c4_18, %c0_19], %13 {strides = array<i32>} : memref<25x1024xf32, #tpu.memory_space<vmem>>, vector<1x1024xf32>,
    %c0_20 = arith.constant 0 : index
    %c0_21 = arith.constant 0 : index
    %c32 = arith.constant 32 : index
    %15 = vector.load %arg1[%c0_20, %c0_21, %c32] : memref<1x1x1280xf32, #tpu.memory_space<vmem>>, vector<1x1x1024xf32>
    %16 = vector.shape_cast %15 : vector<1x1x1024xf32> to vector<1x1024xf32>
    %c5 = arith.constant 5 : index
    %c0_22 = arith.constant 0 : index
    %17 = vector.load %arg15[%c5, %c0_22] : memref<25x1024xf32, #tpu.memory_space<vmem>>, vector<1x1024xf32>
    tpu.vector_store %arg15[%c5, %c0_22], %16 {strides = array<i32>} : memref<25x1024xf32, #tpu.memory_space<vmem>>, vector<1x1024xf32>,
    %c0_23 = arith.constant 0 : index
    %c0_24 = arith.constant 0 : index
    %c33 = arith.constant 33 : index
    %18 = vector.load %arg1[%c0_23, %c0_24, %c33] : memref<1x1x1280xf32, #tpu.memory_space<vmem>>, vector<1x1x1024xf32>
    %19 = vector.shape_cast %18 : vector<1x1x1024xf32> to vector<1x1024xf32>
    %c6 = arith.constant 6 : index
    %c0_25 = arith.constant 0 : index
    %20 = vector.load %arg15[%c6, %c0_25] : memref<25x1024xf32, #tpu.memory_space<vmem>>, vector<1x1024xf32>
    tpu.vector_store %arg15[%c6, %c0_25], %19 {strides = array<i32>} : memref<25x1024xf32, #tpu.memory_space<vmem>>, vector<1x1024xf32>,
    %c0_26 = arith.constant 0 : index
    %c0_27 = arith.constant 0 : index
    %c34 = arith.constant 34 : index
    %21 = vector.load %arg1[%c0_26, %c0_27, %c34] : memref<1x1x1280xf32, #tpu.memory_space<vmem>>, vector<1x1x1024xf32>
    %22 = vector.shape_cast %21 : vector<1x1x1024xf32> to vector<1x1024xf32>
    %c7 = arith.constant 7 : index
    %c0_28 = arith.constant 0 : index
    %23 = vector.load %arg15[%c7, %c0_28] : memref<25x1024xf32, #tpu.memory_space<vmem>>, vector<1x1024xf32>
    tpu.vector_store %arg15[%c7, %c0_28], %22 {strides = array<i32>} : memref<25x1024xf32, #tpu.memory_space<vmem>>, vector<1x1024xf32>,
    %c0_29 = arith.constant 0 : index
    %c0_30 = arith.constant 0 : index
    %c35 = arith.constant 35 : index
    %24 = vector.load %arg1[%c0_29, %c0_30, %c35] : memref<1x1x1280xf32, #tpu.memory_space<vmem>>, vector<1x1x1024xf32>
    %25 = vector.shape_cast %24 : vector<1x1x1024xf32> to vector<1x1024xf32>
    %c8 = arith.constant 8 : index
    %c0_31 = arith.constant 0 : index
    %26 = vector.load %arg15[%c8, %c0_31] : memref<25x1024xf32, #tpu.memory_space<vmem>>, vector<1x1024xf32>
    tpu.vector_store %arg15[%c8, %c0_31], %25 {strides = array<i32>} : memref<25x1024xf32, #tpu.memory_space<vmem>>, vector<1x1024xf32>,
    %c0_32 = arith.constant 0 : index
    %c0_33 = arith.constant 0 : index
    %c36 = arith.constant 36 : index
    %27 = vector.load %arg1[%c0_32, %c0_33, %c36] : memref<1x1x1280xf32, #tpu.memory_space<vmem>>, vector<1x1x1024xf32>
    %28 = vector.shape_cast %27 : vector<1x1x1024xf32> to vector<1x1024xf32>
    %c9 = arith.constant 9 : index
    %c0_34 = arith.constant 0 : index
    %29 = vector.load %arg15[%c9, %c0_34] : memref<25x1024xf32, #tpu.memory_space<vmem>>, vector<1x1024xf32>
    tpu.vector_store %arg15[%c9, %c0_34], %28 {strides = array<i32>} : memref<25x1024xf32, #tpu.memory_space<vmem>>, vector<1x1024xf32>,
    %c0_35 = arith.constant 0 : index
    %c0_36 = arith.constant 0 : index
    %c64 = arith.constant 64 : index
    %30 = vector.load %arg1[%c0_35, %c0_36, %c64] : memref<1x1x1280xf32, #tpu.memory_space<vmem>>, vector<1x1x1024xf32>
    %31 = vector.shape_cast %30 : vector<1x1x1024xf32> to vector<1x1024xf32>
    %c10 = arith.constant 10 : index
    %c0_37 = arith.constant 0 : index
    %32 = vector.load %arg15[%c10, %c0_37] : memref<25x1024xf32, #tpu.memory_space<vmem>>, vector<1x1024xf32>
    tpu.vector_store %arg15[%c10, %c0_37], %31 {strides = array<i32>} : memref<25x1024xf32, #tpu.memory_space<vmem>>, vector<1x1024xf32>,
    %c0_38 = arith.constant 0 : index
    %c0_39 = arith.constant 0 : index
    %c65 = arith.constant 65 : index
    %33 = vector.load %arg1[%c0_38, %c0_39, %c65] : memref<1x1x1280xf32, #tpu.memory_space<vmem>>, vector<1x1x1024xf32>
    %34 = vector.shape_cast %33 : vector<1x1x1024xf32> to vector<1x1024xf32>
    %c11 = arith.constant 11 : index
    %c0_40 = arith.constant 0 : index
    %35 = vector.load %arg15[%c11, %c0_40] : memref<25x1024xf32, #tpu.memory_space<vmem>>, vector<1x1024xf32>
    tpu.vector_store %arg15[%c11, %c0_40], %34 {strides = array<i32>} : memref<25x1024xf32, #tpu.memory_space<vmem>>, vector<1x1024xf32>,
    %c0_41 = arith.constant 0 : index
    %c0_42 = arith.constant 0 : index
    %c66 = arith.constant 66 : index
    %36 = vector.load %arg1[%c0_41, %c0_42, %c66] : memref<1x1x1280xf32, #tpu.memory_space<vmem>>, vector<1x1x1024xf32>
    %37 = vector.shape_cast %36 : vector<1x1x1024xf32> to vector<1x1024xf32>
    %c12 = arith.constant 12 : index
    %c0_43 = arith.constant 0 : index
    %38 = vector.load %arg15[%c12, %c0_43] : memref<25x1024xf32, #tpu.memory_space<vmem>>, vector<1x1024xf32>
    tpu.vector_store %arg15[%c12, %c0_43], %37 {strides = array<i32>} : memref<25x1024xf32, #tpu.memory_space<vmem>>, vector<1x1024xf32>,
    %c0_44 = arith.constant 0 : index
    %c0_45 = arith.constant 0 : index
    %c67 = arith.constant 67 : index
    %39 = vector.load %arg1[%c0_44, %c0_45, %c67] : memref<1x1x1280xf32, #tpu.memory_space<vmem>>, vector<1x1x1024xf32>
    %40 = vector.shape_cast %39 : vector<1x1x1024xf32> to vector<1x1024xf32>
    %c13 = arith.constant 13 : index
    %c0_46 = arith.constant 0 : index
    %41 = vector.load %arg15[%c13, %c0_46] : memref<25x1024xf32, #tpu.memory_space<vmem>>, vector<1x1024xf32>
    tpu.vector_store %arg15[%c13, %c0_46], %40 {strides = array<i32>} : memref<25x1024xf32, #tpu.memory_space<vmem>>, vector<1x1024xf32>,
    %c0_47 = arith.constant 0 : index
    %c0_48 = arith.constant 0 : index
    %c68 = arith.constant 68 : index
    %42 = vector.load %arg1[%c0_47, %c0_48, %c68] : memref<1x1x1280xf32, #tpu.memory_space<vmem>>, vector<1x1x1024xf32>
    %43 = vector.shape_cast %42 : vector<1x1x1024xf32> to vector<1x1024xf32>
    %c14 = arith.constant 14 : index
    %c0_49 = arith.constant 0 : index
    %44 = vector.load %arg15[%c14, %c0_49] : memref<25x1024xf32, #tpu.memory_space<vmem>>, vector<1x1024xf32>
    tpu.vector_store %arg15[%c14, %c0_49], %43 {strides = array<i32>} : memref<25x1024xf32, #tpu.memory_space<vmem>>, vector<1x1024xf32>,
    %c0_50 = arith.constant 0 : index
    %c0_51 = arith.constant 0 : index
    %c96 = arith.constant 96 : index
    %45 = vector.load %arg1[%c0_50, %c0_51, %c96] : memref<1x1x1280xf32, #tpu.memory_space<vmem>>, vector<1x1x1024xf32>
    %46 = vector.shape_cast %45 : vector<1x1x1024xf32> to vector<1x1024xf32>
    %c15 = arith.constant 15 : index
    %c0_52 = arith.constant 0 : index
    %47 = vector.load %arg15[%c15, %c0_52] : memref<25x1024xf32, #tpu.memory_space<vmem>>, vector<1x1024xf32>
    tpu.vector_store %arg15[%c15, %c0_52], %46 {strides = array<i32>} : memref<25x1024xf32, #tpu.memory_space<vmem>>, vector<1x1024xf32>,
    %c0_53 = arith.constant 0 : index
    %c0_54 = arith.constant 0 : index
    %c97 = arith.constant 97 : index
    %48 = vector.load %arg1[%c0_53, %c0_54, %c97] : memref<1x1x1280xf32, #tpu.memory_space<vmem>>, vector<1x1x1024xf32>
    %49 = vector.shape_cast %48 : vector<1x1x1024xf32> to vector<1x1024xf32>
    %c16 = arith.constant 16 : index
    %c0_55 = arith.constant 0 : index
    %50 = vector.load %arg15[%c16, %c0_55] : memref<25x1024xf32, #tpu.memory_space<vmem>>, vector<1x1024xf32>
    tpu.vector_store %arg15[%c16, %c0_55], %49 {strides = array<i32>} : memref<25x1024xf32, #tpu.memory_space<vmem>>, vector<1x1024xf32>,
    %c0_56 = arith.constant 0 : index
    %c0_57 = arith.constant 0 : index
    %c98 = arith.constant 98 : index
    %51 = vector.load %arg1[%c0_56, %c0_57, %c98] : memref<1x1x1280xf32, #tpu.memory_space<vmem>>, vector<1x1x1024xf32>
    %52 = vector.shape_cast %51 : vector<1x1x1024xf32> to vector<1x1024xf32>
    %c17 = arith.constant 17 : index
    %c0_58 = arith.constant 0 : index
    %53 = vector.load %arg15[%c17, %c0_58] : memref<25x1024xf32, #tpu.memory_space<vmem>>, vector<1x1024xf32>
    tpu.vector_store %arg15[%c17, %c0_58], %52 {strides = array<i32>} : memref<25x1024xf32, #tpu.memory_space<vmem>>, vector<1x1024xf32>,
    %c0_59 = arith.constant 0 : index
    %c0_60 = arith.constant 0 : index
    %c99 = arith.constant 99 : index
    %54 = vector.load %arg1[%c0_59, %c0_60, %c99] : memref<1x1x1280xf32, #tpu.memory_space<vmem>>, vector<1x1x1024xf32>
    %55 = vector.shape_cast %54 : vector<1x1x1024xf32> to vector<1x1024xf32>
    %c18 = arith.constant 18 : index
    %c0_61 = arith.constant 0 : index
    %56 = vector.load %arg15[%c18, %c0_61] : memref<25x1024xf32, #tpu.memory_space<vmem>>, vector<1x1024xf32>
    tpu.vector_store %arg15[%c18, %c0_61], %55 {strides = array<i32>} : memref<25x1024xf32, #tpu.memory_space<vmem>>, vector<1x1024xf32>,
    %c0_62 = arith.constant 0 : index
    %c0_63 = arith.constant 0 : index
    %c100 = arith.constant 100 : index
    %57 = vector.load %arg1[%c0_62, %c0_63, %c100] : memref<1x1x1280xf32, #tpu.memory_space<vmem>>, vector<1x1x1024xf32>
    %58 = vector.shape_cast %57 : vector<1x1x1024xf32> to vector<1x1024xf32>
    %c19 = arith.constant 19 : index
    %c0_64 = arith.constant 0 : index
    %59 = vector.load %arg15[%c19, %c0_64] : memref<25x1024xf32, #tpu.memory_space<vmem>>, vector<1x1024xf32>
    tpu.vector_store %arg15[%c19, %c0_64], %58 {strides = array<i32>} : memref<25x1024xf32, #tpu.memory_space<vmem>>, vector<1x1024xf32>,
    %c0_65 = arith.constant 0 : index
    %c0_66 = arith.constant 0 : index
    %c128 = arith.constant 128 : index
    %60 = vector.load %arg1[%c0_65, %c0_66, %c128] : memref<1x1x1280xf32, #tpu.memory_space<vmem>>, vector<1x1x1024xf32>
    %61 = vector.shape_cast %60 : vector<1x1x1024xf32> to vector<1x1024xf32>
    %c20 = arith.constant 20 : index
    %c0_67 = arith.constant 0 : index
    %62 = vector.load %arg15[%c20, %c0_67] : memref<25x1024xf32, #tpu.memory_space<vmem>>, vector<1x1024xf32>
    tpu.vector_store %arg15[%c20, %c0_67], %61 {strides = array<i32>} : memref<25x1024xf32, #tpu.memory_space<vmem>>, vector<1x1024xf32>,
    %c0_68 = arith.constant 0 : index
    %c0_69 = arith.constant 0 : index
    %c129 = arith.constant 129 : index
    %63 = vector.load %arg1[%c0_68, %c0_69, %c129] : memref<1x1x1280xf32, #tpu.memory_space<vmem>>, vector<1x1x1024xf32>
    %64 = vector.shape_cast %63 : vector<1x1x1024xf32> to vector<1x1024xf32>
    %c21 = arith.constant 21 : index
    %c0_70 = arith.constant 0 : index
    %65 = vector.load %arg15[%c21, %c0_70] : memref<25x1024xf32, #tpu.memory_space<vmem>>, vector<1x1024xf32>
    tpu.vector_store %arg15[%c21, %c0_70], %64 {strides = array<i32>} : memref<25x1024xf32, #tpu.memory_space<vmem>>, vector<1x1024xf32>,
    %c0_71 = arith.constant 0 : index
    %c0_72 = arith.constant 0 : index
    %c130 = arith.constant 130 : index
    %66 = vector.load %arg1[%c0_71, %c0_72, %c130] : memref<1x1x1280xf32, #tpu.memory_space<vmem>>, vector<1x1x1024xf32>
    %67 = vector.shape_cast %66 : vector<1x1x1024xf32> to vector<1x1024xf32>
    %c22 = arith.constant 22 : index
    %c0_73 = arith.constant 0 : index
    %68 = vector.load %arg15[%c22, %c0_73] : memref<25x1024xf32, #tpu.memory_space<vmem>>, vector<1x1024xf32>
    tpu.vector_store %arg15[%c22, %c0_73], %67 {strides = array<i32>} : memref<25x1024xf32, #tpu.memory_space<vmem>>, vector<1x1024xf32>,
    %c0_74 = arith.constant 0 : index
    %c0_75 = arith.constant 0 : index
    %c131 = arith.constant 131 : index
    %69 = vector.load %arg1[%c0_74, %c0_75, %c131] : memref<1x1x1280xf32, #tpu.memory_space<vmem>>, vector<1x1x1024xf32>
    %70 = vector.shape_cast %69 : vector<1x1x1024xf32> to vector<1x1024xf32>
    %c23 = arith.constant 23 : index
    %c0_76 = arith.constant 0 : index
    %71 = vector.load %arg15[%c23, %c0_76] : memref<25x1024xf32, #tpu.memory_space<vmem>>, vector<1x1024xf32>
    tpu.vector_store %arg15[%c23, %c0_76], %70 {strides = array<i32>} : memref<25x1024xf32, #tpu.memory_space<vmem>>, vector<1x1024xf32>,
    %c0_77 = arith.constant 0 : index
    %c0_78 = arith.constant 0 : index
    %c132 = arith.constant 132 : index
    %72 = vector.load %arg1[%c0_77, %c0_78, %c132] : memref<1x1x1280xf32, #tpu.memory_space<vmem>>, vector<1x1x1024xf32>
    %73 = vector.shape_cast %72 : vector<1x1x1024xf32> to vector<1x1024xf32>
    %c24 = arith.constant 24 : index
    %c0_79 = arith.constant 0 : index
    %74 = vector.load %arg15[%c24, %c0_79] : memref<25x1024xf32, #tpu.memory_space<vmem>>, vector<1x1024xf32>
    tpu.vector_store %arg15[%c24, %c0_79], %73 {strides = array<i32>} : memref<25x1024xf32, #tpu.memory_space<vmem>>, vector<1x1024xf32>,
    %c0_80 = arith.constant 0 : index
    %c0_81 = arith.constant 0 : index
    %75 = vector.load %arg2[%c0_80, %c0_81] : memref<6x25xbf16, #tpu.memory_space<vmem>>, vector<6x25xbf16>
    %c0_82 = arith.constant 0 : index
    %c0_83 = arith.constant 0 : index
    %76 = vector.load %arg15[%c0_82, %c0_83] : memref<25x1024xf32, #tpu.memory_space<vmem>>, vector<25x1024xf32>
    %77 = arith.truncf %76 : vector<25x1024xf32> to vector<25x1024xbf16>
    %cst = arith.constant dense<0.000000e+00> : vector<6x1024xf32>
    %78 = tpu.matmul %75, %77, %cst {dimension_numbers = #tpu.dot_dimension_numbers<[1], [0], [0], [1], [0, 0, 1, 1], [], []>} : vector<6x25xbf16>, vector<25x1024xbf16>, vector<6x1024xf32> -> vector<6x1024xf32>
    %c0_84 = arith.constant 0 : index
    %c0_85 = arith.constant 0 : index
    %79 = vector.load %arg3[%c0_84, %c0_85] : memref<6x1xf32, #tpu.memory_space<vmem>>, vector<6x1xf32>
    %80 = vector.broadcast %79 : vector<6x1xf32> to vector<6x1024xf32>
    %81 = arith.addf %78, %80 : vector<6x1024xf32>
    %82 = math.tanh %81 : vector<6x1024xf32>
    %83 = arith.truncf %82 : vector<6x1024xf32> to vector<6x1024xbf16>
    %c0_86 = arith.constant 0 : index
    %c0_87 = arith.constant 0 : index
    %84 = vector.load %arg12[%c0_86, %c0_87] : memref<1024x256xbf16, #tpu.memory_space<vmem>>, vector<1024x256xbf16>
    %cst_88 = arith.constant dense<0.000000e+00> : vector<6x256xf32>
    %85 = tpu.matmul %83, %84, %cst_88 {dimension_numbers = #tpu.dot_dimension_numbers<[1], [0], [0], [1], [0, 0, 1, 1], [], []>} : vector<6x1024xbf16>, vector<1024x256xbf16>, vector<6x256xf32> -> vector<6x256xf32>
    %c0_89 = arith.constant 0 : index
    %c0_90 = arith.constant 0 : index
    %86 = vector.load %arg16[%c0_89, %c0_90] : memref<6x384xf32, #tpu.memory_space<vmem>>, vector<6x256xf32>
    tpu.vector_store %arg16[%c0_89, %c0_90], %85 {strides = array<i32>} : memref<6x384xf32, #tpu.memory_space<vmem>>, vector<6x256xf32>,
    %cst_91 = arith.constant 0.000000e+00 : f32
    %87 = vector.broadcast %cst_91 : f32 to vector<6x128xf32>
    %c0_92 = arith.constant 0 : index
    %c256 = arith.constant 256 : index
    %88 = vector.load %arg16[%c0_92, %c256] : memref<6x384xf32, #tpu.memory_space<vmem>>, vector<6x128xf32>
    tpu.vector_store %arg16[%c0_92, %c256], %87 {strides = array<i32>} : memref<6x384xf32, #tpu.memory_space<vmem>>, vector<6x128xf32>,
    %c0_93 = arith.constant 0 : index
    %c0_94 = arith.constant 0 : index
    %89 = vector.load %arg16[%c0_93, %c0_94] : memref<6x384xf32, #tpu.memory_space<vmem>>, vector<6x256xf32>
    %c0_95 = arith.constant 0 : index
    %c0_96 = arith.constant 0 : index
    %90 = vector.load %arg17[%c0_95, %c0_96] : memref<150x256xf32, #tpu.memory_space<vmem>>, vector<6x256xf32>
    tpu.vector_store %arg17[%c0_95, %c0_96], %89 {strides = array<i32>} : memref<150x256xf32, #tpu.memory_space<vmem>>, vector<6x256xf32>,
    %c0_97 = arith.constant 0 : index
    %c1_98 = arith.constant 1 : index
    %91 = vector.load %arg16[%c0_97, %c1_98] : memref<6x384xf32, #tpu.memory_space<vmem>>, vector<6x256xf32>
    %c6_99 = arith.constant 6 : index
    %c0_100 = arith.constant 0 : index
    %92 = vector.load %arg17[%c6_99, %c0_100] : memref<150x256xf32, #tpu.memory_space<vmem>>, vector<6x256xf32>
    tpu.vector_store %arg17[%c6_99, %c0_100], %91 {strides = array<i32>} : memref<150x256xf32, #tpu.memory_space<vmem>>, vector<6x256xf32>,
    %c0_101 = arith.constant 0 : index
    %c2_102 = arith.constant 2 : index
    %93 = vector.load %arg16[%c0_101, %c2_102] : memref<6x384xf32, #tpu.memory_space<vmem>>, vector<6x256xf32>
    %c12_103 = arith.constant 12 : index
    %c0_104 = arith.constant 0 : index
    %94 = vector.load %arg17[%c12_103, %c0_104] : memref<150x256xf32, #tpu.memory_space<vmem>>, vector<6x256xf32>
    tpu.vector_store %arg17[%c12_103, %c0_104], %93 {strides = array<i32>} : memref<150x256xf32, #tpu.memory_space<vmem>>, vector<6x256xf32>,
    %c0_105 = arith.constant 0 : index
    %c3_106 = arith.constant 3 : index
    %95 = vector.load %arg16[%c0_105, %c3_106] : memref<6x384xf32, #tpu.memory_space<vmem>>, vector<6x256xf32>
    %c18_107 = arith.constant 18 : index
    %c0_108 = arith.constant 0 : index
    %96 = vector.load %arg17[%c18_107, %c0_108] : memref<150x256xf32, #tpu.memory_space<vmem>>, vector<6x256xf32>
    tpu.vector_store %arg17[%c18_107, %c0_108], %95 {strides = array<i32>} : memref<150x256xf32, #tpu.memory_space<vmem>>, vector<6x256xf32>,
    %c0_109 = arith.constant 0 : index
    %c4_110 = arith.constant 4 : index
    %97 = vector.load %arg16[%c0_109, %c4_110] : memref<6x384xf32, #tpu.memory_space<vmem>>, vector<6x256xf32>
    %c24_111 = arith.constant 24 : index
    %c0_112 = arith.constant 0 : index
    %98 = vector.load %arg17[%c24_111, %c0_112] : memref<150x256xf32, #tpu.memory_space<vmem>>, vector<6x256xf32>
    tpu.vector_store %arg17[%c24_111, %c0_112], %97 {strides = array<i32>} : memref<150x256xf32, #tpu.memory_space<vmem>>, vector<6x256xf32>,
    %c0_113 = arith.constant 0 : index
    %c16_114 = arith.constant 16 : index
    %99 = vector.load %arg16[%c0_113, %c16_114] : memref<6x384xf32, #tpu.memory_space<vmem>>, vector<6x256xf32>
    %c30 = arith.constant 30 : index
    %c0_115 = arith.constant 0 : index
    %100 = vector.load %arg17[%c30, %c0_115] : memref<150x256xf32, #tpu.memory_space<vmem>>, vector<6x256xf32>
    tpu.vector_store %arg17[%c30, %c0_115], %99 {strides = array<i32>} : memref<150x256xf32, #tpu.memory_space<vmem>>, vector<6x256xf32>,
    %c0_116 = arith.constant 0 : index
    %c17_117 = arith.constant 17 : index
    %101 = vector.load %arg16[%c0_116, %c17_117] : memref<6x384xf32, #tpu.memory_space<vmem>>, vector<6x256xf32>
    %c36_118 = arith.constant 36 : index
    %c0_119 = arith.constant 0 : index
    %102 = vector.load %arg17[%c36_118, %c0_119] : memref<150x256xf32, #tpu.memory_space<vmem>>, vector<6x256xf32>
    tpu.vector_store %arg17[%c36_118, %c0_119], %101 {strides = array<i32>} : memref<150x256xf32, #tpu.memory_space<vmem>>, vector<6x256xf32>,
    %c0_120 = arith.constant 0 : index
    %c18_121 = arith.constant 18 : index
    %103 = vector.load %arg16[%c0_120, %c18_121] : memref<6x384xf32, #tpu.memory_space<vmem>>, vector<6x256xf32>
    %c42 = arith.constant 42 : index
    %c0_122 = arith.constant 0 : index
    %104 = vector.load %arg17[%c42, %c0_122] : memref<150x256xf32, #tpu.memory_space<vmem>>, vector<6x256xf32>
    tpu.vector_store %arg17[%c42, %c0_122], %103 {strides = array<i32>} : memref<150x256xf32, #tpu.memory_space<vmem>>, vector<6x256xf32>,
    %c0_123 = arith.constant 0 : index
    %c19_124 = arith.constant 19 : index
    %105 = vector.load %arg16[%c0_123, %c19_124] : memref<6x384xf32, #tpu.memory_space<vmem>>, vector<6x256xf32>
    %c48 = arith.constant 48 : index
    %c0_125 = arith.constant 0 : index
    %106 = vector.load %arg17[%c48, %c0_125] : memref<150x256xf32, #tpu.memory_space<vmem>>, vector<6x256xf32>
    tpu.vector_store %arg17[%c48, %c0_125], %105 {strides = array<i32>} : memref<150x256xf32, #tpu.memory_space<vmem>>, vector<6x256xf32>,
    %c0_126 = arith.constant 0 : index
    %c20_127 = arith.constant 20 : index
    %107 = vector.load %arg16[%c0_126, %c20_127] : memref<6x384xf32, #tpu.memory_space<vmem>>, vector<6x256xf32>
    %c54 = arith.constant 54 : index
    %c0_128 = arith.constant 0 : index
    %108 = vector.load %arg17[%c54, %c0_128] : memref<150x256xf32, #tpu.memory_space<vmem>>, vector<6x256xf32>
    tpu.vector_store %arg17[%c54, %c0_128], %107 {strides = array<i32>} : memref<150x256xf32, #tpu.memory_space<vmem>>, vector<6x256xf32>,
    %c0_129 = arith.constant 0 : index
    %c32_130 = arith.constant 32 : index
    %109 = vector.load %arg16[%c0_129, %c32_130] : memref<6x384xf32, #tpu.memory_space<vmem>>, vector<6x256xf32>
    %c60 = arith.constant 60 : index
    %c0_131 = arith.constant 0 : index
    %110 = vector.load %arg17[%c60, %c0_131] : memref<150x256xf32, #tpu.memory_space<vmem>>, vector<6x256xf32>
    tpu.vector_store %arg17[%c60, %c0_131], %109 {strides = array<i32>} : memref<150x256xf32, #tpu.memory_space<vmem>>, vector<6x256xf32>,
    %c0_132 = arith.constant 0 : index
    %c33_133 = arith.constant 33 : index
    %111 = vector.load %arg16[%c0_132, %c33_133] : memref<6x384xf32, #tpu.memory_space<vmem>>, vector<6x256xf32>
    %c66_134 = arith.constant 66 : index
    %c0_135 = arith.constant 0 : index
    %112 = vector.load %arg17[%c66_134, %c0_135] : memref<150x256xf32, #tpu.memory_space<vmem>>, vector<6x256xf32>
    tpu.vector_store %arg17[%c66_134, %c0_135], %111 {strides = array<i32>} : memref<150x256xf32, #tpu.memory_space<vmem>>, vector<6x256xf32>,
    %c0_136 = arith.constant 0 : index
    %c34_137 = arith.constant 34 : index
    %113 = vector.load %arg16[%c0_136, %c34_137] : memref<6x384xf32, #tpu.memory_space<vmem>>, vector<6x256xf32>
    %c72 = arith.constant 72 : index
    %c0_138 = arith.constant 0 : index
    %114 = vector.load %arg17[%c72, %c0_138] : memref<150x256xf32, #tpu.memory_space<vmem>>, vector<6x256xf32>
    tpu.vector_store %arg17[%c72, %c0_138], %113 {strides = array<i32>} : memref<150x256xf32, #tpu.memory_space<vmem>>, vector<6x256xf32>,
    %c0_139 = arith.constant 0 : index
    %c35_140 = arith.constant 35 : index
    %115 = vector.load %arg16[%c0_139, %c35_140] : memref<6x384xf32, #tpu.memory_space<vmem>>, vector<6x256xf32>
    %c78 = arith.constant 78 : index
    %c0_141 = arith.constant 0 : index
    %116 = vector.load %arg17[%c78, %c0_141] : memref<150x256xf32, #tpu.memory_space<vmem>>, vector<6x256xf32>
    tpu.vector_store %arg17[%c78, %c0_141], %115 {strides = array<i32>} : memref<150x256xf32, #tpu.memory_space<vmem>>, vector<6x256xf32>,
    %c0_142 = arith.constant 0 : index
    %c36_143 = arith.constant 36 : index
    %117 = vector.load %arg16[%c0_142, %c36_143] : memref<6x384xf32, #tpu.memory_space<vmem>>, vector<6x256xf32>
    %c84 = arith.constant 84 : index
    %c0_144 = arith.constant 0 : index
    %118 = vector.load %arg17[%c84, %c0_144] : memref<150x256xf32, #tpu.memory_space<vmem>>, vector<6x256xf32>
    tpu.vector_store %arg17[%c84, %c0_144], %117 {strides = array<i32>} : memref<150x256xf32, #tpu.memory_space<vmem>>, vector<6x256xf32>,
    %c0_145 = arith.constant 0 : index
    %c48_146 = arith.constant 48 : index
    %119 = vector.load %arg16[%c0_145, %c48_146] : memref<6x384xf32, #tpu.memory_space<vmem>>, vector<6x256xf32>
    %c90 = arith.constant 90 : index
    %c0_147 = arith.constant 0 : index
    %120 = vector.load %arg17[%c90, %c0_147] : memref<150x256xf32, #tpu.memory_space<vmem>>, vector<6x256xf32>
    tpu.vector_store %arg17[%c90, %c0_147], %119 {strides = array<i32>} : memref<150x256xf32, #tpu.memory_space<vmem>>, vector<6x256xf32>,
    %c0_148 = arith.constant 0 : index
    %c49 = arith.constant 49 : index
    %121 = vector.load %arg16[%c0_148, %c49] : memref<6x384xf32, #tpu.memory_space<vmem>>, vector<6x256xf32>
    %c96_149 = arith.constant 96 : index
    %c0_150 = arith.constant 0 : index
    %122 = vector.load %arg17[%c96_149, %c0_150] : memref<150x256xf32, #tpu.memory_space<vmem>>, vector<6x256xf32>
    tpu.vector_store %arg17[%c96_149, %c0_150], %121 {strides = array<i32>} : memref<150x256xf32, #tpu.memory_space<vmem>>, vector<6x256xf32>,
    %c0_151 = arith.constant 0 : index
    %c50 = arith.constant 50 : index
    %123 = vector.load %arg16[%c0_151, %c50] : memref<6x384xf32, #tpu.memory_space<vmem>>, vector<6x256xf32>
    %c102 = arith.constant 102 : index
    %c0_152 = arith.constant 0 : index
    %124 = vector.load %arg17[%c102, %c0_152] : memref<150x256xf32, #tpu.memory_space<vmem>>, vector<6x256xf32>
    tpu.vector_store %arg17[%c102, %c0_152], %123 {strides = array<i32>} : memref<150x256xf32, #tpu.memory_space<vmem>>, vector<6x256xf32>,
    %c0_153 = arith.constant 0 : index
    %c51 = arith.constant 51 : index
    %125 = vector.load %arg16[%c0_153, %c51] : memref<6x384xf32, #tpu.memory_space<vmem>>, vector<6x256xf32>
    %c108 = arith.constant 108 : index
    %c0_154 = arith.constant 0 : index
    %126 = vector.load %arg17[%c108, %c0_154] : memref<150x256xf32, #tpu.memory_space<vmem>>, vector<6x256xf32>
    tpu.vector_store %arg17[%c108, %c0_154], %125 {strides = array<i32>} : memref<150x256xf32, #tpu.memory_space<vmem>>, vector<6x256xf32>,
    %c0_155 = arith.constant 0 : index
    %c52 = arith.constant 52 : index
    %127 = vector.load %arg16[%c0_155, %c52] : memref<6x384xf32, #tpu.memory_space<vmem>>, vector<6x256xf32>
    %c114 = arith.constant 114 : index
    %c0_156 = arith.constant 0 : index
    %128 = vector.load %arg17[%c114, %c0_156] : memref<150x256xf32, #tpu.memory_space<vmem>>, vector<6x256xf32>
    tpu.vector_store %arg17[%c114, %c0_156], %127 {strides = array<i32>} : memref<150x256xf32, #tpu.memory_space<vmem>>, vector<6x256xf32>,
    %c0_157 = arith.constant 0 : index
    %c64_158 = arith.constant 64 : index
    %129 = vector.load %arg16[%c0_157, %c64_158] : memref<6x384xf32, #tpu.memory_space<vmem>>, vector<6x256xf32>
    %c120 = arith.constant 120 : index
    %c0_159 = arith.constant 0 : index
    %130 = vector.load %arg17[%c120, %c0_159] : memref<150x256xf32, #tpu.memory_space<vmem>>, vector<6x256xf32>
    tpu.vector_store %arg17[%c120, %c0_159], %129 {strides = array<i32>} : memref<150x256xf32, #tpu.memory_space<vmem>>, vector<6x256xf32>,
    %c0_160 = arith.constant 0 : index
    %c65_161 = arith.constant 65 : index
    %131 = vector.load %arg16[%c0_160, %c65_161] : memref<6x384xf32, #tpu.memory_space<vmem>>, vector<6x256xf32>
    %c126 = arith.constant 126 : index
    %c0_162 = arith.constant 0 : index
    %132 = vector.load %arg17[%c126, %c0_162] : memref<150x256xf32, #tpu.memory_space<vmem>>, vector<6x256xf32>
    tpu.vector_store %arg17[%c126, %c0_162], %131 {strides = array<i32>} : memref<150x256xf32, #tpu.memory_space<vmem>>, vector<6x256xf32>,
    %c0_163 = arith.constant 0 : index
    %c66_164 = arith.constant 66 : index
    %133 = vector.load %arg16[%c0_163, %c66_164] : memref<6x384xf32, #tpu.memory_space<vmem>>, vector<6x256xf32>
    %c132_165 = arith.constant 132 : index
    %c0_166 = arith.constant 0 : index
    %134 = vector.load %arg17[%c132_165, %c0_166] : memref<150x256xf32, #tpu.memory_space<vmem>>, vector<6x256xf32>
    tpu.vector_store %arg17[%c132_165, %c0_166], %133 {strides = array<i32>} : memref<150x256xf32, #tpu.memory_space<vmem>>, vector<6x256xf32>,
    %c0_167 = arith.constant 0 : index
    %c67_168 = arith.constant 67 : index
    %135 = vector.load %arg16[%c0_167, %c67_168] : memref<6x384xf32, #tpu.memory_space<vmem>>, vector<6x256xf32>
    %c138 = arith.constant 138 : index
    %c0_169 = arith.constant 0 : index
    %136 = vector.load %arg17[%c138, %c0_169] : memref<150x256xf32, #tpu.memory_space<vmem>>, vector<6x256xf32>
    tpu.vector_store %arg17[%c138, %c0_169], %135 {strides = array<i32>} : memref<150x256xf32, #tpu.memory_space<vmem>>, vector<6x256xf32>,
    %c0_170 = arith.constant 0 : index
    %c68_171 = arith.constant 68 : index
    %137 = vector.load %arg16[%c0_170, %c68_171] : memref<6x384xf32, #tpu.memory_space<vmem>>, vector<6x256xf32>
    %c144 = arith.constant 144 : index
    %c0_172 = arith.constant 0 : index
    %138 = vector.load %arg17[%c144, %c0_172] : memref<150x256xf32, #tpu.memory_space<vmem>>, vector<6x256xf32>
    tpu.vector_store %arg17[%c144, %c0_172], %137 {strides = array<i32>} : memref<150x256xf32, #tpu.memory_space<vmem>>, vector<6x256xf32>,
    %c0_173 = arith.constant 0 : index
    %c0_174 = arith.constant 0 : index
    %139 = vector.load %arg4[%c0_173, %c0_174] : memref<16x150xbf16, #tpu.memory_space<vmem>>, vector<16x150xbf16>
    %c0_175 = arith.constant 0 : index
    %c0_176 = arith.constant 0 : index
    %140 = vector.load %arg17[%c0_175, %c0_176] : memref<150x256xf32, #tpu.memory_space<vmem>>, vector<150x256xf32>
    %141 = arith.truncf %140 : vector<150x256xf32> to vector<150x256xbf16>
    %cst_177 = arith.constant dense<0.000000e+00> : vector<16x256xf32>
    %142 = tpu.matmul %139, %141, %cst_177 {dimension_numbers = #tpu.dot_dimension_numbers<[1], [0], [0], [1], [0, 0, 1, 1], [], []>} : vector<16x150xbf16>, vector<150x256xbf16>, vector<16x256xf32> -> vector<16x256xf32>
    %c0_178 = arith.constant 0 : index
    %c0_179 = arith.constant 0 : index
    %143 = vector.load %arg5[%c0_178, %c0_179] : memref<16x1xf32, #tpu.memory_space<vmem>>, vector<16x1xf32>
    %144 = vector.broadcast %143 : vector<16x1xf32> to vector<16x256xf32>
    %145 = arith.addf %142, %144 : vector<16x256xf32>
    %146 = math.tanh %145 : vector<16x256xf32>
    %147 = arith.truncf %146 : vector<16x256xf32> to vector<16x256xbf16>
    %c0_180 = arith.constant 0 : index
    %c0_181 = arith.constant 0 : index
    %148 = vector.load %arg13[%c0_180, %c0_181] : memref<256x25xbf16, #tpu.memory_space<vmem>>, vector<256x25xbf16>
    %cst_182 = arith.constant dense<0.000000e+00> : vector<16x25xf32>
    %149 = tpu.matmul %147, %148, %cst_182 {dimension_numbers = #tpu.dot_dimension_numbers<[1], [0], [0], [1], [0, 0, 1, 1], [], []>} : vector<16x256xbf16>, vector<256x25xbf16>, vector<16x25xf32> -> vector<16x25xf32>
    %150 = arith.truncf %149 : vector<16x25xf32> to vector<16x25xbf16>
    %c0_183 = arith.constant 0 : index
    %c0_184 = arith.constant 0 : index
    %151 = vector.load %arg7[%c0_183, %c0_184] : memref<120x1xf32, #tpu.memory_space<vmem>>, vector<120x1xf32>
    %c0_185 = arith.constant 0 : index
    %c0_186 = arith.constant 0 : index
    %152 = vector.load %arg6[%c0_185, %c0_186] : memref<120x400xbf16, #tpu.memory_space<vmem>>, vector<120x16xbf16>
    %153 = vector.extract_strided_slice %150 {offsets = [0, 0], sizes = [16, 1], strides = [1, 1]} : vector<16x25xbf16> to vector<16x1xbf16>
    %cst_187 = arith.constant dense<0.000000e+00> : vector<120x1xf32>
    %154 = tpu.matmul %152, %153, %cst_187 {dimension_numbers = #tpu.dot_dimension_numbers<[1], [0], [0], [1], [0, 0, 1, 1], [], []>} : vector<120x16xbf16>, vector<16x1xbf16>, vector<120x1xf32> -> vector<120x1xf32>
    %155 = arith.addf %151, %154 : vector<120x1xf32>
    %c0_188 = arith.constant 0 : index
    %c16_189 = arith.constant 16 : index
    %156 = vector.load %arg6[%c0_188, %c16_189] : memref<120x400xbf16, #tpu.memory_space<vmem>>, vector<120x16xbf16>
    %157 = vector.extract_strided_slice %150 {offsets = [0, 1], sizes = [16, 1], strides = [1, 1]} : vector<16x25xbf16> to vector<16x1xbf16>
    %cst_190 = arith.constant dense<0.000000e+00> : vector<120x1xf32>
    %158 = tpu.matmul %156, %157, %cst_190 {dimension_numbers = #tpu.dot_dimension_numbers<[1], [0], [0], [1], [0, 0, 1, 1], [], []>} : vector<120x16xbf16>, vector<16x1xbf16>, vector<120x1xf32> -> vector<120x1xf32>
    %159 = arith.addf %155, %158 : vector<120x1xf32>
    %c0_191 = arith.constant 0 : index
    %c32_192 = arith.constant 32 : index
    %160 = vector.load %arg6[%c0_191, %c32_192] : memref<120x400xbf16, #tpu.memory_space<vmem>>, vector<120x16xbf16>
    %161 = vector.extract_strided_slice %150 {offsets = [0, 2], sizes = [16, 1], strides = [1, 1]} : vector<16x25xbf16> to vector<16x1xbf16>
    %cst_193 = arith.constant dense<0.000000e+00> : vector<120x1xf32>
    %162 = tpu.matmul %160, %161, %cst_193 {dimension_numbers = #tpu.dot_dimension_numbers<[1], [0], [0], [1], [0, 0, 1, 1], [], []>} : vector<120x16xbf16>, vector<16x1xbf16>, vector<120x1xf32> -> vector<120x1xf32>
    %163 = arith.addf %159, %162 : vector<120x1xf32>
    %c0_194 = arith.constant 0 : index
    %c48_195 = arith.constant 48 : index
    %164 = vector.load %arg6[%c0_194, %c48_195] : memref<120x400xbf16, #tpu.memory_space<vmem>>, vector<120x16xbf16>
    %165 = vector.extract_strided_slice %150 {offsets = [0, 3], sizes = [16, 1], strides = [1, 1]} : vector<16x25xbf16> to vector<16x1xbf16>
    %cst_196 = arith.constant dense<0.000000e+00> : vector<120x1xf32>
    %166 = tpu.matmul %164, %165, %cst_196 {dimension_numbers = #tpu.dot_dimension_numbers<[1], [0], [0], [1], [0, 0, 1, 1], [], []>} : vector<120x16xbf16>, vector<16x1xbf16>, vector<120x1xf32> -> vector<120x1xf32>
    %167 = arith.addf %163, %166 : vector<120x1xf32>
    %c0_197 = arith.constant 0 : index
    %c64_198 = arith.constant 64 : index
    %168 = vector.load %arg6[%c0_197, %c64_198] : memref<120x400xbf16, #tpu.memory_space<vmem>>, vector<120x16xbf16>
    %169 = vector.extract_strided_slice %150 {offsets = [0, 4], sizes = [16, 1], strides = [1, 1]} : vector<16x25xbf16> to vector<16x1xbf16>
    %cst_199 = arith.constant dense<0.000000e+00> : vector<120x1xf32>
    %170 = tpu.matmul %168, %169, %cst_199 {dimension_numbers = #tpu.dot_dimension_numbers<[1], [0], [0], [1], [0, 0, 1, 1], [], []>} : vector<120x16xbf16>, vector<16x1xbf16>, vector<120x1xf32> -> vector<120x1xf32>
    %171 = arith.addf %167, %170 : vector<120x1xf32>
    %c0_200 = arith.constant 0 : index
    %c80 = arith.constant 80 : index
    %172 = vector.load %arg6[%c0_200, %c80] : memref<120x400xbf16, #tpu.memory_space<vmem>>, vector<120x16xbf16>
    %173 = vector.extract_strided_slice %150 {offsets = [0, 5], sizes = [16, 1], strides = [1, 1]} : vector<16x25xbf16> to vector<16x1xbf16>
    %cst_201 = arith.constant dense<0.000000e+00> : vector<120x1xf32>
    %174 = tpu.matmul %172, %173, %cst_201 {dimension_numbers = #tpu.dot_dimension_numbers<[1], [0], [0], [1], [0, 0, 1, 1], [], []>} : vector<120x16xbf16>, vector<16x1xbf16>, vector<120x1xf32> -> vector<120x1xf32>
    %175 = arith.addf %171, %174 : vector<120x1xf32>
    %c0_202 = arith.constant 0 : index
    %c96_203 = arith.constant 96 : index
    %176 = vector.load %arg6[%c0_202, %c96_203] : memref<120x400xbf16, #tpu.memory_space<vmem>>, vector<120x16xbf16>
    %177 = vector.extract_strided_slice %150 {offsets = [0, 6], sizes = [16, 1], strides = [1, 1]} : vector<16x25xbf16> to vector<16x1xbf16>
    %cst_204 = arith.constant dense<0.000000e+00> : vector<120x1xf32>
    %178 = tpu.matmul %176, %177, %cst_204 {dimension_numbers = #tpu.dot_dimension_numbers<[1], [0], [0], [1], [0, 0, 1, 1], [], []>} : vector<120x16xbf16>, vector<16x1xbf16>, vector<120x1xf32> -> vector<120x1xf32>
    %179 = arith.addf %175, %178 : vector<120x1xf32>
    %c0_205 = arith.constant 0 : index
    %c112 = arith.constant 112 : index
    %180 = vector.load %arg6[%c0_205, %c112] : memref<120x400xbf16, #tpu.memory_space<vmem>>, vector<120x16xbf16>
    %181 = vector.extract_strided_slice %150 {offsets = [0, 7], sizes = [16, 1], strides = [1, 1]} : vector<16x25xbf16> to vector<16x1xbf16>
    %cst_206 = arith.constant dense<0.000000e+00> : vector<120x1xf32>
    %182 = tpu.matmul %180, %181, %cst_206 {dimension_numbers = #tpu.dot_dimension_numbers<[1], [0], [0], [1], [0, 0, 1, 1], [], []>} : vector<120x16xbf16>, vector<16x1xbf16>, vector<120x1xf32> -> vector<120x1xf32>
    %183 = arith.addf %179, %182 : vector<120x1xf32>
    %c0_207 = arith.constant 0 : index
    %c128_208 = arith.constant 128 : index
    %184 = vector.load %arg6[%c0_207, %c128_208] : memref<120x400xbf16, #tpu.memory_space<vmem>>, vector<120x16xbf16>
    %185 = vector.extract_strided_slice %150 {offsets = [0, 8], sizes = [16, 1], strides = [1, 1]} : vector<16x25xbf16> to vector<16x1xbf16>
    %cst_209 = arith.constant dense<0.000000e+00> : vector<120x1xf32>
    %186 = tpu.matmul %184, %185, %cst_209 {dimension_numbers = #tpu.dot_dimension_numbers<[1], [0], [0], [1], [0, 0, 1, 1], [], []>} : vector<120x16xbf16>, vector<16x1xbf16>, vector<120x1xf32> -> vector<120x1xf32>
    %187 = arith.addf %183, %186 : vector<120x1xf32>
    %c0_210 = arith.constant 0 : index
    %c144_211 = arith.constant 144 : index
    %188 = vector.load %arg6[%c0_210, %c144_211] : memref<120x400xbf16, #tpu.memory_space<vmem>>, vector<120x16xbf16>
    %189 = vector.extract_strided_slice %150 {offsets = [0, 9], sizes = [16, 1], strides = [1, 1]} : vector<16x25xbf16> to vector<16x1xbf16>
    %cst_212 = arith.constant dense<0.000000e+00> : vector<120x1xf32>
    %190 = tpu.matmul %188, %189, %cst_212 {dimension_numbers = #tpu.dot_dimension_numbers<[1], [0], [0], [1], [0, 0, 1, 1], [], []>} : vector<120x16xbf16>, vector<16x1xbf16>, vector<120x1xf32> -> vector<120x1xf32>
    %191 = arith.addf %187, %190 : vector<120x1xf32>
    %c0_213 = arith.constant 0 : index
    %c160 = arith.constant 160 : index
    %192 = vector.load %arg6[%c0_213, %c160] : memref<120x400xbf16, #tpu.memory_space<vmem>>, vector<120x16xbf16>
    %193 = vector.extract_strided_slice %150 {offsets = [0, 10], sizes = [16, 1], strides = [1, 1]} : vector<16x25xbf16> to vector<16x1xbf16>
    %cst_214 = arith.constant dense<0.000000e+00> : vector<120x1xf32>
    %194 = tpu.matmul %192, %193, %cst_214 {dimension_numbers = #tpu.dot_dimension_numbers<[1], [0], [0], [1], [0, 0, 1, 1], [], []>} : vector<120x16xbf16>, vector<16x1xbf16>, vector<120x1xf32> -> vector<120x1xf32>
    %195 = arith.addf %191, %194 : vector<120x1xf32>
    %c0_215 = arith.constant 0 : index
    %c176 = arith.constant 176 : index
    %196 = vector.load %arg6[%c0_215, %c176] : memref<120x400xbf16, #tpu.memory_space<vmem>>, vector<120x16xbf16>
    %197 = vector.extract_strided_slice %150 {offsets = [0, 11], sizes = [16, 1], strides = [1, 1]} : vector<16x25xbf16> to vector<16x1xbf16>
    %cst_216 = arith.constant dense<0.000000e+00> : vector<120x1xf32>
    %198 = tpu.matmul %196, %197, %cst_216 {dimension_numbers = #tpu.dot_dimension_numbers<[1], [0], [0], [1], [0, 0, 1, 1], [], []>} : vector<120x16xbf16>, vector<16x1xbf16>, vector<120x1xf32> -> vector<120x1xf32>
    %199 = arith.addf %195, %198 : vector<120x1xf32>
    %c0_217 = arith.constant 0 : index
    %c192 = arith.constant 192 : index
    %200 = vector.load %arg6[%c0_217, %c192] : memref<120x400xbf16, #tpu.memory_space<vmem>>, vector<120x16xbf16>
    %201 = vector.extract_strided_slice %150 {offsets = [0, 12], sizes = [16, 1], strides = [1, 1]} : vector<16x25xbf16> to vector<16x1xbf16>
    %cst_218 = arith.constant dense<0.000000e+00> : vector<120x1xf32>
    %202 = tpu.matmul %200, %201, %cst_218 {dimension_numbers = #tpu.dot_dimension_numbers<[1], [0], [0], [1], [0, 0, 1, 1], [], []>} : vector<120x16xbf16>, vector<16x1xbf16>, vector<120x1xf32> -> vector<120x1xf32>
    %203 = arith.addf %199, %202 : vector<120x1xf32>
    %c0_219 = arith.constant 0 : index
    %c208 = arith.constant 208 : index
    %204 = vector.load %arg6[%c0_219, %c208] : memref<120x400xbf16, #tpu.memory_space<vmem>>, vector<120x16xbf16>
    %205 = vector.extract_strided_slice %150 {offsets = [0, 13], sizes = [16, 1], strides = [1, 1]} : vector<16x25xbf16> to vector<16x1xbf16>
    %cst_220 = arith.constant dense<0.000000e+00> : vector<120x1xf32>
    %206 = tpu.matmul %204, %205, %cst_220 {dimension_numbers = #tpu.dot_dimension_numbers<[1], [0], [0], [1], [0, 0, 1, 1], [], []>} : vector<120x16xbf16>, vector<16x1xbf16>, vector<120x1xf32> -> vector<120x1xf32>
    %207 = arith.addf %203, %206 : vector<120x1xf32>
    %c0_221 = arith.constant 0 : index
    %c224 = arith.constant 224 : index
    %208 = vector.load %arg6[%c0_221, %c224] : memref<120x400xbf16, #tpu.memory_space<vmem>>, vector<120x16xbf16>
    %209 = vector.extract_strided_slice %150 {offsets = [0, 14], sizes = [16, 1], strides = [1, 1]} : vector<16x25xbf16> to vector<16x1xbf16>
    %cst_222 = arith.constant dense<0.000000e+00> : vector<120x1xf32>
    %210 = tpu.matmul %208, %209, %cst_222 {dimension_numbers = #tpu.dot_dimension_numbers<[1], [0], [0], [1], [0, 0, 1, 1], [], []>} : vector<120x16xbf16>, vector<16x1xbf16>, vector<120x1xf32> -> vector<120x1xf32>
    %211 = arith.addf %207, %210 : vector<120x1xf32>
    %c0_223 = arith.constant 0 : index
    %c240 = arith.constant 240 : index
    %212 = vector.load %arg6[%c0_223, %c240] : memref<120x400xbf16, #tpu.memory_space<vmem>>, vector<120x16xbf16>
    %213 = vector.extract_strided_slice %150 {offsets = [0, 15], sizes = [16, 1], strides = [1, 1]} : vector<16x25xbf16> to vector<16x1xbf16>
    %cst_224 = arith.constant dense<0.000000e+00> : vector<120x1xf32>
    %214 = tpu.matmul %212, %213, %cst_224 {dimension_numbers = #tpu.dot_dimension_numbers<[1], [0], [0], [1], [0, 0, 1, 1], [], []>} : vector<120x16xbf16>, vector<16x1xbf16>, vector<120x1xf32> -> vector<120x1xf32>
    %215 = arith.addf %211, %214 : vector<120x1xf32>
    %c0_225 = arith.constant 0 : index
    %c256_226 = arith.constant 256 : index
    %216 = vector.load %arg6[%c0_225, %c256_226] : memref<120x400xbf16, #tpu.memory_space<vmem>>, vector<120x16xbf16>
    %217 = vector.extract_strided_slice %150 {offsets = [0, 16], sizes = [16, 1], strides = [1, 1]} : vector<16x25xbf16> to vector<16x1xbf16>
    %cst_227 = arith.constant dense<0.000000e+00> : vector<120x1xf32>
    %218 = tpu.matmul %216, %217, %cst_227 {dimension_numbers = #tpu.dot_dimension_numbers<[1], [0], [0], [1], [0, 0, 1, 1], [], []>} : vector<120x16xbf16>, vector<16x1xbf16>, vector<120x1xf32> -> vector<120x1xf32>
    %219 = arith.addf %215, %218 : vector<120x1xf32>
    %c0_228 = arith.constant 0 : index
    %c272 = arith.constant 272 : index
    %220 = vector.load %arg6[%c0_228, %c272] : memref<120x400xbf16, #tpu.memory_space<vmem>>, vector<120x16xbf16>
    %221 = vector.extract_strided_slice %150 {offsets = [0, 17], sizes = [16, 1], strides = [1, 1]} : vector<16x25xbf16> to vector<16x1xbf16>
    %cst_229 = arith.constant dense<0.000000e+00> : vector<120x1xf32>
    %222 = tpu.matmul %220, %221, %cst_229 {dimension_numbers = #tpu.dot_dimension_numbers<[1], [0], [0], [1], [0, 0, 1, 1], [], []>} : vector<120x16xbf16>, vector<16x1xbf16>, vector<120x1xf32> -> vector<120x1xf32>
    %223 = arith.addf %219, %222 : vector<120x1xf32>
    %c0_230 = arith.constant 0 : index
    %c288 = arith.constant 288 : index
    %224 = vector.load %arg6[%c0_230, %c288] : memref<120x400xbf16, #tpu.memory_space<vmem>>, vector<120x16xbf16>
    %225 = vector.extract_strided_slice %150 {offsets = [0, 18], sizes = [16, 1], strides = [1, 1]} : vector<16x25xbf16> to vector<16x1xbf16>
    %cst_231 = arith.constant dense<0.000000e+00> : vector<120x1xf32>
    %226 = tpu.matmul %224, %225, %cst_231 {dimension_numbers = #tpu.dot_dimension_numbers<[1], [0], [0], [1], [0, 0, 1, 1], [], []>} : vector<120x16xbf16>, vector<16x1xbf16>, vector<120x1xf32> -> vector<120x1xf32>
    %227 = arith.addf %223, %226 : vector<120x1xf32>
    %c0_232 = arith.constant 0 : index
    %c304 = arith.constant 304 : index
    %228 = vector.load %arg6[%c0_232, %c304] : memref<120x400xbf16, #tpu.memory_space<vmem>>, vector<120x16xbf16>
    %229 = vector.extract_strided_slice %150 {offsets = [0, 19], sizes = [16, 1], strides = [1, 1]} : vector<16x25xbf16> to vector<16x1xbf16>
    %cst_233 = arith.constant dense<0.000000e+00> : vector<120x1xf32>
    %230 = tpu.matmul %228, %229, %cst_233 {dimension_numbers = #tpu.dot_dimension_numbers<[1], [0], [0], [1], [0, 0, 1, 1], [], []>} : vector<120x16xbf16>, vector<16x1xbf16>, vector<120x1xf32> -> vector<120x1xf32>
    %231 = arith.addf %227, %230 : vector<120x1xf32>
    %c0_234 = arith.constant 0 : index
    %c320 = arith.constant 320 : index
    %232 = vector.load %arg6[%c0_234, %c320] : memref<120x400xbf16, #tpu.memory_space<vmem>>, vector<120x16xbf16>
    %233 = vector.extract_strided_slice %150 {offsets = [0, 20], sizes = [16, 1], strides = [1, 1]} : vector<16x25xbf16> to vector<16x1xbf16>
    %cst_235 = arith.constant dense<0.000000e+00> : vector<120x1xf32>
    %234 = tpu.matmul %232, %233, %cst_235 {dimension_numbers = #tpu.dot_dimension_numbers<[1], [0], [0], [1], [0, 0, 1, 1], [], []>} : vector<120x16xbf16>, vector<16x1xbf16>, vector<120x1xf32> -> vector<120x1xf32>
    %235 = arith.addf %231, %234 : vector<120x1xf32>
    %c0_236 = arith.constant 0 : index
    %c336 = arith.constant 336 : index
    %236 = vector.load %arg6[%c0_236, %c336] : memref<120x400xbf16, #tpu.memory_space<vmem>>, vector<120x16xbf16>
    %237 = vector.extract_strided_slice %150 {offsets = [0, 21], sizes = [16, 1], strides = [1, 1]} : vector<16x25xbf16> to vector<16x1xbf16>
    %cst_237 = arith.constant dense<0.000000e+00> : vector<120x1xf32>
    %238 = tpu.matmul %236, %237, %cst_237 {dimension_numbers = #tpu.dot_dimension_numbers<[1], [0], [0], [1], [0, 0, 1, 1], [], []>} : vector<120x16xbf16>, vector<16x1xbf16>, vector<120x1xf32> -> vector<120x1xf32>
    %239 = arith.addf %235, %238 : vector<120x1xf32>
    %c0_238 = arith.constant 0 : index
    %c352 = arith.constant 352 : index
    %240 = vector.load %arg6[%c0_238, %c352] : memref<120x400xbf16, #tpu.memory_space<vmem>>, vector<120x16xbf16>
    %241 = vector.extract_strided_slice %150 {offsets = [0, 22], sizes = [16, 1], strides = [1, 1]} : vector<16x25xbf16> to vector<16x1xbf16>
    %cst_239 = arith.constant dense<0.000000e+00> : vector<120x1xf32>
    %242 = tpu.matmul %240, %241, %cst_239 {dimension_numbers = #tpu.dot_dimension_numbers<[1], [0], [0], [1], [0, 0, 1, 1], [], []>} : vector<120x16xbf16>, vector<16x1xbf16>, vector<120x1xf32> -> vector<120x1xf32>
    %243 = arith.addf %239, %242 : vector<120x1xf32>
    %c0_240 = arith.constant 0 : index
    %c368 = arith.constant 368 : index
    %244 = vector.load %arg6[%c0_240, %c368] : memref<120x400xbf16, #tpu.memory_space<vmem>>, vector<120x16xbf16>
    %245 = vector.extract_strided_slice %150 {offsets = [0, 23], sizes = [16, 1], strides = [1, 1]} : vector<16x25xbf16> to vector<16x1xbf16>
    %cst_241 = arith.constant dense<0.000000e+00> : vector<120x1xf32>
    %246 = tpu.matmul %244, %245, %cst_241 {dimension_numbers = #tpu.dot_dimension_numbers<[1], [0], [0], [1], [0, 0, 1, 1], [], []>} : vector<120x16xbf16>, vector<16x1xbf16>, vector<120x1xf32> -> vector<120x1xf32>
    %247 = arith.addf %243, %246 : vector<120x1xf32>
    %c0_242 = arith.constant 0 : index
    %c384 = arith.constant 384 : index
    %248 = vector.load %arg6[%c0_242, %c384] : memref<120x400xbf16, #tpu.memory_space<vmem>>, vector<120x16xbf16>
    %249 = vector.extract_strided_slice %150 {offsets = [0, 24], sizes = [16, 1], strides = [1, 1]} : vector<16x25xbf16> to vector<16x1xbf16>
    %cst_243 = arith.constant dense<0.000000e+00> : vector<120x1xf32>
    %250 = tpu.matmul %248, %249, %cst_243 {dimension_numbers = #tpu.dot_dimension_numbers<[1], [0], [0], [1], [0, 0, 1, 1], [], []>} : vector<120x16xbf16>, vector<16x1xbf16>, vector<120x1xf32> -> vector<120x1xf32>
    %251 = arith.addf %247, %250 : vector<120x1xf32>
    %252 = math.tanh %251 : vector<120x1xf32>
    %c0_244 = arith.constant 0 : index
    %c0_245 = arith.constant 0 : index
    %253 = vector.load %arg8[%c0_244, %c0_245] : memref<84x120xbf16, #tpu.memory_space<vmem>>, vector<84x120xbf16>
    %254 = arith.truncf %252 : vector<120x1xf32> to vector<120x1xbf16>
    %cst_246 = arith.constant dense<0.000000e+00> : vector<84x1xf32>
    %255 = tpu.matmul %253, %254, %cst_246 {dimension_numbers = #tpu.dot_dimension_numbers<[1], [0], [0], [1], [0, 0, 1, 1], [], []>} : vector<84x120xbf16>, vector<120x1xbf16>, vector<84x1xf32> -> vector<84x1xf32>
    %c0_247 = arith.constant 0 : index
    %c0_248 = arith.constant 0 : index
    %256 = vector.load %arg9[%c0_247, %c0_248] : memref<84x1xf32, #tpu.memory_space<vmem>>, vector<84x1xf32>
    %257 = arith.addf %255, %256 : vector<84x1xf32>
    %258 = math.tanh %257 : vector<84x1xf32>
    %c0_249 = arith.constant 0 : index
    %c0_250 = arith.constant 0 : index
    %259 = vector.load %arg10[%c0_249, %c0_250] : memref<10x84xbf16, #tpu.memory_space<vmem>>, vector<10x84xbf16>
    %260 = arith.truncf %258 : vector<84x1xf32> to vector<84x1xbf16>
    %cst_251 = arith.constant dense<0.000000e+00> : vector<10x1xf32>
    %261 = tpu.matmul %259, %260, %cst_251 {dimension_numbers = #tpu.dot_dimension_numbers<[1], [0], [0], [1], [0, 0, 1, 1], [], []>} : vector<10x84xbf16>, vector<84x1xbf16>, vector<10x1xf32> -> vector<10x1xf32>
    %c0_252 = arith.constant 0 : index
    %c0_253 = arith.constant 0 : index
    %262 = vector.load %arg11[%c0_252, %c0_253] : memref<10x1xf32, #tpu.memory_space<vmem>>, vector<10x1xf32>
    %263 = arith.addf %261, %262 : vector<10x1xf32>
    %c0_254 = arith.constant 0 : index
    %c0_255 = arith.constant 0 : index
    %c0_256 = arith.constant 0 : index
    %264 = vector.load %arg14[%c0_254, %c0_255, %c0_256] : memref<1x10x1xf32, #tpu.memory_space<vmem>>, vector<1x10x1xf32>
    %265 = vector.shape_cast %264 : vector<1x10x1xf32> to vector<10x1xf32>
    %266 = vector.shape_cast %263 : vector<10x1xf32> to vector<1x10x1xf32>
    tpu.vector_store %arg14[%c0_254, %c0_255, %c0_256], %266 {strides = array<i32>} : memref<1x10x1xf32, #tpu.memory_space<vmem>>, vector<1x10x1xf32>,
    return
  }
  func.func @transform_0(%arg0: i32) -> (i32, i32, i32) {
    %c0_i32 = arith.constant 0 : i32
    %c0_i32_0 = arith.constant 0 : i32
    %c0_i32_1 = arith.constant 0 : i32
    return %arg0, %c0_i32, %c0_i32_0 : i32, i32, i32
  }
  func.func @transform_1(%arg0: i32) -> (i32, i32) {
    %c0_i32 = arith.constant 0 : i32
    %c0_i32_0 = arith.constant 0 : i32
    %c0_i32_1 = arith.constant 0 : i32
    return %c0_i32, %c0_i32_0 : i32, i32
  }
  func.func @transform_2(%arg0: i32) -> (i32, i32) {
    %c0_i32 = arith.constant 0 : i32
    %c0_i32_0 = arith.constant 0 : i32
    %c0_i32_1 = arith.constant 0 : i32
    return %c0_i32, %c0_i32_0 : i32, i32
  }
  func.func @transform_3(%arg0: i32) -> (i32, i32) {
    %c0_i32 = arith.constant 0 : i32
    %c0_i32_0 = arith.constant 0 : i32
    %c0_i32_1 = arith.constant 0 : i32
    return %c0_i32, %c0_i32_0 : i32, i32
  }
  func.func @transform_4(%arg0: i32) -> (i32, i32) {
    %c0_i32 = arith.constant 0 : i32
    %c0_i32_0 = arith.constant 0 : i32
    %c0_i32_1 = arith.constant 0 : i32
    return %c0_i32, %c0_i32_0 : i32, i32
  }
  func.func @transform_5(%arg0: i32) -> (i32, i32) {
    %c0_i32 = arith.constant 0 : i32
    %c0_i32_0 = arith.constant 0 : i32
    %c0_i32_1 = arith.constant 0 : i32
    return %c0_i32, %c0_i32_0 : i32, i32
  }
  func.func @transform_6(%arg0: i32) -> (i32, i32) {
    %c0_i32 = arith.constant 0 : i32
    %c0_i32_0 = arith.constant 0 : i32
    %c0_i32_1 = arith.constant 0 : i32
    return %c0_i32, %c0_i32_0 : i32, i32
  }
  func.func @transform_7(%arg0: i32) -> (i32, i32) {
    %c0_i32 = arith.constant 0 : i32
    %c0_i32_0 = arith.constant 0 : i32
    %c0_i32_1 = arith.constant 0 : i32
    return %c0_i32, %c0_i32_0 : i32, i32
  }
  func.func @transform_8(%arg0: i32) -> (i32, i32) {
    %c0_i32 = arith.constant 0 : i32
    %c0_i32_0 = arith.constant 0 : i32
    %c0_i32_1 = arith.constant 0 : i32
    return %c0_i32, %c0_i32_0 : i32, i32
  }
  func.func @transform_9(%arg0: i32) -> (i32, i32) {
    %c0_i32 = arith.constant 0 : i32
    %c0_i32_0 = arith.constant 0 : i32
    %c0_i32_1 = arith.constant 0 : i32
    return %c0_i32, %c0_i32_0 : i32, i32
  }
  func.func @transform_10(%arg0: i32) -> (i32, i32) {
    %c0_i32 = arith.constant 0 : i32
    %c0_i32_0 = arith.constant 0 : i32
    %c0_i32_1 = arith.constant 0 : i32
    return %c0_i32, %c0_i32_0 : i32, i32
  }
  func.func @transform_11(%arg0: i32) -> (i32, i32) {
    %c0_i32 = arith.constant 0 : i32
    %c0_i32_0 = arith.constant 0 : i32
    %c0_i32_1 = arith.constant 0 : i32
    return %c0_i32, %c0_i32_0 : i32, i32
  }
  func.func @transform_12(%arg0: i32) -> (i32, i32) {
    %c0_i32 = arith.constant 0 : i32
    %c0_i32_0 = arith.constant 0 : i32
    %c0_i32_1 = arith.constant 0 : i32
    return %c0_i32, %c0_i32_0 : i32, i32
  }
  func.func @transform_13(%arg0: i32) -> (i32, i32, i32) {
    %c0_i32 = arith.constant 0 : i32
    %c0_i32_0 = arith.constant 0 : i32
    %c0_i32_1 = arith.constant 0 : i32
    return %arg0, %c0_i32, %c0_i32_0 : i32, i32, i32
  }
}

</mosaic_0001>

<bundles_post_ra>
// kernel: lenet5_forward.1
= control target key start
LH: loop header
LB: loop body
LE: loop exit
PB: predicated region body
PF: predicated region fallthrough
CT: control target
= control target key end

     0   :  { %s11505_s0 = inlined_call_operand.vmem [shape: f32[2,1,1280], index: 0, kind: input, shape index: {}]   ;;  %s11506_s1 = inlined_call_operand.vmem [shape: bf16[6,25], index: 1, kind: input, shape index: {}]   ;;  %s11507_s2 = inlined_call_operand.vmem [shape: f32[6,1], index: 2, kind: input, shape index: {}]   ;;  %s11508_s3 = inlined_call_operand.vmem [shape: bf16[16,150], index: 3, kind: input, shape index: {}]   ;;  %s11509_s4 = inlined_call_operand.vmem [shape: f32[16,1], index: 4, kind: input, shape index: {}]   ;;  %s11510_s5 = inlined_call_operand.vmem [shape: bf16[120,400], index: 5, kind: input, shape index: {}]   ;;  %s11511_s6 = inlined_call_operand.vmem [shape: f32[120,1], index: 6, kind: input, shape index: {}]   ;;  %s11512_s7 = inlined_call_operand.vmem [shape: bf16[84,120], index: 7, kind: input, shape index: {}]   ;;  %s11513_s8 = inlined_call_operand.vmem [shape: f32[84,1], index: 8, kind: input, shape index: {}]   ;;  %s11514_s9 = inlined_call_operand.hbm [shape: bf16[10,84], index: 9, kind: input, shape index: {}]   ;;  %s11515_s10 = inlined_call_operand.vmem [shape: f32[10,1], index: 10, kind: input, shape index: {}]   ;;  %s11516_s11 = inlined_call_operand.vmem [shape: bf16[1024,256], index: 11, kind: input, shape index: {}]   ;;  %s11517_s12 = inlined_call_operand.vmem [shape: bf16[256,25], index: 12, kind: input, shape index: {}]   ;;  %s11518_s13 = inlined_call_operand.vmem [shape: f32[2,10,1], index: 13, kind: output, shape index: {}]  }
   0x1   :  { %11574 = sst [smem:[#allocation19_spill]] %s11505_s0 }
   0x2   :  { %11575 = sst [smem:[#allocation20_spill]] %s11506_s1 }
   0x3   :  { %11576 = sst [smem:[#allocation21_spill]] %s11507_s2 }
   0x4   :  { %11577 = sst [smem:[#allocation22_spill]] %s11508_s3 }
   0x5   :  { %11578 = sst [smem:[#allocation23_spill]] %s11509_s4 }
   0x6   :  { %11579 = sst [smem:[#allocation24_spill]] %s11514_s9 }
   0x7   :  { %18 = vsyncpa [#allocation6], 0  ;;  %s9365_s25 = smov 0  }
   0x8 LB: > { %s9371_s26 = sadd.s32 4294967295, %s9240_s25   ;;  %p7221_p0 = scmp.ge.s32.totalorder %s9240_s25, 1  ;;  %s9240_s25 = sphi %s9365_s25, %s24_s25  }
   0x9   : > { %p333_p1 = scmp.lt.s32.totalorder %s9240_s25, 3  ;;  %s9242_s27 = smov [#allocation5]  }
   0xa   : > { %s369_s28 = sshll.u32 %s9242_s27, 4  ;;  %p11519_p3 = scmp.eq.s32.totalorder %s9371_s26, 0  ;;  %s370_s28 = int_to_ptr.vmem [resolvable:$true] %s369_s28 }
   0xb   : > { %p9375_p2 = pnand %p7221_p0, %p333_p1  ;;  %s11582_s9 = sld [smem:[#allocation24_spill]] }
   0xd   : > { %s11580_s29 = scalar_select %p9375_p2, 1, 0 }
   0xe   : > { %p8807_p4 = pneg %p9375_p2 }
  0x10   : > { %p9384_p5 = pnand %p11519_p3, %p8807_p4 }
  0x11   : > { %s9202_s16 = scalar_lea.hbm %s11582_s9, 128 }
  0x12   : > { %p9203_p6 = scmp.ne.s32.totalorder %s11582_s9, %s9202_s16  ;;  %p9204_p7 = pneg %p9384_p5 }
  0x13   : > { %p9209_p10 = scmp.lt.u32.totalorder %s9202_s16, %s11582_s9 }
  0x14   : > { %p9205_p8 = pnand %p9204_p7, %p9203_p6 }
  0x16   : > { %p9206_p9 = pneg %p9205_p8 }
  0x18   : > { %p9211_p11 = pnand %p9209_p10, %p9206_p9 }
  0x1a   : > { %9214 = shalt.err (!%p9211_p11)
}
  0x1b   : > { %s9215_s21 = scalar_lea.vmem %s370_s28, 128  ;;  %p9223_p1 = scmp.lt.s32.totalorder %s370_s28, %s370_s28 }
  0x1c   : > { %p9216_p12 = scmp.ne.s32.totalorder %s370_s28, %s9215_s21  ;;  %p9224_p4 = scmp.lt.s32.totalorder %s9215_s21, %s9215_s21 }
  0x1e   : > { %p9218_p13 = pnand %p9216_p12, %p9204_p7  ;;  %p9225_p3 = por %p9224_p4, %p9223_p1 }
  0x20   : > { %p9219_p0 = pneg %p9218_p13 }
  0x22   : > { %p9226_p2 = pnand %p9225_p3, %p9219_p0 }
  0x24   : > { %9229 = shalt.err (!%p9226_p2)
}
  0x25   : > { %s9243_s22 = smov 64   ;;  %s9244_s23 = smov 4  }
  0x26   : > { %8810 = dma.hbm_to_vmem [thread:$0]  (!%p9384_p5), %s11582_s9, 128, %s370_s28, [#allocation6], %s9243_s22, %s9243_s22, %s9244_s23  }
  0x27   : > { %p11583_p6 = scmp.ne.s32.totalorder %s11580_s29, 0 }
  0x29   : > { %401 = sbr.rel (%p11583_p6) target bundleno = 3001 (0xbb9), region = 72 }
  0x30   : > { %p11584_p8 = scmp.eq.s32.totalorder %s9371_s26, 0 }
  0x32   : > { %9235 = dma.done.wait (%p11584_p8), [#allocation6], 128   ;;  %p11585_p7 = pmov %p11584_p8 }
  0x33   : > { %p444_p2 = scmp.lt.s32.totalorder %s9371_s26, 1  ;;  %s11586_s0 = sld [smem:[#allocation19_spill]]  ;;  %v9264_v25 = vmov 0   ;;  %vm467_vm0 = vcmask 1046528   ;;  %vm486_vm1 = vcmask 1031168   ;;  %vm469_vm2 = vcmask 1039360  }
  0x34   : > { %9237 = vsyncadd (%p11585_p7), [#allocation6], 4294967168  ;;  %s11549_s29 = smov 126   ;;  %s11561_s16 = smov 127   ;;  %968 = vmatprep.mubr.bf16.mxu0 %v9264_v25  ;;  %1009 = vmatprep.mubr.bf16.mxu1 %v9264_v25  ;;  %vm503_vm3 = vcmask 1022976   ;;  %vm520_vm4 = vcmask 1014784  }
  0x35   : > { %s11644_s26 = smov (!%p444_p2, %s9371_s26), 1  ;;  %s11557_s17 = smov 125   ;;  %8874 = vset.pattern.permute.xlu0 %v9264_v25  ;;  %8875 = vset.pattern.permute.xlu1 %v9264_v25  ;;  %vm537_vm5 = vcmask 785408   ;;  %vm554_vm6 = vcmask 777216   ;;  %vm571_vm7 = vcmask 769024   ;;  %vm588_vm8 = vcmask 760832  }
  0x36   : > { %s8802_s30 = smul.u32 10, %s11644_s26  ;;  %s11567_s18 = smov 124   ;;  %vm605_vm9 = vcmask 752640   ;;  %vm622_vm10 = vcmask 523264   ;;  %vm639_vm11 = vcmask 515072   ;;  %vm656_vm12 = vcmask 506880  }
  0x37   : > { %s11545_s19 = smov 96   ;;  %s11541_s20 = smov 95   ;;  %vm11531_vm13 = vcmask 498688   ;;  %vm11532_vm14 = vcmask 490496   ;;  %vm707_vm15 = vcmask 261120  }
  0x38   : > { %s11537_s21 = smov 94   ;;  %s11535_s22 = smov 93  }
  0x39   : > { %s9418_s28 = scalar_lea.vmem %s11586_s0, %s8802_s30  ;;  %s11539_s23 = smov 92  }
  0x3a   : > { %v9421_v0 = vld [vmem:[%s9418_s28] sm:$0xff]  ;;  %v476_v1 = vld [vmem:[%s9418_s28 + $0x8] sm:$0x1]  ;;  %s11533_s24 = smov 64   ;;  %s11521_s27 = smov 63  }
  0x3b   : > { %479 = vrot.lane.b32.xlu1 %v9421_v0, %s11549_s29  ;;  %461 = vrot.lane.b32.xlu0 %v9421_v0, %s11561_s16  ;;  %455 = vst [vmem:[#allocation2] ss:$8 sm:$0xf] %v9421_v0  ;;  %456 = vst [vmem:[#allocation2] ss:$8 sm:$0xf0] %v9421_v0 }
  0x3c   : > { %v458_v2 = vld [vmem:[%s9418_s28 + $0x8] sm:$0x1]  ;;  %s11523_s30 = smov 62   ;;  %s11525_s14 = smov 61   ;;  %v786_v21 = vld [vmem:[%s9418_s28 + $0x9] sm:$0x1] }
  0x3d   : > { %v493_v3 = vld [vmem:[%s9418_s28 + $0x8] sm:$0x1]  ;;  %s11527_s15 = smov 60   ;;  %v802_v22 = vld [vmem:[%s9418_s28 + $0x9] sm:$0x1]  ;;  %s11587_s2 = sld [smem:[#allocation21_spill]] }
  0x3e   : > { %v9435_v4 = vld [vmem:[%s9418_s28 + $0x1] sm:$0xff]  ;;  %v818_v23 = vld [vmem:[%s9418_s28 + $0x9] sm:$0x1]  ;;  %s11588_s1 = sld [smem:[#allocation20_spill]]  ;;  %s11606_s0 = smov 77  }
  0x3f   : > { %481 = vrot.lane.b32.xlu1 %v476_v1, %s11549_s29  ;;  %463 = vrot.lane.b32.xlu0 %v458_v2, %s11561_s16  ;;  %v510_v5 = vld [vmem:[%s9418_s28 + $0x8] sm:$0x1]  ;;  %783 = vst [vmem:[#allocation2 + $0x84] ss:$8 sm:$0xf] %v9435_v4  ;;  %s11609_s9 = smov 62  }
  0x40   : > { %784 = vst [vmem:[#allocation2 + $0x84] ss:$8 sm:$0xf0] %v9435_v4  ;;  %v527_v6 = vld [vmem:[%s9418_s28 + $0x8] sm:$0x1]  ;;  %s11612_s4 = sld [smem:[#allocation23_spill]] }
  0x41   : > { %v544_v7 = vld [vmem:[%s9418_s28 + $0x8] sm:$0x1]  ;;  %v834_v24 = vld [vmem:[%s9418_s28 + $0x9] sm:$0x1]  ;;  %s11613_s3 = sld [smem:[#allocation22_spill]] }
  0x42   : > { %v561_v8 = vld [vmem:[%s9418_s28 + $0x8] sm:$0x1] }
  0x43   : > { %498 = vrot.lane.b32.xlu1 %v493_v3, %s11557_s17  ;;  %496 = vrot.lane.b32.xlu0 %v9421_v0, %s11557_s17  ;;  %v578_v9 = vld [vmem:[%s9418_s28 + $0x8] sm:$0x1]  ;;  %v898_v26 = vld [vmem:[%s11587_s2] sm:$0x3f]  ;;  %s11608_s2 = smov 76  }
  0x44   : > { %v595_v10 = vld [vmem:[%s9418_s28 + $0x8] sm:$0x1] }
  0x45   : > { %v612_v11 = vld [vmem:[%s9418_s28 + $0x8] sm:$0x1] }
  0x46   : > { %v629_v12 = vld [vmem:[%s9418_s28 + $0x8] sm:$0x1] }
  0x47   : > { %515 = vrot.lane.b32.xlu1 %v510_v5, %s11567_s18  ;;  %513 = vrot.lane.b32.xlu0 %v9421_v0, %s11567_s18  ;;  %v646_v13 = vld [vmem:[%s9418_s28 + $0x8] sm:$0x1] }
  0x48   : > { %v663_v14 = vld [vmem:[%s9418_s28 + $0x8] sm:$0x1] }
  0x49   : > { %v680_v15 = vld [vmem:[%s9418_s28 + $0x8] sm:$0x1] }
  0x4a   : > { %v697_v16 = vld [vmem:[%s9418_s28 + $0x8] sm:$0x1] }
  0x4b   : > { %532 = vrot.lane.b32.xlu1 %v527_v6, %s11545_s19  ;;  %530 = vrot.lane.b32.xlu0 %v9421_v0, %s11545_s19  ;;  %v714_v17 = vld [vmem:[%s9418_s28 + $0x8] sm:$0x1] }
  0x4c   : > { %v731_v18 = vld [vmem:[%s9418_s28 + $0x8] sm:$0x1] }
  0x4d   : > { %v748_v19 = vld [vmem:[%s9418_s28 + $0x8] sm:$0x1] }
  0x4e   : > { %v765_v20 = vld [vmem:[%s9418_s28 + $0x8] sm:$0x1]  ;;  %s11565_s28 = smov 109  }
  0x4f   : > { %549 = vrot.lane.b32.xlu1 %v544_v7, %s11541_s20  ;;  %547 = vrot.lane.b32.xlu0 %v9421_v0, %s11541_s20  ;;  %s11553_s20 = smov 80  }
  0x53   : > { %566 = vrot.lane.b32.xlu1 %v561_v8, %s11537_s21  ;;  %564 = vrot.lane.b32.xlu0 %v9421_v0, %s11537_s21  ;;  %s11589_s21 = smov 95  }
  0x57   : > { %583 = vrot.lane.b32.xlu1 %v578_v9, %s11535_s22  ;;  %581 = vrot.lane.b32.xlu0 %v9421_v0, %s11535_s22  ;;  %s11590_s22 = smov 92  }
  0x5b   : > { %600 = vrot.lane.b32.xlu1 %v595_v10, %s11539_s23  ;;  %598 = vrot.lane.b32.xlu0 %v9421_v0, %s11539_s23  ;;  %s11559_s23 = smov 76  }
  0x5f   : > { %617 = vrot.lane.b32.xlu1 %v612_v11, %s11533_s24  ;;  %615 = vrot.lane.b32.xlu0 %v9421_v0, %s11533_s24  ;;  %s11563_s24 = smov 79  }
  0x63   : > { %634 = vrot.lane.b32.xlu1 %v629_v12, %s11521_s27  ;;  %632 = vrot.lane.b32.xlu0 %v9421_v0, %s11521_s27  ;;  %s11529_s27 = smov 32  }
  0x67   : > { %651 = vrot.lane.b32.xlu1 %v646_v13, %s11523_s30  ;;  %649 = vrot.lane.b32.xlu0 %v9421_v0, %s11523_s30  ;;  %s9260_s30 = smov 31  }
  0x6b   : > { %668 = vrot.lane.b32.xlu1 %v663_v14, %s11525_s14  ;;  %666 = vrot.lane.b32.xlu0 %v9421_v0, %s11525_s14  ;;  %s9261_s14 = smov 30  }
  0x6f   : > { %685 = vrot.lane.b32.xlu1 %v680_v15, %s11527_s15  ;;  %683 = vrot.lane.b32.xlu0 %v9421_v0, %s11527_s15  ;;  %s9262_s15 = smov 29  }
  0x73   : > { %702 = vrot.lane.b32.xlu1 %v697_v16, %s11529_s27  ;;  %700 = vrot.lane.b32.xlu0 %v9421_v0, %s11529_s27  ;;  %s9263_s27 = smov 28  }
  0x77   : > { %719 = vrot.lane.b32.xlu1 %v714_v17, %s9260_s30  ;;  %717 = vrot.lane.b32.xlu0 %v9421_v0, %s9260_s30  ;;  %s11551_s30 = smov 110  }
  0x7b   : > { %736 = vrot.lane.b32.xlu1 %v731_v18, %s9261_s14  ;;  %734 = vrot.lane.b32.xlu0 %v9421_v0, %s9261_s14  ;;  %s11547_s14 = smov 108  }
  0x7f   : > { %753 = vrot.lane.b32.xlu1 %v748_v19, %s9262_s15  ;;  %751 = vrot.lane.b32.xlu0 %v9421_v0, %s9262_s15  ;;  %s11543_s15 = smov 111  }
  0x83   : > { %770 = vrot.lane.b32.xlu1 %v765_v20, %s9263_s27  ;;  %768 = vrot.lane.b32.xlu0 %v9421_v0, %s9263_s27  ;;  %s11555_s27 = smov 112  }
  0x87   : > { %791 = vrot.lane.b32.xlu1 %v786_v21, %s11561_s16  ;;  %789 = vrot.lane.b32.xlu0 %v9435_v4, %s11561_s16 }
  0x8b   : > { %807 = vrot.lane.b32.xlu1 %v802_v22, %s11549_s29  ;;  %805 = vrot.lane.b32.xlu0 %v9435_v4, %s11549_s29 }
  0x8f   : > { %823 = vrot.lane.b32.xlu1 %v818_v23, %s11557_s17  ;;  %821 = vrot.lane.b32.xlu0 %v9435_v4, %s11557_s17 }
  0x93   : > { %839 = vrot.lane.b32.xlu1 %v834_v24, %s11567_s18  ;;  %837 = vrot.lane.b32.xlu0 %v9435_v4, %s11567_s18 }
  0x97   : > { %901 = vperm.xlu0 %8874, %v898_v26  }
  0xad   : > { %v480_v27 = vpop.permute.xlu1 %479  ;;  %v462_v28 = vpop.permute.xlu0 %461 }
  0xae   : > { %v483_v31 = vrot.slane %v480_v27, 1  ;;  %v465_v32 = vrot.slane %v462_v28, 1 }
  0xb1   : > { %v482_v29 = vpop.permute.xlu1 %481  ;;  %v464_v30 = vpop.permute.xlu0 %463 }
  0xb2   : > { %v484_v33 = vrot.slane %v482_v29, 1  ;;  %v466_v34 = vrot.slane %v464_v30, 1 }
  0xb4   : > { %v485_v35 = vsel %vm467_vm0, %v483_v31, %v484_v33  ;;  %v468_v36 = vsel %vm467_vm0, %v465_v32, %v466_v34 }
  0xb5   : > { %v487_v37 = vsel %vm486_vm1, %v480_v27, %v485_v35  ;;  %v470_v38 = vsel %vm469_vm2, %v462_v28, %v468_v36  ;;  %v499_v39 = vpop.permute.xlu1 %498  ;;  %v497_v40 = vpop.permute.xlu0 %496 }
  0xb6   : > { %490 = vst [vmem:[#allocation2 + $0x2] ss:$8 sm:$0xf] %v487_v37  ;;  %491 = vst [vmem:[#allocation2 + $0x2] ss:$8 sm:$0xf0] %v487_v37 }
  0xb7   : > { %473 = vst [vmem:[#allocation2 + $0x1] ss:$8 sm:$0xf] %v470_v38  ;;  %474 = vst [vmem:[#allocation2 + $0x1] ss:$8 sm:$0xf0] %v470_v38 }
  0xb8   : > { %v501_v41 = vrot.slane %v499_v39, 1  ;;  %v500_v42 = vrot.slane %v497_v40, 1 }
  0xb9   : > { %v516_v45 = vpop.permute.xlu1 %515  ;;  %v514_v46 = vpop.permute.xlu0 %513 }
  0xba   : > { %v502_v43 = vsel %vm467_vm0, %v500_v42, %v501_v41  ;;  %v518_v47 = vrot.slane %v516_v45, 1  ;;  %v517_v48 = vrot.slane %v514_v46, 1 }
  0xbb   : > { %v504_v44 = vsel %vm503_vm3, %v497_v40, %v502_v43 }
  0xbc   : > { %507 = vst [vmem:[#allocation2 + $0x3] ss:$8 sm:$0xf] %v504_v44  ;;  %508 = vst [vmem:[#allocation2 + $0x3] ss:$8 sm:$0xf0] %v504_v44  ;;  %v519_v49 = vsel %vm467_vm0, %v517_v48, %v518_v47 }
  0xbd   : > { %v521_v50 = vsel %vm520_vm4, %v514_v46, %v519_v49  ;;  %v533_v51 = vpop.permute.xlu1 %532  ;;  %v531_v52 = vpop.permute.xlu0 %530 }
  0xbe   : > { %524 = vst [vmem:[#allocation2 + $0x4] ss:$8 sm:$0xf] %v521_v50  ;;  %525 = vst [vmem:[#allocation2 + $0x4] ss:$8 sm:$0xf0] %v521_v50 }
  0xbf   : > { %v535_v53 = vrot.slane %v533_v51, 1  ;;  %v534_v54 = vrot.slane %v531_v52, 1 }
  0xc1   : > { %v536_v55 = vsel %vm467_vm0, %v534_v54, %v535_v53  ;;  %v550_v57 = vpop.permute.xlu1 %549  ;;  %v548_v58 = vpop.permute.xlu0 %547 }
  0xc2   : > { %v538_v56 = vsel %vm537_vm5, %v531_v52, %v536_v55  ;;  %v552_v59 = vrot.slane %v550_v57, 1  ;;  %v551_v60 = vrot.slane %v548_v58, 1 }
  0xc3   : > { %541 = vst [vmem:[#allocation2 + $0x5] ss:$8 sm:$0xf] %v538_v56  ;;  %542 = vst [vmem:[#allocation2 + $0x5] ss:$8 sm:$0xf0] %v538_v56 }
  0xc4   : > { %v553_v61 = vsel %vm467_vm0, %v551_v60, %v552_v59 }
  0xc5   : > { %v555_v62 = vsel %vm554_vm6, %v548_v58, %v553_v61  ;;  %v567_v63 = vpop.permute.xlu1 %566  ;;  %v565_v0 = vpop.permute.xlu0 %564 }
  0xc6   : > { %558 = vst [vmem:[#allocation2 + $0x6] ss:$8 sm:$0xf] %v555_v62  ;;  %559 = vst [vmem:[#allocation2 + $0x6] ss:$8 sm:$0xf0] %v555_v62 }
  0xc7   : > { %v569_v1 = vrot.slane %v567_v63, 1  ;;  %v568_v2 = vrot.slane %v565_v0, 1 }
  0xc9   : > { %v570_v3 = vsel %vm467_vm0, %v568_v2, %v569_v1  ;;  %v584_v5 = vpop.permute.xlu1 %583  ;;  %v582_v6 = vpop.permute.xlu0 %581 }
  0xca   : > { %v572_v4 = vsel %vm571_vm7, %v565_v0, %v570_v3  ;;  %v586_v7 = vrot.slane %v584_v5, 1  ;;  %v585_v8 = vrot.slane %v582_v6, 1 }
  0xcb   : > { %575 = vst [vmem:[#allocation2 + $0x7] ss:$8 sm:$0xf] %v572_v4  ;;  %576 = vst [vmem:[#allocation2 + $0x7] ss:$8 sm:$0xf0] %v572_v4 }
  0xcc   : > { %v587_v9 = vsel %vm467_vm0, %v585_v8, %v586_v7 }
  0xcd   : > { %v589_v10 = vsel %vm588_vm8, %v582_v6, %v587_v9  ;;  %v601_v11 = vpop.permute.xlu1 %600  ;;  %v599_v12 = vpop.permute.xlu0 %598 }
  0xce   : > { %592 = vst [vmem:[#allocation2 + $0x40] ss:$8 sm:$0xf] %v589_v10  ;;  %593 = vst [vmem:[#allocation2 + $0x40] ss:$8 sm:$0xf0] %v589_v10 }
  0xcf   : > { %v603_v13 = vrot.slane %v601_v11, 1  ;;  %v602_v14 = vrot.slane %v599_v12, 1 }
  0xd1   : > { %v604_v15 = vsel %vm467_vm0, %v602_v14, %v603_v13  ;;  %v618_v17 = vpop.permute.xlu1 %617  ;;  %v616_v18 = vpop.permute.xlu0 %615 }
  0xd2   : > { %v606_v16 = vsel %vm605_vm9, %v599_v12, %v604_v15  ;;  %v620_v19 = vrot.slane %v618_v17, 1  ;;  %v619_v20 = vrot.slane %v616_v18, 1  ;;  %v851_v1 = vld [vmem:[#allocation2 + $0x8] sm:$0xff]  ;;  %v853_v2 = vld [vmem:[#allocation2 + $0x18] sm:$0xff]  ;;  %v850_v13 = vld [vmem:[#allocation2] sm:$0xff] }
  0xd3   : > { %609 = vst [vmem:[#allocation2 + $0x41] ss:$8 sm:$0xf] %v606_v16  ;;  %610 = vst [vmem:[#allocation2 + $0x41] ss:$8 sm:$0xf0] %v606_v16 }
  0xd4   : > { %v621_v21 = vsel %vm467_vm0, %v619_v20, %v620_v19  ;;  %v852_v14 = vld [vmem:[#allocation2 + $0x10] sm:$0xff] }
  0xd5   : > { %v623_v22 = vsel %vm622_vm10, %v616_v18, %v621_v21  ;;  %v635_v23 = vpop.permute.xlu1 %634  ;;  %v633_v24 = vpop.permute.xlu0 %632 }
  0xd6   : > { %626 = vst [vmem:[#allocation2 + $0x42] ss:$8 sm:$0xf] %v623_v22  ;;  %627 = vst [vmem:[#allocation2 + $0x42] ss:$8 sm:$0xf0] %v623_v22 }
  0xd7   : > { %v637_v26 = vrot.slane %v635_v23, 1  ;;  %v636_v27 = vrot.slane %v633_v24, 1 }
  0xd9   : > { %v638_v28 = vsel %vm467_vm0, %v636_v27, %v637_v26  ;;  %v652_v30 = vpop.permute.xlu1 %651  ;;  %v650_v31 = vpop.permute.xlu0 %649 }
  0xda   : > { %v640_v29 = vsel %vm639_vm11, %v633_v24, %v638_v28  ;;  %v654_v32 = vrot.slane %v652_v30, 1  ;;  %v653_v33 = vrot.slane %v650_v31, 1 }
  0xdb   : > { %643 = vst [vmem:[#allocation2 + $0x43] ss:$8 sm:$0xf] %v640_v29  ;;  %644 = vst [vmem:[#allocation2 + $0x43] ss:$8 sm:$0xf0] %v640_v29 }
  0xdc   : > { %v655_v34 = vsel %vm467_vm0, %v653_v33, %v654_v32 }
  0xdd   : > { %v657_v35 = vsel %vm656_vm12, %v650_v31, %v655_v34  ;;  %v669_v36 = vpop.permute.xlu1 %668  ;;  %v667_v37 = vpop.permute.xlu0 %666 }
  0xde   : > { %660 = vst [vmem:[#allocation2 + $0x44] ss:$8 sm:$0xf] %v657_v35  ;;  %661 = vst [vmem:[#allocation2 + $0x44] ss:$8 sm:$0xf0] %v657_v35 }
  0xdf   : > { %v671_v38 = vrot.slane %v669_v36, 1  ;;  %v670_v39 = vrot.slane %v667_v37, 1 }
  0xe1   : > { %v672_v40 = vsel %vm467_vm0, %v670_v39, %v671_v38  ;;  %v686_v42 = vpop.permute.xlu1 %685  ;;  %v684_v43 = vpop.permute.xlu0 %683 }
  0xe2   : > { %v674_v41 = vsel %vm11531_vm13, %v667_v37, %v672_v40  ;;  %v688_v44 = vrot.slane %v686_v42, 1  ;;  %v687_v45 = vrot.slane %v684_v43, 1  ;;  %vm724_vm13 = vcmask 252928  }
  0xe3   : > { %677 = vst [vmem:[#allocation2 + $0x45] ss:$8 sm:$0xf] %v674_v41  ;;  %678 = vst [vmem:[#allocation2 + $0x45] ss:$8 sm:$0xf0] %v674_v41 }
  0xe4   : > { %v689_v46 = vsel %vm467_vm0, %v687_v45, %v688_v44 }
  0xe5   : > { %v691_v47 = vsel %vm11532_vm14, %v684_v43, %v689_v46  ;;  %v703_v48 = vpop.permute.xlu1 %702  ;;  %v701_v49 = vpop.permute.xlu0 %700  ;;  %vm741_vm14 = vcmask 244736  }
  0xe6   : > { %694 = vst [vmem:[#allocation2 + $0x46] ss:$8 sm:$0xf] %v691_v47  ;;  %695 = vst [vmem:[#allocation2 + $0x46] ss:$8 sm:$0xf0] %v691_v47 }
  0xe7   : > { %v705_v50 = vrot.slane %v703_v48, 1  ;;  %v704_v51 = vrot.slane %v701_v49, 1 }
  0xe9   : > { %v706_v52 = vsel %vm467_vm0, %v704_v51, %v705_v50  ;;  %v720_v54 = vpop.permute.xlu1 %719  ;;  %v718_v55 = vpop.permute.xlu0 %717  ;;  %v9265_v51 = vmov 65535  }
  0xea   : > { %v708_v53 = vsel %vm707_vm15, %v701_v49, %v706_v52  ;;  %v722_v56 = vrot.slane %v720_v54, 1  ;;  %v721_v57 = vrot.slane %v718_v55, 1  ;;  %vm758_vm15 = vcmask 236544  }
  0xeb   : > { %711 = vst [vmem:[#allocation2 + $0x47] ss:$8 sm:$0xf] %v708_v53  ;;  %712 = vst [vmem:[#allocation2 + $0x47] ss:$8 sm:$0xf0] %v708_v53 }
  0xec   : > { %v723_v58 = vsel %vm467_vm0, %v721_v57, %v722_v56 }
  0xed   : > { %v725_v59 = vsel %vm724_vm13, %v718_v55, %v723_v58  ;;  %v737_v60 = vpop.permute.xlu1 %736  ;;  %v735_v61 = vpop.permute.xlu0 %734  ;;  %vm775_vm13 = vcmask 228352  }
  0xee   : > { %728 = vst [vmem:[#allocation2 + $0x80] ss:$8 sm:$0xf] %v725_v59  ;;  %729 = vst [vmem:[#allocation2 + $0x80] ss:$8 sm:$0xf0] %v725_v59 }
  0xef   : > { %v739_v62 = vrot.slane %v737_v60, 1  ;;  %v738_v63 = vrot.slane %v735_v61, 1 }
  0xf1   : > { %v740_v0 = vsel %vm467_vm0, %v738_v63, %v739_v62  ;;  %v754_v4 = vpop.permute.xlu1 %753  ;;  %v752_v5 = vpop.permute.xlu0 %751 }
  0xf2   : > { %v742_v3 = vsel %vm741_vm14, %v735_v61, %v740_v0  ;;  %v859_v6 = vld [vmem:[#allocation2 + $0x48] sm:$0xff]  ;;  %v861_v7 = vld [vmem:[#allocation2 + $0x58] sm:$0xff]  ;;  %v858_v8 = vld [vmem:[#allocation2 + $0x40] sm:$0xff]  ;;  %v756_v9 = vrot.slane %v754_v4, 1  ;;  %v755_v10 = vrot.slane %v752_v5, 1  ;;  %vm908_vm14 = vcmask 1043456  }
  0xf3   : > { %745 = vst [vmem:[#allocation2 + $0x81] ss:$8 sm:$0xf] %v742_v3  ;;  %746 = vst [vmem:[#allocation2 + $0x81] ss:$8 sm:$0xf0] %v742_v3  ;;  %v883_v11 = vpack.c.bf16 %v859_v6, %v851_v1  ;;  %v885_v12 = vpack.c.bf16 %v861_v7, %v853_v2  ;;  %v882_v16 = vpack.c.bf16 %v858_v8, %v850_v13 }
  0xf4   : > { %v860_v15 = vld [vmem:[#allocation2 + $0x50] sm:$0xff]  ;;  %v757_v18 = vsel %vm467_vm0, %v755_v10, %v756_v9  ;;  %v910_v52 = vsel %vm908_vm14, 4294967295, %v9265_v51  ;;  %v863_v1 = vld [vmem:[#allocation2 + $0x68] sm:$0xff]  ;;  %v865_v3 = vld [vmem:[#allocation2 + $0x78] sm:$0xff] }
  0xf5   : > { %v884_v17 = vpack.c.bf16 %v860_v15, %v852_v14  ;;  %936 = vmatprep.subr.bf16.mxu0 %v883_v11  ;;  %977 = vmatprep.subr.bf16.mxu1 %v885_v12  ;;  %v759_v19 = vsel %vm758_vm15, %v752_v5, %v757_v18  ;;  %v771_v20 = vpop.permute.xlu1 %770  ;;  %v769_v21 = vpop.permute.xlu0 %768  ;;  %vm909_vm15 = vcmask 1044480   ;;  %v855_v9 = vld [vmem:[#allocation2 + $0x28] sm:$0xff]  ;;  %v857_v10 = vld [vmem:[#allocation2 + $0x38] sm:$0xff]  ;;  %v862_v13 = vld [vmem:[#allocation2 + $0x60] sm:$0xff] }
  0xf6   : > { %937 = vmatpush1.bf16.msra.mxu0 %v882_v16  ;;  %762 = vst [vmem:[#allocation2 + $0x82] ss:$8 sm:$0xf] %v759_v19  ;;  %763 = vst [vmem:[#allocation2 + $0x82] ss:$8 sm:$0xf0] %v759_v19  ;;  %v887_v12 = vpack.c.bf16 %v863_v1, %v855_v9  ;;  %v889_v16 = vpack.c.bf16 %v865_v3, %v857_v10 }
  0xf7   : > { %978 = vmatpush1.bf16.msra.mxu1 %v884_v17  ;;  %v773_v22 = vrot.slane %v771_v20, 1  ;;  %v772_v23 = vrot.slane %v769_v21, 1  ;;  %v911_v54 = vsel %vm909_vm15, %v910_v52, 0  ;;  %v864_v17 = vld [vmem:[#allocation2 + $0x70] sm:$0xff]  ;;  %v8902_v51 = vld [vmem:[%s11516_s11 + $0x84] ss:$8 sps:$4 sm:$0xff]  }
  0xf8   : > { %v8900_v52 = vld [vmem:[%s11516_s11 + $0x80] ss:$8 sps:$4 sm:$0xff]   ;;  %v8923_v1 = vld [vmem:[%s11516_s11 + $0xf4] ss:$8 sps:$4 sm:$0xff]   ;;  %v8926_v3 = vld [vmem:[%s11516_s11 + $0x104] ss:$8 sps:$4 sm:$0xff]  }
  0xf9   : > { %v774_v24 = vsel %vm467_vm0, %v772_v23, %v773_v22  ;;  %v792_v27 = vpop.permute.xlu1 %791  ;;  %v790_v28 = vpop.permute.xlu0 %789  ;;  %v849_v22 = vld [vmem:[%s11588_s1] sm:$0x7]  ;;  %v854_v23 = vld [vmem:[#allocation2 + $0x20] sm:$0xff]  ;;  %s11607_s1 = smov 78   ;;  %vm2203_vm15 = vcmask 900096  }
  0xfa   : > { %v776_v26 = vsel %vm775_vm13, %v769_v21, %v774_v24  ;;  %v794_v29 = vrot.slane %v792_v27, 1  ;;  %v793_v30 = vrot.slane %v790_v28, 1  ;;  %v856_v24 = vld [vmem:[#allocation2 + $0x30] sm:$0xff]  ;;  %vm2656_vm13 = vcmask 179200  }
  0xfb   : > { %779 = vst [vmem:[#allocation2 + $0x83] ss:$8 sm:$0xf] %v776_v26  ;;  %780 = vst [vmem:[#allocation2 + $0x83] ss:$8 sm:$0xf0] %v776_v26 }
  0xfc   : > { %v795_v31 = vsel %vm467_vm0, %v793_v30, %v794_v29  ;;  %v888_v29 = vpack.c.bf16 %v864_v17, %v856_v24 }
  0xfd   : > { %v796_v32 = vsel %vm469_vm2, %v790_v28, %v795_v31  ;;  %v808_v33 = vpop.permute.xlu1 %807  ;;  %v806_v34 = vpop.permute.xlu0 %805  ;;  %v886_v28 = vpack.c.bf16 %v862_v13, %v854_v23 }
  0xfe   : > { %799 = vst [vmem:[#allocation2 + $0x85] ss:$8 sm:$0xf] %v796_v32  ;;  %800 = vst [vmem:[#allocation2 + $0x85] ss:$8 sm:$0xf0] %v796_v32 }
  0xff   : > { %v810_v35 = vrot.slane %v808_v33, 1  ;;  %v809_v36 = vrot.slane %v806_v34, 1 }
 0x101   : > { %v811_v37 = vsel %vm467_vm0, %v809_v36, %v810_v35  ;;  %v824_v39 = vpop.permute.xlu1 %823  ;;  %v822_v40 = vpop.permute.xlu0 %821 }
 0x102   : > { %v812_v38 = vsel %vm486_vm1, %v806_v34, %v811_v37  ;;  %v826_v41 = vrot.slane %v824_v39, 1  ;;  %v825_v42 = vrot.slane %v822_v40, 1  ;;  %v8878_v34 = vld [vmem:[%s11516_s11 + $0x4] ss:$8 sps:$4 sm:$0xff]   ;;  %v8876_v37 = vld [vmem:[%s11516_s11] ss:$8 sps:$4 sm:$0xff]  }
 0x103   : > { %815 = vst [vmem:[#allocation2 + $0x86] ss:$8 sm:$0xf] %v812_v38  ;;  %816 = vst [vmem:[#allocation2 + $0x86] ss:$8 sm:$0xf0] %v812_v38 }
 0x104   : > { %v827_v43 = vsel %vm467_vm0, %v825_v42, %v826_v41  ;;  %v8881_v38 = vld [vmem:[%s11516_s11 + $0x14] ss:$8 sps:$4 sm:$0xff]   ;;  %v8884_v39 = vld [vmem:[%s11516_s11 + $0x24] ss:$8 sps:$4 sm:$0xff]   ;;  %v8885_v42 = vld [vmem:[%s11516_s11 + $0x30] ss:$8 sps:$4 sm:$0xff]  }
 0x105   : > { %v828_v44 = vsel %vm503_vm3, %v822_v40, %v827_v43  ;;  %v840_v45 = vpop.permute.xlu1 %839  ;;  %v838_v46 = vpop.permute.xlu0 %837  ;;  %v8882_v40 = vld [vmem:[%s11516_s11 + $0x20] ss:$8 sps:$4 sm:$0xff]   ;;  %v8887_v41 = vld [vmem:[%s11516_s11 + $0x34] ss:$8 sps:$4 sm:$0xff]   ;;  %v8890_v43 = vld [vmem:[%s11516_s11 + $0x44] ss:$8 sps:$4 sm:$0xff]  }
 0x106   : > { %831 = vst [vmem:[#allocation2 + $0x87] ss:$8 sm:$0xf] %v828_v44  ;;  %832 = vst [vmem:[#allocation2 + $0x87] ss:$8 sm:$0xf0] %v828_v44 }
 0x107   : > { %v842_v47 = vrot.slane %v840_v45, 1  ;;  %v841_v48 = vrot.slane %v838_v46, 1  ;;  %v8888_v44 = vld [vmem:[%s11516_s11 + $0x40] ss:$8 sps:$4 sm:$0xff]   ;;  %v8893_v45 = vld [vmem:[%s11516_s11 + $0x54] ss:$8 sps:$4 sm:$0xff]  }
 0x109   : > { %v843_v49 = vsel %vm467_vm0, %v841_v48, %v842_v47  ;;  %vm904_vm0 = vcmask 203776   ;;  %v8896_v47 = vld [vmem:[%s11516_s11 + $0x64] ss:$8 sps:$4 sm:$0xff]   ;;  %v8894_v48 = vld [vmem:[%s11516_s11 + $0x60] ss:$8 sps:$4 sm:$0xff]  }
 0x10a   : > { %v844_v50 = vsel %vm520_vm4, %v838_v46, %v843_v49  ;;  %v8891_v46 = vld [vmem:[%s11516_s11 + $0x50] ss:$8 sps:$4 sm:$0xff]   ;;  %v8899_v49 = vld [vmem:[%s11516_s11 + $0x74] ss:$8 sps:$4 sm:$0xff]  }
 0x10b   : > { %847 = vst [vmem:[#allocation2 + $0xc0] ss:$8 sm:$0xf] %v844_v50  ;;  %848 = vst [vmem:[#allocation2 + $0xc0] ss:$8 sm:$0xf0] %v844_v50 }
 0x10c   : > { %v8897_v50 = vld [vmem:[%s11516_s11 + $0x70] ss:$8 sps:$4 sm:$0xff]  }
 0x10d   : > { %v867_v53 = vld [vmem:[#allocation2 + $0x88] sm:$0xff]  ;;  %v869_v55 = vld [vmem:[#allocation2 + $0x98] sm:$0xff]  ;;  %v866_v56 = vld [vmem:[#allocation2 + $0x80] sm:$0xff] }
 0x10e   : > { %v868_v63 = vld [vmem:[#allocation2 + $0x90] sm:$0xff]  ;;  %v871_v14 = vld [vmem:[#allocation2 + $0xa8] sm:$0xff]  ;;  %v873_v15 = vld [vmem:[#allocation2 + $0xb8] sm:$0xff] }
 0x10f   : > { %v870_v26 = vld [vmem:[#allocation2 + $0xa0] sm:$0xff]  ;;  %v872_v27 = vld [vmem:[#allocation2 + $0xb0] sm:$0xff] }
 0x112   : > { %v875_v57 = vld [vmem:[#allocation2 + $0xc8] sm:$0x1]  ;;  %v877_v58 = vld [vmem:[#allocation2 + $0xd8] sm:$0x1]  ;;  %v874_v59 = vld [vmem:[#allocation2 + $0xc0] sm:$0x1] }
 0x113   : > { %v891_v60 = vpack.c.bf16 %v875_v57, %v867_v53  ;;  %v893_v61 = vpack.c.bf16 %v877_v58, %v869_v55  ;;  %v890_v62 = vpack.c.bf16 %v874_v59, %v866_v56  ;;  %v876_v0 = vld [vmem:[#allocation2 + $0xd0] sm:$0x1]  ;;  %v879_v4 = vld [vmem:[#allocation2 + $0xe8] sm:$0x1]  ;;  %v881_v5 = vld [vmem:[#allocation2 + $0xf8] sm:$0x1] }
 0x114   : > { %v892_v2 = vpack.c.bf16 %v876_v0, %v868_v63  ;;  %v895_v18 = vpack.c.bf16 %v879_v4, %v871_v14  ;;  %v897_v19 = vpack.c.bf16 %v881_v5, %v873_v15  ;;  %v878_v20 = vld [vmem:[#allocation2 + $0xe0] sm:$0x1]  ;;  %v880_v21 = vld [vmem:[#allocation2 + $0xf0] sm:$0x1]  ;;  %v8905_v53 = vld [vmem:[%s11516_s11 + $0x94] ss:$8 sps:$4 sm:$0xff]  }
 0x115   : > { %v916_v6 = vand.u32 %v911_v54, %v891_v60  ;;  %v922_v7 = vand.u32 %v911_v54, %v893_v61  ;;  %v913_v8 = vand.u32 %v911_v54, %v890_v62  ;;  %v894_v30 = vpack.c.bf16 %v878_v20, %v870_v26  ;;  %v8908_v55 = vld [vmem:[%s11516_s11 + $0xa4] ss:$8 sps:$4 sm:$0xff]   ;;  %v8906_v56 = vld [vmem:[%s11516_s11 + $0xa0] ss:$8 sps:$4 sm:$0xff]   ;;  %v8911_v57 = vld [vmem:[%s11516_s11 + $0xb4] ss:$8 sps:$4 sm:$0xff]  }
 0x116   : > { %v919_v11 = vand.u32 %v911_v54, %v892_v2  ;;  %v896_v31 = vpack.c.bf16 %v880_v21, %v872_v27  ;;  %v928_v32 = vand.u32 %v911_v54, %v895_v18  ;;  %v934_v33 = vand.u32 %v911_v54, %v897_v19  ;;  %v8909_v58 = vld [vmem:[%s11516_s11 + $0xb0] ss:$8 sps:$4 sm:$0xff]   ;;  %v8914_v59 = vld [vmem:[%s11516_s11 + $0xc4] ss:$8 sps:$4 sm:$0xff]   ;;  %v8912_v60 = vld [vmem:[%s11516_s11 + $0xc0] ss:$8 sps:$4 sm:$0xff]   ;;  %v9672_v4 = vpop.permute.xlu0 %901 }
 0x117   : > { %938 = vmatprep.subr.bf16.mxu0 %v916_v6  ;;  %979 = vmatprep.subr.bf16.mxu1 %v922_v7  ;;  %v925_v35 = vand.u32 %v911_v54, %v894_v30  ;;  %v8917_v61 = vld [vmem:[%s11516_s11 + $0xd4] ss:$8 sps:$4 sm:$0xff]   ;;  %v8915_v62 = vld [vmem:[%s11516_s11 + $0xd0] ss:$8 sps:$4 sm:$0xff]   ;;  %v8920_v63 = vld [vmem:[%s11516_s11 + $0xe4] ss:$8 sps:$4 sm:$0xff]  }
 0x118   : > { %939 = vmatpush1.bf16.msra.mxu0 %v913_v8  ;;  %980 = vmatpush1.bf16.msra.mxu1 %v919_v11  ;;  %v931_v36 = vand.u32 %v911_v54, %v896_v31  ;;  %v8903_v54 = vld [vmem:[%s11516_s11 + $0x90] ss:$8 sps:$4 sm:$0xff]   ;;  %v8918_v0 = vld [vmem:[%s11516_s11 + $0xe0] ss:$8 sps:$4 sm:$0xff]   ;;  %v8929_v31 = vld [vmem:[%s11516_s11 + $0x114] ss:$8 sps:$4 sm:$0xff]  }
 0x119   : > { %1018 = vmatprep.subr.bf16.mxu0 %v887_v12  ;;  %1059 = vmatprep.subr.bf16.mxu1 %v889_v16  ;;  %v8921_v2 = vld [vmem:[%s11516_s11 + $0xf0] ss:$8 sps:$4 sm:$0xff]  }
 0x11b   : > { %7228 = vmatmul.mubr.msk.bf16.vlgmr.msra.gmra.mrb[0].mxu0 %vm904_vm0, %v849_v22  ;;  %7229 = vmatmul.mubr.msk.bf16.vlgmr.msra.gmra.mrb[0].mxu1 %vm904_vm0, %v849_v22 }
 0x11c   : > { %1019 = vmatpush1.bf16.msra.mxu0 %v886_v28  ;;  %1060 = vmatpush1.bf16.msra.mxu1 %v888_v29  ;;  %v8924_v29 = vld [vmem:[%s11516_s11 + $0x100] ss:$8 sps:$4 sm:$0xff]  }
 0x11d   : > { %1020 = vmatprep.subr.bf16.mxu0 %v928_v32  ;;  %1061 = vmatprep.subr.bf16.mxu1 %v934_v33  ;;  %v8927_v33 = vld [vmem:[%s11516_s11 + $0x110] ss:$8 sps:$4 sm:$0xff]  }
 0x11e   : > { %1050 = vmatprep.mubr.bf16.mxu0 %v9264_v25  ;;  %1091 = vmatprep.mubr.bf16.mxu1 %v9264_v25  ;;  %v8879_v25 = vld [vmem:[%s11516_s11 + $0x10] ss:$8 sps:$4 sm:$0xff]  }
 0x120   : > { %1021 = vmatpush1.bf16.msra.mxu0 %v925_v35  ;;  %1062 = vmatpush1.bf16.msra.mxu1 %v931_v36  ;;  %v8930_v35 = vld [vmem:[%s11516_s11 + $0x120] ss:$8 sps:$4 sm:$0xff]   ;;  %v8935_v36 = vld [vmem:[%s11516_s11 + $0x134] ss:$8 sps:$4 sm:$0xff]  }
 0x121   : > { %1884 = vmatprep.subr.bf16.mxu0 %v8878_v34  ;;  %v8932_v34 = vld [vmem:[%s11516_s11 + $0x124] ss:$8 sps:$4 sm:$0xff]  }
 0x123   : > { %7230 = vmatmul.mubr.msk.bf16.vlgmr.msra.gmra.mrb[4].mxu0 %vm904_vm0, %v849_v22  ;;  %7231 = vmatmul.mubr.msk.bf16.vlgmr.msra.gmra.mrb[4].mxu1 %vm904_vm0, %v849_v22  ;;  %vm2155_vm0 = vcmask 916480  }
 0x124   : > { %1885 = vmatpush1.bf16.msra.mxu0 %v8876_v37  ;;  %v8933_v37 = vld [vmem:[%s11516_s11 + $0x130] ss:$8 sps:$4 sm:$0xff]  }
 0x125   : > { %1886 = vmatprep.subr.bf16.mxu0 %v8881_v38  ;;  %v8938_v38 = vld [vmem:[%s11516_s11 + $0x144] ss:$8 sps:$4 sm:$0xff]  }
 0x128   : > { %1887 = vmatpush1.bf16.msra.mxu0 %v8879_v25  ;;  %v8936_v25 = vld [vmem:[%s11516_s11 + $0x140] ss:$8 sps:$4 sm:$0xff]  }
 0x129   : > { %1888 = vmatprep.subr.bf16.mxu0 %v8884_v39  ;;  %v8941_v39 = vld [vmem:[%s11516_s11 + $0x154] ss:$8 sps:$4 sm:$0xff]  }
 0x12c   : > { %1889 = vmatpush1.bf16.msra.mxu0 %v8882_v40  ;;  %v8939_v40 = vld [vmem:[%s11516_s11 + $0x150] ss:$8 sps:$4 sm:$0xff]  }
 0x12d   : > { %1890 = vmatprep.subr.bf16.mxu0 %v8887_v41  ;;  %v8944_v41 = vld [vmem:[%s11516_s11 + $0x164] ss:$8 sps:$4 sm:$0xff]  }
 0x130   : > { %1891 = vmatpush1.bf16.msra.mxu0 %v8885_v42  ;;  %v8942_v42 = vld [vmem:[%s11516_s11 + $0x160] ss:$8 sps:$4 sm:$0xff]  }
 0x131   : > { %1892 = vmatprep.subr.bf16.mxu0 %v8890_v43  ;;  %v8947_v43 = vld [vmem:[%s11516_s11 + $0x174] ss:$8 sps:$4 sm:$0xff]  }
 0x134   : > { %1893 = vmatpush1.bf16.msra.mxu0 %v8888_v44  ;;  %v8945_v44 = vld [vmem:[%s11516_s11 + $0x170] ss:$8 sps:$4 sm:$0xff]  }
 0x135   : > { %1894 = vmatprep.subr.bf16.mxu0 %v8893_v45  ;;  %v8950_v45 = vld [vmem:[%s11516_s11 + $0x184] ss:$8 sps:$4 sm:$0xff]  }
 0x138   : > { %1895 = vmatpush1.bf16.msra.mxu0 %v8891_v46  ;;  %v8948_v46 = vld [vmem:[%s11516_s11 + $0x180] ss:$8 sps:$4 sm:$0xff]  }
 0x139   : > { %1896 = vmatprep.subr.bf16.mxu0 %v8896_v47  ;;  %v8953_v47 = vld [vmem:[%s11516_s11 + $0x194] ss:$8 sps:$4 sm:$0xff]  }
 0x13c   : > { %1897 = vmatpush1.bf16.msra.mxu0 %v8894_v48  ;;  %v8951_v48 = vld [vmem:[%s11516_s11 + $0x190] ss:$8 sps:$4 sm:$0xff]  }
 0x13d   : > { %1898 = vmatprep.subr.bf16.mxu0 %v8899_v49  ;;  %v8956_v49 = vld [vmem:[%s11516_s11 + $0x1a4] ss:$8 sps:$4 sm:$0xff]  }
 0x140   : > { %1899 = vmatpush1.bf16.msra.mxu0 %v8897_v50  ;;  %v8954_v50 = vld [vmem:[%s11516_s11 + $0x1a0] ss:$8 sps:$4 sm:$0xff]  }
 0x141   : > { %1900 = vmatprep.subr.bf16.mxu0 %v8902_v51  ;;  %v8959_v51 = vld [vmem:[%s11516_s11 + $0x1b4] ss:$8 sps:$4 sm:$0xff]  }
 0x144   : > { %1901 = vmatpush1.bf16.msra.mxu0 %v8900_v52  ;;  %v8957_v52 = vld [vmem:[%s11516_s11 + $0x1b0] ss:$8 sps:$4 sm:$0xff]  }
 0x145   : > { %1902 = vmatprep.subr.bf16.mxu0 %v8905_v53  ;;  %v8962_v53 = vld [vmem:[%s11516_s11 + $0x1c4] ss:$8 sps:$4 sm:$0xff]  }
 0x148   : > { %1903 = vmatpush1.bf16.msra.mxu0 %v8903_v54 }
 0x149   : > { %1904 = vmatprep.subr.bf16.mxu0 %v8908_v55  ;;  %v8960_v55 = vld [vmem:[%s11516_s11 + $0x1c0] ss:$8 sps:$4 sm:$0xff]  }
 0x14c   : > { %1905 = vmatpush1.bf16.msra.mxu0 %v8906_v56 }
 0x14d   : > { %1906 = vmatprep.subr.bf16.mxu0 %v8911_v57  ;;  %v8965_v57 = vld [vmem:[%s11516_s11 + $0x1d4] ss:$8 sps:$4 sm:$0xff]  }
 0x150   : > { %1907 = vmatpush1.bf16.msra.mxu0 %v8909_v58  ;;  %v8963_v58 = vld [vmem:[%s11516_s11 + $0x1d0] ss:$8 sps:$4 sm:$0xff]  }
 0x151   : > { %1908 = vmatprep.subr.bf16.mxu0 %v8914_v59  ;;  %v8968_v59 = vld [vmem:[%s11516_s11 + $0x1e4] ss:$8 sps:$4 sm:$0xff]  }
 0x154   : > { %1909 = vmatpush1.bf16.msra.mxu0 %v8912_v60  ;;  %v8966_v60 = vld [vmem:[%s11516_s11 + $0x1e0] ss:$8 sps:$4 sm:$0xff]  }
 0x155   : > { %1910 = vmatprep.subr.bf16.mxu0 %v8917_v61  ;;  %v8971_v61 = vld [vmem:[%s11516_s11 + $0x1f4] ss:$8 sps:$4 sm:$0xff]  }
 0x158   : > { %1911 = vmatpush1.bf16.msra.mxu0 %v8915_v62  ;;  %v8969_v62 = vld [vmem:[%s11516_s11 + $0x1f0] ss:$8 sps:$4 sm:$0xff]  }
 0x159   : > { %1912 = vmatprep.subr.bf16.mxu0 %v8920_v63  ;;  %v8974_v63 = vld [vmem:[%s11516_s11 + $0x204] ss:$8 sps:$4 sm:$0xff]  }
 0x15c   : > { %1913 = vmatpush1.bf16.msra.mxu0 %v8918_v0 }
 0x15d   : > { %1914 = vmatprep.subr.bf16.mxu0 %v8923_v1 }
 0x160   : > { %1915 = vmatpush1.bf16.msra.mxu0 %v8921_v2  ;;  %v8972_v2 = vld [vmem:[%s11516_s11 + $0x200] ss:$8 sps:$4 sm:$0xff]  }
 0x161   : > { %1925 = vmatprep.subr.bf16.mxu0 %v8926_v3 }
 0x1ee   : > { %v970_v5 = vpop.f32.mrb[0].mxu0  ;;  %v9674_v6 = vpop.f32.mrb[0].mxu1 }
 0x1ef   : > { %v971_v7 = vadd.f32 %v970_v5, %v9672_v4  ;;  %v972_v8 = vpop.f32.mrb[1].mxu0  ;;  %v1013_v9 = vpop.f32.mrb[1].mxu1  ;;  %v1012_v54 = vadd.f32 %v9674_v6, %v9672_v4  ;;  %v8977_v5 = vld [vmem:[%s11516_s11 + $0x214] ss:$8 sps:$4 sm:$0xff]  }
 0x1f0   : > { %v973_v10 = vadd.f32 %v972_v8, %v9672_v4  ;;  %v1014_v11 = vadd.f32 %v1013_v9, %v9672_v4  ;;  %v974_v12 = vpop.f32.mrb[2].mxu0  ;;  %v1015_v13 = vpop.f32.mrb[2].mxu1  ;;  %v11572_v8 = vmov 0.0   ;;  %v8980_v9 = vld [vmem:[%s11516_s11 + $0x224] ss:$8 sps:$4 sm:$0xff]  }
 0x1f1   : > { %v975_v14 = vpop.f32.mrb[3].mxu0  ;;  %v1016_v15 = vpop.f32.mrb[3].mxu1  ;;  %9126 = vtanh.f32 %v971_v7  ;;  %v8975_v7 = vld [vmem:[%s11516_s11 + $0x210] ss:$8 sps:$4 sm:$0xff]   ;;  %2050 = vst [vmem:[#allocation3 + $0x10] sm:$0x3f] %v11572_v8 }
 0x1f2   : > { %9128 = vtanh.f32 %v973_v10  ;;  %v8978_v10 = vld [vmem:[%s11516_s11 + $0x220] ss:$8 sps:$4 sm:$0xff]   ;;  %v8981_v15 = vld [vmem:[%s11516_s11 + $0x230] ss:$8 sps:$4 sm:$0xff]  }
 0x1f3   : > { %9130 = vtanh.f32 %v1014_v11  ;;  %v8983_v11 = vld [vmem:[%s11516_s11 + $0x234] ss:$8 sps:$4 sm:$0xff]  }
 0x1f4   : > { %9132 = vtanh.f32 %v1012_v54  ;;  %v9004_v54 = vld [vmem:[%s11516_s11 + $0x2a4] ss:$8 sps:$4 sm:$0xff]  }
 0x1f6   : > { %v9679_v16 = vpop.f32.mrb[4].mxu0  ;;  %v9681_v17 = vpop.f32.mrb[4].mxu1 }
 0x1f7   : > { %v9683_v18 = vpop.f32.mrb[5].mxu0  ;;  %v9685_v19 = vpop.f32.mrb[5].mxu1 }
 0x1f8   : > { %v1056_v20 = vpop.f32.mrb[6].mxu0  ;;  %v1097_v21 = vpop.f32.mrb[6].mxu1  ;;  %v1055_v56 = vadd.f32 %v9683_v18, %v9672_v4  ;;  %v2057_v12 = vld [vmem:[#allocation3 + $0x10] sm:$0x3f] }
 0x1f9   : > { %v1057_v22 = vpop.f32.mrb[7].mxu0  ;;  %v1098_v23 = vpop.f32.mrb[7].mxu1  ;;  %v2080_v13 = vld [vmem:[#allocation3 + $0x10] sm:$0x3f]  ;;  %v2063_v18 = vrot.slane %v2057_v12, 2 }
 0x1fa   : > { %9134 = vtanh.f32 %v1055_v56  ;;  %v2166_v14 = vld [vmem:[#allocation3 + $0x10] sm:$0x3f]  ;;  %v8986_v21 = vld [vmem:[%s11516_s11 + $0x244] ss:$8 sps:$4 sm:$0xff]   ;;  %v2086_v23 = vrot.slane %v2080_v13, 4 }
 0x1fb   : > { %v9127_v24 = vpop.eup %9126  ;;  %v2172_v20 = vrot.slane %v2166_v14, 4  ;;  %v2190_v22 = vld [vmem:[#allocation3 + $0x10] sm:$0x3f]  ;;  %2068 = vrot.lane.b32.xlu1 %v2063_v18, %s11561_s16  ;;  %v9028_v18 = vld [vmem:[%s11516_s11 + $0x324] ss:$8 sps:$4 sm:$0xff]   ;;  %s11600_s16 = smov 110  }
 0x1fc   : > { %v9129_v26 = vpop.eup %9128  ;;  %v1108_v30 = vpack.c.bf16 %v9127_v24, %v9127_v24  ;;  %v2196_v24 = vrot.slane %v2190_v22, 6  ;;  %v2452_v56 = vld [vmem:[#allocation3 + $0x10] sm:$0x3f] }
 0x1fd   : > { %v9131_v27 = vpop.eup %9130  ;;  %v1109_v28 = vpack.c.bf16 %v9129_v26, %v9129_v26  ;;  %2177 = vrot.lane.b32.xlu0 %v2172_v20, %s11543_s15  ;;  %v2103_v26 = vld [vmem:[#allocation3 + $0x10] sm:$0x3f]  ;;  %s11592_s15 = smov 93   ;;  %v9026_v20 = vld [vmem:[%s11516_s11 + $0x320] ss:$8 sps:$4 sm:$0xff]  }
 0x1fe   : > { %v1111_v32 = vpack.c.bf16 %v9131_v27, %v9131_v27  ;;  %v9133_v0 = vpop.eup %9132  ;;  %v8984_v27 = vld [vmem:[%s11516_s11 + $0x240] ss:$8 sps:$4 sm:$0xff]   ;;  %v9025_v13 = vld [vmem:[%s11516_s11 + $0x314] ss:$8 sps:$4 sm:$0xff]   ;;  %v9029_v22 = vld [vmem:[%s11516_s11 + $0x330] ss:$8 sps:$4 sm:$0xff]  }
 0x1ff   : > { %1916 = vmatprep.mubr.bf16.mxu0 %v1109_v28  ;;  %v1110_v3 = vpack.c.bf16 %v9133_v0, %v9133_v0  ;;  %v8989_v28 = vld [vmem:[%s11516_s11 + $0x254] ss:$8 sps:$4 sm:$0xff]   ;;  %2091 = vrot.lane.b32.xlu1 %v2086_v23, %s11549_s29  ;;  %s11591_s29 = smov 94   ;;  %v9008_v0 = vld [vmem:[%s11516_s11 + $0x2c0] ss:$8 sps:$4 sm:$0xff]  }
 0x200   : > { %1917 = vmatmul.mubr.bf16.vlgmr.msra.gmra.mrb[8].mxu0 %v1108_v30  ;;  %v2212_v30 = vld [vmem:[#allocation3 + $0x10] sm:$0x3f]  ;;  %v9034_v23 = vld [vmem:[%s11516_s11 + $0x344] ss:$8 sps:$4 sm:$0xff]  }
 0x201   : > { %1926 = vmatpush1.bf16.msra.mxu0 %v8924_v29  ;;  %1957 = vmatprep.mubr.bf16.mxu0 %v1111_v32  ;;  %v2109_v29 = vrot.slane %v2103_v26, 6  ;;  %v8987_v32 = vld [vmem:[%s11516_s11 + $0x250] ss:$8 sps:$4 sm:$0xff]   ;;  %v9037_v26 = vld [vmem:[%s11516_s11 + $0x354] ss:$8 sps:$4 sm:$0xff]  }
 0x202   : > { %1927 = vmatprep.subr.bf16.mxu0 %v8929_v31  ;;  %2201 = vrot.lane.b32.xlu0 %v2196_v24, %s11551_s30  ;;  %v2231_v31 = vld [vmem:[#allocation3 + $0x10] sm:$0x3f]  ;;  %v9032_v24 = vld [vmem:[%s11516_s11 + $0x340] ss:$8 sps:$4 sm:$0xff]   ;;  %s11598_s30 = smov 125  }
 0x203   : > { %2114 = vrot.lane.b32.xlu1 %v2109_v29, %s11557_s17  ;;  %v9038_v29 = vld [vmem:[%s11516_s11 + $0x360] ss:$8 sps:$4 sm:$0xff]   ;;  %s11597_s17 = smov 127  }
 0x204   : > { %v9135_v1 = vpop.eup %9134 }
 0x205   : > { %1928 = vmatpush1.bf16.msra.mxu0 %v8927_v33  ;;  %v1113_v6 = vpack.c.bf16 %v9135_v1, %v9135_v1  ;;  %v8992_v33 = vld [vmem:[%s11516_s11 + $0x264] ss:$8 sps:$4 sm:$0xff]   ;;  %v1096_v1 = vadd.f32 %v9685_v19, %v9672_v4  ;;  %v9014_v19 = vld [vmem:[%s11516_s11 + $0x2e0] ss:$8 sps:$4 sm:$0xff]  }
 0x206   : > { %1929 = vmatprep.subr.bf16.mxu0 %v8932_v34  ;;  %2220 = vrot.lane.b32.xlu0 %v2212_v30, %s11565_s28  ;;  %v2237_v34 = vrot.slane %v2231_v31, 2  ;;  %v9043_v30 = vld [vmem:[%s11516_s11 + $0x374] ss:$8 sps:$4 sm:$0xff]   ;;  %v9041_v31 = vld [vmem:[%s11516_s11 + $0x370] ss:$8 sps:$4 sm:$0xff]   ;;  %s11570_s28 = smov 77  }
 0x209   : > { %1930 = vmatpush1.bf16.msra.mxu0 %v8930_v35  ;;  %v2124_v35 = vld [vmem:[#allocation3 + $0x10] sm:$0x3f] }
 0x20a   : > { %1931 = vmatprep.subr.bf16.mxu0 %v8935_v36  ;;  %v2142_v36 = vld [vmem:[#allocation3 + $0x10] sm:$0x3f]  ;;  %2132 = vrot.lane.b32.xlu1 %v2124_v35, %s11567_s18 }
 0x20b   : > { %2242 = vrot.lane.b32.xlu0 %v2237_v34, %s11547_s14  ;;  %v9049_v34 = vld [vmem:[%s11516_s11 + $0x394] ss:$8 sps:$4 sm:$0xff]   ;;  %v9047_v35 = vld [vmem:[%s11516_s11 + $0x390] ss:$8 sps:$4 sm:$0xff]   ;;  %s11568_s14 = smov 78  }
 0x20d   : > { %1932 = vmatpush1.bf16.msra.mxu0 %v8933_v37  ;;  %v2255_v37 = vld [vmem:[#allocation3 + $0x10] sm:$0x3f] }
 0x20e   : > { %1933 = vmatprep.subr.bf16.mxu0 %v8938_v38  ;;  %v8990_v38 = vld [vmem:[%s11516_s11 + $0x260] ss:$8 sps:$4 sm:$0xff]  }
 0x211   : > { %1934 = vmatpush1.bf16.msra.mxu0 %v8936_v25  ;;  %v8995_v25 = vld [vmem:[%s11516_s11 + $0x274] ss:$8 sps:$4 sm:$0xff]  }
 0x212   : > { %1935 = vmatprep.subr.bf16.mxu0 %v8941_v39  ;;  %v2148_v39 = vrot.slane %v2142_v36, 2  ;;  %v9052_v36 = vld [vmem:[%s11516_s11 + $0x3a4] ss:$8 sps:$4 sm:$0xff]  }
 0x214   : > { %2153 = vrot.lane.b32.xlu1 %v2148_v39, %s11555_s27  ;;  %v9058_v39 = vld [vmem:[%s11516_s11 + $0x3c4] ss:$8 sps:$4 sm:$0xff]   ;;  %s11595_s27 = smov 109  }
 0x215   : > { %1936 = vmatpush1.bf16.msra.mxu0 %v8939_v40  ;;  %v2261_v40 = vrot.slane %v2255_v37, 4  ;;  %v9050_v37 = vld [vmem:[%s11516_s11 + $0x3a0] ss:$8 sps:$4 sm:$0xff]  }
 0x216   : > { %1937 = vmatprep.subr.bf16.mxu0 %v8944_v41  ;;  %v2278_v41 = vld [vmem:[#allocation3 + $0x10] sm:$0x3f] }
 0x217   : > { %2266 = vrot.lane.b32.xlu0 %v2261_v40, %s11545_s19  ;;  %v1094_v40 = vadd.f32 %v9681_v17, %v9672_v4  ;;  %v9062_v17 = vld [vmem:[%s11516_s11 + $0x3e0] ss:$8 sps:$4 sm:$0xff]   ;;  %s11593_s19 = smov 64  }
 0x219   : > { %1938 = vmatpush1.bf16.msra.mxu0 %v8942_v42  ;;  %v2340_v42 = vld [vmem:[#allocation3 + $0x10] sm:$0x3f] }
 0x21a   : > { %1939 = vmatprep.subr.bf16.mxu0 %v8947_v43  ;;  %v8993_v43 = vld [vmem:[%s11516_s11 + $0x270] ss:$8 sps:$4 sm:$0xff]  }
 0x21d   : > { %1940 = vmatpush1.bf16.msra.mxu0 %v8945_v44  ;;  %v8998_v44 = vld [vmem:[%s11516_s11 + $0x284] ss:$8 sps:$4 sm:$0xff]  }
 0x21e   : > { %1941 = vmatprep.subr.bf16.mxu0 %v8950_v45  ;;  %v2284_v45 = vrot.slane %v2278_v41, 6  ;;  %v9056_v41 = vld [vmem:[%s11516_s11 + $0x3c0] ss:$8 sps:$4 sm:$0xff]  }
 0x220   : > { %2289 = vrot.lane.b32.xlu1 %v2284_v45, %s11589_s21  ;;  %v9065_v45 = vld [vmem:[%s11516_s11 + $0x3f0] ss:$8 sps:$4 sm:$0xff]  }
 0x221   : > { %1942 = vmatpush1.bf16.msra.mxu0 %v8948_v46  ;;  %v2346_v46 = vrot.slane %v2340_v42, 4  ;;  %v9061_v42 = vld [vmem:[%s11516_s11 + $0x3d4] ss:$8 sps:$4 sm:$0xff]  }
 0x222   : > { %1943 = vmatprep.subr.bf16.mxu0 %v8953_v47  ;;  %v2363_v47 = vld [vmem:[#allocation3 + $0x10] sm:$0x3f] }
 0x223   : > { %2351 = vrot.lane.b32.xlu0 %v2346_v46, %s11590_s22 }
 0x225   : > { %1944 = vmatpush1.bf16.msra.mxu0 %v8951_v48  ;;  %v8996_v48 = vld [vmem:[%s11516_s11 + $0x280] ss:$8 sps:$4 sm:$0xff]  }
 0x226   : > { %1945 = vmatprep.subr.bf16.mxu0 %v8956_v49  ;;  %v9001_v49 = vld [vmem:[%s11516_s11 + $0x294] ss:$8 sps:$4 sm:$0xff]  }
 0x229   : > { %1946 = vmatpush1.bf16.msra.mxu0 %v8954_v50  ;;  %v2369_v50 = vrot.slane %v2363_v47, 6 }
 0x22a   : > { %1947 = vmatprep.subr.bf16.mxu0 %v8959_v51  ;;  %v2299_v51 = vld [vmem:[#allocation3 + $0x10] sm:$0x3f] }
 0x22b   : > { %2307 = vrot.lane.b32.xlu1 %v2299_v51, %s11591_s29  ;;  %2374 = vrot.lane.b32.xlu0 %v2369_v50, %s11553_s20  ;;  %v2492_v51 = vld [vmem:[#allocation3 + $0x10] sm:$0x3f]  ;;  %s11596_s20 = smov 79  }
 0x22d   : > { %1948 = vmatpush1.bf16.msra.mxu0 %v8957_v52  ;;  %v2317_v52 = vld [vmem:[#allocation3 + $0x10] sm:$0x3f] }
 0x22e   : > { %1949 = vmatprep.subr.bf16.mxu0 %v8962_v53  ;;  %v8999_v53 = vld [vmem:[%s11516_s11 + $0x290] ss:$8 sps:$4 sm:$0xff]  }
 0x231   : > { %1950 = vmatpush1.bf16.msra.mxu0 %v8960_v55  ;;  %v2323_v55 = vrot.slane %v2317_v52, 2  ;;  %v2498_v52 = vrot.slane %v2492_v51, 2 }
 0x232   : > { %1951 = vmatprep.subr.bf16.mxu0 %v8965_v57  ;;  %v2385_v57 = vld [vmem:[#allocation3 + $0x10] sm:$0x3f] }
 0x233   : > { %2328 = vrot.lane.b32.xlu1 %v2323_v55, %s11592_s15  ;;  %2393 = vrot.lane.b32.xlu0 %v2385_v57, %s11563_s24  ;;  %s11594_s24 = smov 63  }
 0x235   : > { %1952 = vmatpush1.bf16.msra.mxu0 %v8963_v58  ;;  %v9002_v58 = vld [vmem:[%s11516_s11 + $0x2a0] ss:$8 sps:$4 sm:$0xff]  }
 0x236   : > { %1953 = vmatprep.subr.bf16.mxu0 %v8968_v59  ;;  %v9007_v59 = vld [vmem:[%s11516_s11 + $0x2b4] ss:$8 sps:$4 sm:$0xff]  }
 0x239   : > { %1954 = vmatpush1.bf16.msra.mxu0 %v8966_v60  ;;  %v2458_v60 = vrot.slane %v2452_v56, 6 }
 0x23a   : > { %1955 = vmatprep.subr.bf16.mxu0 %v8971_v61  ;;  %v9005_v61 = vld [vmem:[%s11516_s11 + $0x2b0] ss:$8 sps:$4 sm:$0xff]  }
 0x23b   : > { %2463 = vrot.lane.b32.xlu1 %v2458_v60, %s11559_s23  ;;  %s11601_s23 = smov 126  }
 0x23d   : > { %1956 = vmatpush1.bf16.msra.mxu0 %v8969_v62  ;;  %v9010_v62 = vld [vmem:[%s11516_s11 + $0x2c4] ss:$8 sps:$4 sm:$0xff]  }
 0x23e   : > { %1966 = vmatprep.subr.bf16.mxu0 %v8974_v63  ;;  %v1053_v63 = vadd.f32 %v9679_v16, %v9672_v4  ;;  %v9016_v16 = vld [vmem:[%s11516_s11 + $0x2e4] ss:$8 sps:$4 sm:$0xff]  }
 0x23f   : > { %v9064_v4 = vld [vmem:[%s11516_s11 + $0x3e4] ss:$8 sps:$4 sm:$0xff]  }
 0x240   : > { %1958 = vmatmul.mubr.bf16.vlgmr.msra.gmra.mrb[8].mxu0 %v1110_v3  ;;  %9136 = vtanh.f32 %v1053_v63  ;;  %v9011_v3 = vld [vmem:[%s11516_s11 + $0x2d0] ss:$8 sps:$4 sm:$0xff]  }
 0x241   : > { %1967 = vmatpush1.bf16.msra.mxu0 %v8972_v2  ;;  %1998 = vmatprep.mubr.bf16.mxu0 %v1113_v6  ;;  %v9013_v2 = vld [vmem:[%s11516_s11 + $0x2d4] ss:$8 sps:$4 sm:$0xff]   ;;  %9138 = vtanh.f32 %v1096_v1  ;;  %v9017_v6 = vld [vmem:[%s11516_s11 + $0x2f0] ss:$8 sps:$4 sm:$0xff]  }
 0x242   : > { %1968 = vmatprep.subr.bf16.mxu0 %v8977_v5  ;;  %v9019_v5 = vld [vmem:[%s11516_s11 + $0x2f4] ss:$8 sps:$4 sm:$0xff]   ;;  %9140 = vtanh.f32 %v1094_v40 }
 0x245   : > { %1969 = vmatpush1.bf16.msra.mxu0 %v8975_v7  ;;  %v9022_v7 = vld [vmem:[%s11516_s11 + $0x304] ss:$8 sps:$4 sm:$0xff]  }
 0x246   : > { %1970 = vmatprep.subr.bf16.mxu0 %v8980_v9 }
 0x249   : > { %1971 = vmatpush1.bf16.msra.mxu0 %v8978_v10 }
 0x24a   : > { %1972 = vmatprep.subr.bf16.mxu0 %v8983_v11  ;;  %v9137_v9 = vpop.eup %9136  ;;  %v9020_v11 = vld [vmem:[%s11516_s11 + $0x300] ss:$8 sps:$4 sm:$0xff]  }
 0x24b   : > { %v9139_v10 = vpop.eup %9138  ;;  %v1112_v12 = vpack.c.bf16 %v9137_v9, %v9137_v9 }
 0x24c   : > { %v1115_v14 = vpack.c.bf16 %v9139_v10, %v9139_v10  ;;  %v9141_v46 = vpop.eup %9140 }
 0x24d   : > { %1973 = vmatpush1.bf16.msra.mxu0 %v8981_v15  ;;  %v9023_v15 = vld [vmem:[%s11516_s11 + $0x310] ss:$8 sps:$4 sm:$0xff]   ;;  %v1114_v47 = vpack.c.bf16 %v9141_v46, %v9141_v46 }
 0x24e   : > { %1974 = vmatprep.subr.bf16.mxu0 %v8986_v21  ;;  %v9031_v21 = vld [vmem:[%s11516_s11 + $0x334] ss:$8 sps:$4 sm:$0xff]  }
 0x251   : > { %1975 = vmatpush1.bf16.msra.mxu0 %v8984_v27  ;;  %v9035_v27 = vld [vmem:[%s11516_s11 + $0x350] ss:$8 sps:$4 sm:$0xff]  }
 0x252   : > { %1976 = vmatprep.subr.bf16.mxu0 %v8989_v28  ;;  %v9040_v28 = vld [vmem:[%s11516_s11 + $0x364] ss:$8 sps:$4 sm:$0xff]  }
 0x255   : > { %1977 = vmatpush1.bf16.msra.mxu0 %v8987_v32  ;;  %v9046_v32 = vld [vmem:[%s11516_s11 + $0x384] ss:$8 sps:$4 sm:$0xff]  }
 0x256   : > { %1978 = vmatprep.subr.bf16.mxu0 %v8992_v33  ;;  %v9044_v33 = vld [vmem:[%s11516_s11 + $0x380] ss:$8 sps:$4 sm:$0xff]  }
 0x259   : > { %1979 = vmatpush1.bf16.msra.mxu0 %v8990_v38  ;;  %v9055_v38 = vld [vmem:[%s11516_s11 + $0x3b4] ss:$8 sps:$4 sm:$0xff]  }
 0x25a   : > { %1980 = vmatprep.subr.bf16.mxu0 %v8995_v25  ;;  %v9053_v25 = vld [vmem:[%s11516_s11 + $0x3b0] ss:$8 sps:$4 sm:$0xff]  }
 0x25d   : > { %1981 = vmatpush1.bf16.msra.mxu0 %v8993_v43  ;;  %v9059_v43 = vld [vmem:[%s11516_s11 + $0x3d0] ss:$8 sps:$4 sm:$0xff]  }
 0x25e   : > { %1982 = vmatprep.subr.bf16.mxu0 %v8998_v44  ;;  %v9067_v44 = vld [vmem:[%s11516_s11 + $0x3f4] ss:$8 sps:$4 sm:$0xff]  }
 0x261   : > { %1983 = vmatpush1.bf16.msra.mxu0 %v8996_v48  ;;  %v2404_v48 = vld [vmem:[#allocation3 + $0x10] sm:$0x3f] }
 0x262   : > { %1984 = vmatprep.subr.bf16.mxu0 %v9001_v49  ;;  %v2474_v49 = vld [vmem:[#allocation3 + $0x10] sm:$0x3f]  ;;  %v2410_v50 = vrot.slane %v2404_v48, 2 }
 0x263   : > { %2482 = vrot.lane.b32.xlu1 %v2474_v49, %s11593_s19 }
 0x264   : > { %2415 = vrot.lane.b32.xlu0 %v2410_v50, %s11568_s14  ;;  %s11603_s14 = smov 111  }
 0x265   : > { %1985 = vmatpush1.bf16.msra.mxu0 %v8999_v53  ;;  %v2428_v53 = vld [vmem:[#allocation3 + $0x10] sm:$0x3f] }
 0x266   : > { %1986 = vmatprep.subr.bf16.mxu0 %v9004_v54  ;;  %v2434_v54 = vrot.slane %v2428_v53, 4 }
 0x267   : > { %2503 = vrot.lane.b32.xlu1 %v2498_v52, %s11594_s24 }
 0x268   : > { %2439 = vrot.lane.b32.xlu0 %v2434_v54, %s11570_s28  ;;  %s11605_s28 = smov 80  }
 0x269   : > { %1987 = vmatpush1.bf16.msra.mxu0 %v9002_v58 }
 0x26a   : > { %1988 = vmatprep.subr.bf16.mxu0 %v9007_v59 }
 0x26d   : > { %1989 = vmatpush1.bf16.msra.mxu0 %v9005_v61 }
 0x26e   : > { %1990 = vmatprep.subr.bf16.mxu0 %v9010_v62 }
 0x26f   : > { %v10036_v51 = vpop.permute.xlu0 %2177 }
 0x271   : > { %1991 = vmatpush1.bf16.msra.mxu0 %v9008_v0 }
 0x272   : > { %1992 = vmatprep.subr.bf16.mxu0 %v9013_v2 }
 0x275   : > { %1993 = vmatpush1.bf16.msra.mxu0 %v9011_v3 }
 0x276   : > { %1994 = vmatprep.subr.bf16.mxu0 %v9016_v16 }
 0x279   : > { %1995 = vmatpush1.bf16.msra.mxu0 %v9014_v19 }
 0x27a   : > { %1996 = vmatprep.subr.bf16.mxu0 %v9019_v5 }
 0x27d   : > { %1997 = vmatpush1.bf16.msra.mxu0 %v9017_v6 }
 0x27e   : > { %2007 = vmatprep.subr.bf16.mxu0 %v9022_v7 }
 0x280   : > { %1999 = vmatmul.mubr.bf16.vlgmr.msra.gmra.mrb[8].mxu0 %v1112_v12 }
 0x281   : > { %2008 = vmatpush1.bf16.msra.mxu0 %v9020_v11  ;;  %2039 = vmatprep.mubr.bf16.mxu0 %v1115_v14 }
 0x282   : > { %2009 = vmatprep.subr.bf16.mxu0 %v9025_v13 }
 0x285   : > { %2010 = vmatpush1.bf16.msra.mxu0 %v9023_v15 }
 0x286   : > { %2011 = vmatprep.subr.bf16.mxu0 %v9028_v18 }
 0x289   : > { %2012 = vmatpush1.bf16.msra.mxu0 %v9026_v20 }
 0x28a   : > { %2013 = vmatprep.subr.bf16.mxu0 %v9031_v21 }
 0x28d   : > { %2014 = vmatpush1.bf16.msra.mxu0 %v9029_v22 }
 0x28e   : > { %2015 = vmatprep.subr.bf16.mxu0 %v9034_v23 }
 0x291   : > { %2016 = vmatpush1.bf16.msra.mxu0 %v9032_v24 }
 0x292   : > { %2017 = vmatprep.subr.bf16.mxu0 %v9037_v26 }
 0x295   : > { %2018 = vmatpush1.bf16.msra.mxu0 %v9035_v27 }
 0x296   : > { %2019 = vmatprep.subr.bf16.mxu0 %v9040_v28 }
 0x299   : > { %2020 = vmatpush1.bf16.msra.mxu0 %v9038_v29 }
 0x29a   : > { %2021 = vmatprep.subr.bf16.mxu0 %v9043_v30 }
 0x29d   : > { %2022 = vmatpush1.bf16.msra.mxu0 %v9041_v31 }
 0x29e   : > { %2023 = vmatprep.subr.bf16.mxu0 %v9046_v32 }
 0x2a1   : > { %2024 = vmatpush1.bf16.msra.mxu0 %v9044_v33 }
 0x2a2   : > { %2025 = vmatprep.subr.bf16.mxu0 %v9049_v34 }
 0x2a5   : > { %2026 = vmatpush1.bf16.msra.mxu0 %v9047_v35 }
 0x2a6   : > { %2027 = vmatprep.subr.bf16.mxu0 %v9052_v36 }
 0x2a9   : > { %2028 = vmatpush1.bf16.msra.mxu0 %v9050_v37 }
 0x2aa   : > { %2029 = vmatprep.subr.bf16.mxu0 %v9055_v38 }
 0x2ad   : > { %2030 = vmatpush1.bf16.msra.mxu0 %v9053_v25 }
 0x2ae   : > { %2031 = vmatprep.subr.bf16.mxu0 %v9058_v39 }
 0x2b1   : > { %2032 = vmatpush1.bf16.msra.mxu0 %v9056_v41 }
 0x2b2   : > { %2033 = vmatprep.subr.bf16.mxu0 %v9061_v42 }
 0x2b5   : > { %2034 = vmatpush1.bf16.msra.mxu0 %v9059_v43 }
 0x2b6   : > { %2035 = vmatprep.subr.bf16.mxu0 %v9064_v4  ;;  %v10029_v4 = vpop.permute.xlu1 %2068 }
 0x2b9   : > { %2036 = vmatpush1.bf16.msra.mxu0 %v9062_v17 }
 0x2ba   : > { %2037 = vmatprep.subr.bf16.mxu0 %v9067_v44  ;;  %v10034_v48 = vpop.permute.xlu1 %2091 }
 0x2bd   : > { %2038 = vmatpush1.bf16.msra.mxu0 %v9065_v45 }
 0x2c0   : > { %2040 = vmatmul.mubr.bf16.vlgmr.msra.gmra.mrb[8].mxu0 %v1114_v47 }
 0x393   : > { %v2041_v55 = vpop.f32.mrb[8].mxu0 }
 0x394   : > { %2048 = vst [vmem:[#allocation3] sm:$0x3f] %v2041_v55  ;;  %v2043_v56 = vpop.f32.mrb[9].mxu0 }
 0x395   : > { %2049 = vst [vmem:[#allocation3 + $0x8] sm:$0x3f] %v2043_v56  ;;  %v2045_v57 = vpop.f32.mrb[10].mxu0 }
 0x396   : > { %v2046_v58 = vpop.f32.mrb[11].mxu0  ;;  %v10041_v57 = vpop.permute.xlu1 %2114 }
 0x397   : > { %v10044_v58 = vpop.permute.xlu0 %2201 }
 0x39b   : > { %v2051_v59 = vld [vmem:[#allocation3] sm:$0x3f] }
 0x39c   : > { %v2122_v60 = vld [vmem:[#allocation3] sm:$0x3f]  ;;  %2053 = vst [vmem:[#allocation4] sm:$0x3f] %v2051_v59  ;;  %v2052_v61 = vld [vmem:[#allocation3 + $0x8] sm:$0x3f] }
 0x39d   : > { %2128 = vrot.lane.b32.xlu1 %v2122_v60, %s11567_s18  ;;  %v2123_v62 = vld [vmem:[#allocation3 + $0x8] sm:$0x3f]  ;;  %2054 = vst [vmem:[#allocation4 + $0x8] sm:$0x3f] %v2052_v61  ;;  %v2210_v63 = vld [vmem:[#allocation3] sm:$0x3f] }
 0x39e   : > { %2130 = vrot.lane.b32.xlu0 %v2123_v62, %s11567_s18  ;;  %v2298_v0 = vld [vmem:[#allocation3 + $0x8] sm:$0x3f]  ;;  %v2297_v1 = vld [vmem:[#allocation3] sm:$0x3f]  ;;  %s11602_s18 = smov 108  }
 0x39f   : > { %v2473_v2 = vld [vmem:[#allocation3 + $0x8] sm:$0x3f]  ;;  %v2055_v3 = vld [vmem:[#allocation3] sm:$0x3f]  ;;  %v2515_v60 = vld [vmem:[#allocation3 + $0x10] sm:$0x3f] }
 0x3a0   : > { %v2383_v16 = vld [vmem:[#allocation3] sm:$0x3f]  ;;  %v2061_v19 = vrot.slane %v2055_v3, 2  ;;  %v2211_v10 = vld [vmem:[#allocation3 + $0x8] sm:$0x3f]  ;;  %v10050_v3 = vpop.permute.xlu0 %2220 }
 0x3a1   : > { %2216 = vrot.lane.b32.xlu1 %v2210_v63, %s11595_s27  ;;  %v2101_v5 = vld [vmem:[#allocation3] sm:$0x3f]  ;;  %v2384_v13 = vld [vmem:[#allocation3 + $0x8] sm:$0x3f]  ;;  %v2521_v63 = vrot.slane %v2515_v60, 4 }
 0x3a2   : > { %2305 = vrot.lane.b32.xlu0 %v2298_v0, %s11591_s29  ;;  %v2472_v6 = vld [vmem:[#allocation3] sm:$0x3f]  ;;  %v2107_v7 = vrot.slane %v2101_v5, 6  ;;  %v2056_v25 = vld [vmem:[#allocation3 + $0x8] sm:$0x3f] }
 0x3a3   : > { %v2140_v9 = vld [vmem:[#allocation3] sm:$0x3f]  ;;  %v2062_v40 = vrot.slane %v2056_v25, 2  ;;  %v2165_v42 = vld [vmem:[#allocation3 + $0x8] sm:$0x3f] }
 0x3a4   : > { %v2146_v11 = vrot.slane %v2140_v9, 2  ;;  %v2188_v12 = vld [vmem:[#allocation3] sm:$0x3f]  ;;  %v2171_v17 = vrot.slane %v2165_v42, 4  ;;  %v2189_v45 = vld [vmem:[#allocation3 + $0x8] sm:$0x3f] }
 0x3a5   : > { %2303 = vrot.lane.b32.xlu1 %v2297_v1, %s11591_s29  ;;  %s11599_s29 = smov 112   ;;  %v2194_v14 = vrot.slane %v2188_v12, 6  ;;  %v2078_v15 = vld [vmem:[#allocation3] sm:$0x3f]  ;;  %v2079_v46 = vld [vmem:[#allocation3 + $0x8] sm:$0x3f]  ;;  %v10048_v1 = vpop.permute.xlu1 %2132 }
 0x3a6   : > { %2480 = vrot.lane.b32.xlu0 %v2473_v2, %s11593_s19  ;;  %v2229_v18 = vld [vmem:[#allocation3] sm:$0x3f]  ;;  %v2084_v20 = vrot.slane %v2078_v15, 4  ;;  %v2195_v47 = vrot.slane %v2189_v45, 6  ;;  %v2085_v49 = vrot.slane %v2079_v46, 4 }
 0x3a7   : > { %v2235_v21 = vrot.slane %v2229_v18, 2  ;;  %v2164_v22 = vld [vmem:[#allocation3] sm:$0x3f]  ;;  %v2230_v50 = vld [vmem:[#allocation3 + $0x8] sm:$0x3f] }
 0x3a8   : > { %v2276_v23 = vld [vmem:[#allocation3] sm:$0x3f]  ;;  %v2170_v24 = vrot.slane %v2164_v22, 4  ;;  %v2102_v52 = vld [vmem:[#allocation3 + $0x8] sm:$0x3f]  ;;  %v2236_v53 = vrot.slane %v2230_v50, 2 }
 0x3a9   : > { %2389 = vrot.lane.b32.xlu1 %v2383_v16, %s11596_s20  ;;  %v2282_v26 = vrot.slane %v2276_v23, 6  ;;  %v2253_v27 = vld [vmem:[#allocation3] sm:$0x3f]  ;;  %v2108_v54 = vrot.slane %v2102_v52, 6  ;;  %v2254_v55 = vld [vmem:[#allocation3 + $0x8] sm:$0x3f]  ;;  %v10055_v9 = vpop.permute.xlu1 %2153 }
 0x3aa   : > { %2064 = vrot.lane.b32.xlu0 %v2061_v19, %s11597_s17  ;;  %v2315_v28 = vld [vmem:[#allocation3] sm:$0x3f]  ;;  %v2259_v29 = vrot.slane %v2253_v27, 4  ;;  %v2141_v56 = vld [vmem:[#allocation3 + $0x8] sm:$0x3f]  ;;  %v2260_v59 = vrot.slane %v2254_v55, 4 }
 0x3ab   : > { %v2321_v30 = vrot.slane %v2315_v28, 2  ;;  %v2338_v31 = vld [vmem:[#allocation3] sm:$0x3f]  ;;  %v2147_v61 = vrot.slane %v2141_v56, 2  ;;  %v2339_v2 = vld [vmem:[#allocation3 + $0x8] sm:$0x3f] }
 0x3ac   : > { %v2361_v32 = vld [vmem:[#allocation3] sm:$0x3f]  ;;  %v2344_v33 = vrot.slane %v2338_v31, 4  ;;  %v2277_v16 = vld [vmem:[#allocation3 + $0x8] sm:$0x3f]  ;;  %v2345_v19 = vrot.slane %v2339_v2, 4 }
 0x3ad   : > { %2478 = vrot.lane.b32.xlu1 %v2472_v6, %s11593_s19  ;;  %v2367_v34 = vrot.slane %v2361_v32, 6  ;;  %v2426_v35 = vld [vmem:[#allocation3] sm:$0x3f]  ;;  %v2283_v5 = vrot.slane %v2277_v16, 6  ;;  %v2362_v6 = vld [vmem:[#allocation3 + $0x8] sm:$0x3f] }
 0x3ae   : > { %2110 = vrot.lane.b32.xlu0 %v2107_v7, %s11598_s30  ;;  %v2402_v36 = vld [vmem:[#allocation3] sm:$0x3f]  ;;  %v2432_v37 = vrot.slane %v2426_v35, 4  ;;  %v2316_v7 = vld [vmem:[#allocation3 + $0x8] sm:$0x3f] }
 0x3af   : > { %v2408_v38 = vrot.slane %v2402_v36, 2  ;;  %v2450_v39 = vld [vmem:[#allocation3] sm:$0x3f]  ;;  %v2538_v12 = vld [vmem:[#allocation3 + $0x10] sm:$0x3f] }
 0x3b0   : > { %v2456_v41 = vrot.slane %v2450_v39, 6  ;;  %v2490_v43 = vld [vmem:[#allocation3] sm:$0x3f]  ;;  %v2544_v15 = vrot.slane %v2538_v12, 6  ;;  %v2451_v23 = vld [vmem:[#allocation3 + $0x8] sm:$0x3f] }
 0x3b1   : > { %2218 = vrot.lane.b32.xlu1 %v2211_v10, %s11595_s27  ;;  %v2496_v44 = vrot.slane %v2490_v43, 2  ;;  %v2513_v62 = vld [vmem:[#allocation3] sm:$0x3f]  ;;  %v10058_v10 = vpop.permute.xlu0 %2242  ;;  %v2491_v27 = vld [vmem:[#allocation3 + $0x8] sm:$0x3f]  ;;  %v2635_v43 = vld [vmem:[%s11612_s4] sm:$0xff] }
 0x3b2   : > { %2149 = vrot.lane.b32.xlu0 %v2146_v11, %s11599_s29  ;;  %v2519_v0 = vrot.slane %v2513_v62, 4  ;;  %v2368_v11 = vrot.slane %v2362_v6, 6  ;;  %v2497_v31 = vrot.slane %v2491_v27, 2  ;;  %v2514_v32 = vld [vmem:[#allocation3 + $0x8] sm:$0x3f]  ;;  %v2636_v45 = vld [vmem:[%s11612_s4 + $0x8] sm:$0xff] }
 0x3b3   : > { %v2558_v39 = vld [vmem:[#allocation3 + $0x8] sm:$0x3f]  ;;  %s9286_s4 = smov 115  }
 0x3b5   : > { %2391 = vrot.lane.b32.xlu1 %v2384_v13, %s11596_s20  ;;  %s11604_s20 = smov 96   ;;  %v2322_v13 = vrot.slane %v2316_v7, 2  ;;  %v10064_v22 = vpop.permute.xlu0 %2266 }
 0x3b6   : > { %2197 = vrot.lane.b32.xlu0 %v2194_v14, %s11600_s16  ;;  %v2403_v14 = vld [vmem:[#allocation3 + $0x8] sm:$0x3f] }
 0x3b7   : > { %v2409_v18 = vrot.slane %v2403_v14, 2 }
 0x3b9   : > { %2087 = vrot.lane.b32.xlu1 %v2084_v20, %s11601_s23  ;;  %v10062_v20 = vpop.permute.xlu1 %2289 }
 0x3ba   : > { %2238 = vrot.lane.b32.xlu0 %v2235_v21, %s11602_s18  ;;  %v2427_v21 = vld [vmem:[#allocation3 + $0x8] sm:$0x3f] }
 0x3bd   : > { %2173 = vrot.lane.b32.xlu1 %v2170_v24, %s11603_s14  ;;  %v2433_v24 = vrot.slane %v2427_v21, 4  ;;  %v2308_v28 = vpop.permute.xlu1 %2307 }
 0x3be   : > { %2285 = vrot.lane.b32.xlu0 %v2282_v26, %s11589_s21  ;;  %v2457_v26 = vrot.slane %v2451_v23, 6 }
 0x3c1   : > { %2262 = vrot.lane.b32.xlu1 %v2259_v29, %s11604_s20  ;;  %v10070_v29 = vpop.permute.xlu0 %2351  ;;  %v10074_v35 = vpop.permute.xlu1 %2328 }
 0x3c2   : > { %2324 = vrot.lane.b32.xlu0 %v2321_v30, %s11592_s15  ;;  %v2557_v30 = vld [vmem:[#allocation3] sm:$0x3f] }
 0x3c5   : > { %2347 = vrot.lane.b32.xlu1 %v2344_v33, %s11590_s22  ;;  %v2536_v33 = vld [vmem:[#allocation3] sm:$0x3f] }
 0x3c6   : > { %2370 = vrot.lane.b32.xlu0 %v2367_v34, %s11605_s28  ;;  %v2520_v34 = vrot.slane %v2514_v32, 4  ;;  %v2542_v36 = vrot.slane %v2536_v33, 6 }
 0x3c9   : > { %2435 = vrot.lane.b32.xlu1 %v2432_v37, %s11606_s0  ;;  %v2537_v37 = vld [vmem:[#allocation3 + $0x8] sm:$0x3f] }
 0x3ca   : > { %2411 = vrot.lane.b32.xlu0 %v2408_v38, %s11607_s1  ;;  %v10076_v38 = vpop.permute.xlu0 %2374  ;;  %v2543_v25 = vrot.slane %v2537_v37, 6 }
 0x3cd   : > { %2066 = vrot.lane.b32.xlu1 %v2062_v40, %s11597_s17  ;;  %v10081_v40 = vpop.permute.xlu1 %2463 }
 0x3ce   : > { %2459 = vrot.lane.b32.xlu0 %v2456_v41, %s11608_s2  ;;  %v2559_v41 = vld [vmem:[#allocation3 + $0x10] sm:$0x3f]  ;;  %v2394_v42 = vpop.permute.xlu0 %2393 }
 0x3d1   : > { %2175 = vrot.lane.b32.xlu1 %v2171_v17, %s11603_s14  ;;  %v9068_v17 = vld [vmem:[%s11613_s3 + $0x4] ss:$8 sps:$4 sm:$0xff]  }
 0x3d2   : > { %2499 = vrot.lane.b32.xlu0 %v2496_v44, %s11594_s24  ;;  %v2483_v44 = vpop.permute.xlu1 %2482  ;;  %7363 = vmatprep.mubr.msk.bf16.mxu0 %vm2656_vm13, %v9068_v17  ;;  %v10094_v46 = vpop.permute.xlu0 %2415  ;;  %vm2660_vm13 = vcmask 1042432  }
 0x3d5   : > { %2199 = vrot.lane.b32.xlu1 %v2195_v47, %s11600_s16 }
 0x3d6   : > { %2089 = vrot.lane.b32.xlu0 %v2085_v49, %s11601_s23  ;;  %v10096_v47 = vpop.permute.xlu1 %2503  ;;  %v10098_v49 = vpop.permute.xlu0 %2439 }
 0x3d9   : > { %2240 = vrot.lane.b32.xlu1 %v2236_v53, %s11602_s18 }
 0x3da   : > { %2112 = vrot.lane.b32.xlu0 %v2108_v54, %s11598_s30 }
 0x3dd   : > { %2264 = vrot.lane.b32.xlu1 %v2260_v59, %s11604_s20 }
 0x3de   : > { %2151 = vrot.lane.b32.xlu0 %v2147_v61, %s11599_s29 }
 0x3e1   : > { %2522 = vrot.lane.b32.xlu1 %v2519_v0, %s11609_s9 }
 0x3e2   : > { %2526 = vrot.lane.b32.xlu0 %v2521_v63, %s11609_s9 }
 0x3e5   : > { %2349 = vrot.lane.b32.xlu1 %v2345_v19, %s11590_s22  ;;  %s11611_s22 = smov 60  }
 0x3e6   : > { %2287 = vrot.lane.b32.xlu0 %v2283_v5, %s11589_s21  ;;  %s11610_s21 = smov 61  }
 0x3e9   : > { %2372 = vrot.lane.b32.xlu1 %v2368_v11, %s11605_s28 }
 0x3ea   : > { %2326 = vrot.lane.b32.xlu0 %v2322_v13, %s11592_s15  ;;  %s9283_s15 = smov 117  }
 0x3ed   : > { %2413 = vrot.lane.b32.xlu1 %v2409_v18, %s11607_s1 }
 0x3ee   : > { %2549 = vrot.lane.b32.xlu0 %v2544_v15, %s11610_s21 }
 0x3f1   : > { %2437 = vrot.lane.b32.xlu1 %v2433_v24, %s11606_s0 }
 0x3f2   : > { %2461 = vrot.lane.b32.xlu0 %v2457_v26, %s11608_s2  ;;  %s9278_s2 = smov 120  }
 0x3f5   : > { %2563 = vrot.lane.b32.xlu1 %v2557_v30, %s11611_s22 }
 0x3f6   : > { %2501 = vrot.lane.b32.xlu0 %v2497_v31, %s11594_s24  ;;  %s9284_s24 = smov 48  }
 0x3f9   : > { %2524 = vrot.lane.b32.xlu1 %v2520_v34, %s11609_s9  ;;  %s9279_s9 = smov 121  }
 0x3fa   : > { %2545 = vrot.lane.b32.xlu0 %v2542_v36, %s11610_s21 }
 0x3fd   : > { %2547 = vrot.lane.b32.xlu1 %v2543_v25, %s11610_s21  ;;  %s9285_s21 = smov 114  }
 0x3fe   : > { %2565 = vrot.lane.b32.xlu0 %v2558_v39, %s11611_s22 }
 0x401   : > { %2567 = vrot.lane.b32.xlu1 %v2559_v41, %s11611_s22  ;;  %s11618_s22 = smov 32  }
 0x402   : > { %2639 = vperm.xlu0 %8874, %v2635_v43  }
 0x405   : > { %2644 = vperm.xlu1 %8875, %v2636_v45  }
 0x40f   : > { %v2129_v50 = vpop.permute.xlu1 %2128 }
 0x410   : > { %v2131_v52 = vpop.permute.xlu0 %2130 }
 0x411   : > { %v2134_v53 = vsel %vm520_vm4, %v2129_v50, %v2131_v52  ;;  %v2135_v54 = vsel %vm520_vm4, %v2131_v52, %v10048_v1  ;;  %vm2222_vm4 = vcmask 891904  }
 0x412   : > { %2138 = vst [vmem:[#allocation4 + $0x30] sm:$0x3f] %v2134_v53  ;;  %2139 = vst [vmem:[#allocation4 + $0x38] sm:$0x3f] %v2135_v54 }
 0x413   : > { %v2217_v55 = vpop.permute.xlu1 %2216 }
 0x414   : > { %v2306_v56 = vpop.permute.xlu0 %2305 }
 0x415   : > { %v2310_v59 = vsel %vm571_vm7, %v2306_v56, %v2308_v28 }
 0x416   : > { %2314 = vst [vmem:[#allocation4 + $0x98] sm:$0x3f] %v2310_v59 }
 0x417   : > { %v2304_v60 = vpop.permute.xlu1 %2303 }
 0x418   : > { %v2309_v61 = vsel %vm571_vm7, %v2304_v60, %v2306_v56  ;;  %v2481_v62 = vpop.permute.xlu0 %2480  ;;  %vm2395_vm7 = vcmask 646144  }
 0x419   : > { %2313 = vst [vmem:[#allocation4 + $0x90] sm:$0x3f] %v2309_v61  ;;  %v2485_v63 = vsel %vm622_vm10, %v2481_v62, %v2483_v44 }
 0x41a   : > { %2489 = vst [vmem:[#allocation4 + $0xf8] sm:$0x3f] %v2485_v63 }
 0x41b   : > { %v2390_v0 = vpop.permute.xlu1 %2389 }
 0x41c   : > { %v2065_v2 = vpop.permute.xlu0 %2064 }
 0x41f   : > { %v2479_v16 = vpop.permute.xlu1 %2478 }
 0x420   : > { %v2484_v1 = vsel %vm622_vm10, %v2479_v16, %v2481_v62  ;;  %v2111_v19 = vpop.permute.xlu0 %2110  ;;  %vm2179_vm10 = vcmask 908288  }
 0x421   : > { %2488 = vst [vmem:[#allocation4 + $0xf0] sm:$0x3f] %v2484_v1 }
 0x423   : > { %v2219_v5 = vpop.permute.xlu1 %2218 }
 0x424   : > { %v2223_v6 = vsel %vm2222_vm4, %v2217_v55, %v2219_v5  ;;  %v2224_v7 = vsel %vm2222_vm4, %v2219_v5, %v10050_v3  ;;  %v10108_v11 = vpop.permute.xlu0 %2149  ;;  %vm2954_vm4 = vcmask 130048  }
 0x425   : > { %2227 = vst [vmem:[#allocation4 + $0x60] sm:$0x3f] %v2223_v6  ;;  %2228 = vst [vmem:[#allocation4 + $0x68] sm:$0x3f] %v2224_v7 }
 0x427   : > { %v2392_v12 = vpop.permute.xlu1 %2391 }
 0x428   : > { %v2396_v13 = vsel %vm2395_vm7, %v2390_v0, %v2392_v12  ;;  %v2397_v14 = vsel %vm2395_vm7, %v2392_v12, %v2394_v42  ;;  %v2198_v15 = vpop.permute.xlu0 %2197  ;;  %vm6971_vm7 = vcmask 982016  }
 0x429   : > { %2400 = vst [vmem:[#allocation4 + $0xc0] sm:$0x3f] %v2396_v13  ;;  %2401 = vst [vmem:[#allocation4 + $0xc8] sm:$0x3f] %v2397_v14 }
 0x42b   : > { %v2088_v18 = vpop.permute.xlu1 %2087 }
 0x42c   : > { %v2239_v21 = vpop.permute.xlu0 %2238 }
 0x42f   : > { %v2174_v23 = vpop.permute.xlu1 %2173 }
 0x430   : > { %v10110_v24 = vpop.permute.xlu0 %2285 }
 0x433   : > { %v2263_v26 = vpop.permute.xlu1 %2262 }
 0x434   : > { %v10112_v27 = vpop.permute.xlu0 %2324 }
 0x437   : > { %v2348_v3 = vpop.permute.xlu1 %2347 }
 0x438   : > { %v10114_v28 = vpop.permute.xlu0 %2370 }
 0x43b   : > { %v10116_v30 = vpop.permute.xlu1 %2435 }
 0x43c   : > { %v10118_v31 = vpop.permute.xlu0 %2411 }
 0x43f   : > { %v2067_v32 = vpop.permute.xlu1 %2066 }
 0x440   : > { %v2070_v33 = vsel %vm469_vm2, %v2065_v2, %v2067_v32  ;;  %v2071_v34 = vsel %vm469_vm2, %v2067_v32, %v10029_v4  ;;  %v10123_v36 = vpop.permute.xlu0 %2459  ;;  %vm2244_vm2 = vcmask 883712  }
 0x441   : > { %2074 = vst [vmem:[#allocation4 + $0x10] ss:$-12 sps:$4 sm:$0xcf] %v2070_v33   ;;  %2075 = vst [vmem:[#allocation4 + $0x18] ss:$-12 sps:$4 sm:$0xcf] %v2071_v34  }
 0x443   : > { %v2176_v37 = vpop.permute.xlu1 %2175 }
 0x444   : > { %v2180_v25 = vsel %vm2179_vm10, %v2174_v23, %v2176_v37  ;;  %v2181_v39 = vsel %vm2179_vm10, %v2176_v37, %v10036_v51  ;;  %v10126_v41 = vpop.permute.xlu0 %2499  ;;  %vm7103_vm10 = vcmask 1041408  }
 0x445   : > { %2184 = vst [vmem:[#allocation4 + $0x50] ss:$-12 sps:$4 sm:$0xf3] %v2180_v25   ;;  %2185 = vst [vmem:[#allocation4 + $0x58] ss:$-12 sps:$4 sm:$0xf3] %v2181_v39  }
 0x447   : > { %v2200_v42 = vpop.permute.xlu1 %2199 }
 0x448   : > { %v2204_v43 = vsel %vm2203_vm15, %v2198_v15, %v2200_v42  ;;  %v2205_v17 = vsel %vm2203_vm15, %v2200_v42, %v10044_v58  ;;  %v2090_v44 = vpop.permute.xlu0 %2089  ;;  %v2578_v60 = vld [vmem:[#allocation4 + $0x8] sm:$0xff]  ;;  %v2577_v63 = vld [vmem:[#allocation4] sm:$0xff]  ;;  %vm7099_vm15 = vcmask 687104  }
 0x449   : > { %2208 = vst [vmem:[#allocation4 + $0x50] sm:$0xfc] %v2204_v43  ;;  %2209 = vst [vmem:[#allocation4 + $0x58] sm:$0xfc] %v2205_v17  ;;  %v2093_v4 = vsel %vm486_vm1, %v2088_v18, %v2090_v44  ;;  %v2094_v45 = vsel %vm486_vm1, %v2090_v44, %v10034_v48  ;;  %vm2376_vm1 = vcmask 654336  }
 0x44a   : > { %2097 = vst [vmem:[#allocation4 + $0x20] ss:$-12 sps:$4 sm:$0xf3] %v2093_v4   ;;  %2098 = vst [vmem:[#allocation4 + $0x28] ss:$-12 sps:$4 sm:$0xf3] %v2094_v45  }
 0x44b   : > { %v2241_v51 = vpop.permute.xlu1 %2240 }
 0x44c   : > { %v2245_v50 = vsel %vm2244_vm2, %v2239_v21, %v2241_v51  ;;  %v2246_v52 = vsel %vm2244_vm2, %v2241_v51, %v10058_v10  ;;  %v2113_v53 = vpop.permute.xlu0 %2112  ;;  %vm7148_vm2 = vcmask 7168  }
 0x44d   : > { %2249 = vst [vmem:[#allocation4 + $0x70] ss:$-12 sps:$4 sm:$0xcf] %v2245_v50   ;;  %2250 = vst [vmem:[#allocation4 + $0x78] ss:$-12 sps:$4 sm:$0xcf] %v2246_v52   ;;  %v2116_v58 = vsel %vm503_vm3, %v2111_v19, %v2113_v53  ;;  %v2117_v54 = vsel %vm503_vm3, %v2113_v53, %v10041_v57 }
 0x44e   : > { %2120 = vst [vmem:[#allocation4 + $0x20] sm:$0xfc] %v2116_v58  ;;  %2121 = vst [vmem:[#allocation4 + $0x28] sm:$0xfc] %v2117_v54  ;;  %vm2417_vm3 = vcmask 637952  }
 0x44f   : > { %v2265_v55 = vpop.permute.xlu1 %2264 }
 0x450   : > { %v2268_v48 = vsel %vm537_vm5, %v2263_v26, %v2265_v55  ;;  %v2269_v56 = vsel %vm537_vm5, %v2265_v55, %v10064_v22  ;;  %v2152_v59 = vpop.permute.xlu0 %2151  ;;  %v2588_v23 = vld [vmem:[#allocation4 + $0x58] sm:$0xff]  ;;  %vm2441_vm5 = vcmask 629760  }
 0x451   : > { %2272 = vst [vmem:[#allocation4 + $0x80] ss:$-12 sps:$4 sm:$0xf3] %v2268_v48   ;;  %2273 = vst [vmem:[#allocation4 + $0x88] ss:$-12 sps:$4 sm:$0xf3] %v2269_v56   ;;  %v2156_v10 = vsel %vm2155_vm0, %v10108_v11, %v2152_v59  ;;  %v2157_v61 = vsel %vm2155_vm0, %v2152_v59, %v10055_v9 }
 0x452   : > { %v2580_v62 = vld [vmem:[#allocation4 + $0x18] sm:$0xff]  ;;  %v2579_v57 = vld [vmem:[#allocation4 + $0x10] sm:$0xff]  ;;  %2160 = vst [vmem:[#allocation4 + $0x40] ss:$-12 sps:$4 sm:$0xcf] %v2156_v10   ;;  %vm7150_vm0 = vcmask 1024  }
 0x453   : > { %2161 = vst [vmem:[#allocation4 + $0x48] ss:$-12 sps:$4 sm:$0xcf] %v2157_v61   ;;  %v2616_v0 = vpack.c.bf16 %v2580_v62, %v2578_v60  ;;  %v2615_v2 = vpack.c.bf16 %v2579_v57, %v2577_v63  ;;  %v10141_v16 = vpop.permute.xlu1 %2522 }
 0x454   : > { %v10143_v1 = vpop.permute.xlu0 %2526  ;;  %v2590_v39 = vld [vmem:[#allocation4 + $0x68] sm:$0xff] }
 0x455   : > { %2667 = vmatprep.subr.bf16.mxu0 %v2616_v0  ;;  %v2582_v6 = vld [vmem:[#allocation4 + $0x28] sm:$0xff]  ;;  %v2581_v7 = vld [vmem:[#allocation4 + $0x20] sm:$0xff] }
 0x456   : > { %2668 = vmatpush1.bf16.msra.mxu0 %v2615_v2 }
 0x457   : > { %v2350_v22 = vpop.permute.xlu1 %2349 }
 0x458   : > { %v2353_v19 = vsel %vm605_vm9, %v2348_v3, %v2350_v22  ;;  %v2354_v5 = vsel %vm605_vm9, %v2350_v22, %v10070_v29  ;;  %v2288_v9 = vpop.permute.xlu0 %2287  ;;  %v2592_v37 = vld [vmem:[#allocation4 + $0x78] sm:$0xff] }
 0x459   : > { %2357 = vst [vmem:[#allocation4 + $0xb0] ss:$-12 sps:$4 sm:$0xf3] %v2353_v19   ;;  %2358 = vst [vmem:[#allocation4 + $0xb8] ss:$-12 sps:$4 sm:$0xf3] %v2354_v5   ;;  %v2291_v11 = vsel %vm554_vm6, %v10110_v24, %v2288_v9  ;;  %v2292_v12 = vsel %vm554_vm6, %v2288_v9, %v10062_v20  ;;  %v2622_v44 = vpack.c.bf16 %v2592_v37, %v2590_v39 }
 0x45a   : > { %v2584_v13 = vld [vmem:[#allocation4 + $0x38] sm:$0xff]  ;;  %v2583_v14 = vld [vmem:[#allocation4 + $0x30] sm:$0xff]  ;;  %v2586_v15 = vld [vmem:[#allocation4 + $0x48] sm:$0xff]  ;;  %2295 = vst [vmem:[#allocation4 + $0x80] sm:$0xfc] %v2291_v11  ;;  %vm2465_vm6 = vcmask 621568  }
 0x45b   : > { %2296 = vst [vmem:[#allocation4 + $0x88] sm:$0xfc] %v2292_v12  ;;  %v2618_v18 = vpack.c.bf16 %v2584_v13, %v2582_v6  ;;  %v2617_v21 = vpack.c.bf16 %v2583_v14, %v2581_v7  ;;  %v2373_v29 = vpop.permute.xlu1 %2372  ;;  %v2620_v24 = vpack.c.bf16 %v2588_v23, %v2586_v15  ;;  %v2585_v33 = vld [vmem:[#allocation4 + $0x40] sm:$0xff] }
 0x45c   : > { %v2377_v26 = vsel %vm2376_vm1, %v10114_v28, %v2373_v29  ;;  %v2378_v3 = vsel %vm2376_vm1, %v2373_v29, %v10076_v38  ;;  %v2327_v32 = vpop.permute.xlu0 %2326  ;;  %v2587_v28 = vld [vmem:[#allocation4 + $0x50] sm:$0xff]  ;;  %v9071_v39 = vld [vmem:[%s11517_s12 + $0x40] sm:$0xff]  }
 0x45d   : > { %2669 = vmatprep.subr.bf16.mxu0 %v2618_v18  ;;  %2381 = vst [vmem:[#allocation4 + $0xb0] sm:$0xfc] %v2377_v26  ;;  %2382 = vst [vmem:[#allocation4 + $0xb8] sm:$0xfc] %v2378_v3  ;;  %v2330_v20 = vsel %vm588_vm8, %v10112_v27, %v2327_v32  ;;  %v2331_v34 = vsel %vm588_vm8, %v2327_v32, %v10074_v35  ;;  %v2619_v25 = vpack.c.bf16 %v2587_v28, %v2585_v33  ;;  %v2591_v27 = vld [vmem:[#allocation4 + $0x70] sm:$0xff]  ;;  %v2589_v35 = vld [vmem:[#allocation4 + $0x60] sm:$0xff] }
 0x45e   : > { %2670 = vmatpush1.bf16.msra.mxu0 %v2617_v21  ;;  %2334 = vst [vmem:[#allocation4 + $0xa0] ss:$-12 sps:$4 sm:$0xcf] %v2330_v20   ;;  %2335 = vst [vmem:[#allocation4 + $0xa8] ss:$-12 sps:$4 sm:$0xcf] %v2331_v34   ;;  %v2621_v45 = vpack.c.bf16 %v2591_v27, %v2589_v35 }
 0x45f   : > { %2671 = vmatprep.subr.bf16.mxu0 %v2620_v24  ;;  %v2414_v38 = vpop.permute.xlu1 %2413  ;;  %vm11614_vm8 = vcmask 498688   ;;  %v9074_v27 = vld [vmem:[%s11517_s12 + $0x8] sm:$0xff]   ;;  %v9075_v35 = vld [vmem:[%s11517_s12 + $0x50] sm:$0xff]  }
 0x460   : > { %v2418_v42 = vsel %vm2417_vm3, %v10118_v31, %v2414_v38  ;;  %v2419_v43 = vsel %vm2417_vm3, %v2414_v38, %v10094_v46  ;;  %v2550_v17 = vpop.permute.xlu0 %2549  ;;  %vm11615_vm9 = vmmov %vm11614_vm8 }
 0x461   : > { %2422 = vst [vmem:[#allocation4 + $0xd0] ss:$-12 sps:$4 sm:$0xcf] %v2418_v42   ;;  %2423 = vst [vmem:[#allocation4 + $0xd8] ss:$-12 sps:$4 sm:$0xcf] %v2419_v43  }
 0x462   : > { %2672 = vmatpush1.bf16.msra.mxu0 %v2619_v25  ;;  %v2594_v31 = vld [vmem:[#allocation4 + $0x88] sm:$0xff]  ;;  %v2593_v53 = vld [vmem:[#allocation4 + $0x80] sm:$0xff] }
 0x463   : > { %2673 = vmatprep.subr.bf16.mxu0 %v2622_v44  ;;  %v2438_v4 = vpop.permute.xlu1 %2437  ;;  %v9070_v43 = vld [vmem:[%s11613_s3] ss:$8 sps:$4 sm:$0xff]   ;;  %s9277_s3 = smov 16  }
 0x464   : > { %v2442_v51 = vsel %vm2441_vm5, %v10116_v30, %v2438_v4  ;;  %v2443_v50 = vsel %vm2441_vm5, %v2438_v4, %v10098_v49  ;;  %v2462_v52 = vpop.permute.xlu0 %2461  ;;  %v2600_v46 = vld [vmem:[#allocation4 + $0xb8] sm:$0xff]  ;;  %v2599_v62 = vld [vmem:[#allocation4 + $0xb0] sm:$0xff]  ;;  %v9073_v44 = vld [vmem:[%s11517_s12 + $0x48] sm:$0xff]  }
 0x465   : > { %2446 = vst [vmem:[#allocation4 + $0xe0] ss:$-12 sps:$4 sm:$0xf3] %v2442_v51   ;;  %2447 = vst [vmem:[#allocation4 + $0xe8] ss:$-12 sps:$4 sm:$0xf3] %v2443_v50   ;;  %v2466_v58 = vsel %vm2465_vm6, %v10123_v36, %v2462_v52  ;;  %v2467_v54 = vsel %vm2465_vm6, %v2462_v52, %v10081_v40 }
 0x466   : > { %2674 = vmatpush1.bf16.msra.mxu0 %v2621_v45  ;;  %v2596_v55 = vld [vmem:[#allocation4 + $0x98] sm:$0xff]  ;;  %v2595_v48 = vld [vmem:[#allocation4 + $0x90] sm:$0xff]  ;;  %v2598_v56 = vld [vmem:[#allocation4 + $0xa8] sm:$0xff]  ;;  %2470 = vst [vmem:[#allocation4 + $0xe0] sm:$0xfc] %v2466_v58 }
 0x467   : > { %2471 = vst [vmem:[#allocation4 + $0xe8] sm:$0xfc] %v2467_v54  ;;  %v2624_v59 = vpack.c.bf16 %v2596_v55, %v2594_v31  ;;  %v2623_v30 = vpack.c.bf16 %v2595_v48, %v2593_v53  ;;  %v2564_v60 = vpop.permute.xlu1 %2563  ;;  %v2626_v10 = vpack.c.bf16 %v2600_v46, %v2598_v56  ;;  %v2597_v61 = vld [vmem:[#allocation4 + $0xa0] sm:$0xff]  ;;  %v9076_v4 = vld [vmem:[%s11517_s12 + $0x10] sm:$0xff]   ;;  %v9077_v45 = vld [vmem:[%s11517_s12 + $0x58] sm:$0xff]  }
 0x468   : > { %v2502_v49 = vpop.permute.xlu0 %2501  ;;  %v2625_v57 = vpack.c.bf16 %v2599_v62, %v2597_v61  ;;  %v2602_v19 = vld [vmem:[#allocation4 + $0xc8] sm:$0xff]  ;;  %v9078_v51 = vld [vmem:[%s11517_s12 + $0x18] sm:$0xff]   ;;  %v9079_v50 = vld [vmem:[%s11517_s12 + $0x60] sm:$0xff]  }
 0x469   : > { %2675 = vmatprep.subr.bf16.mxu0 %v2624_v59  ;;  %v2505_v63 = vsel %vm639_vm11, %v10126_v41, %v2502_v49  ;;  %v2506_v40 = vsel %vm639_vm11, %v2502_v49, %v10096_v47  ;;  %v2601_v41 = vld [vmem:[#allocation4 + $0xc0] sm:$0xff]  ;;  %vm11616_vm11 = vcmask 490496   ;;  %v9081_v31 = vld [vmem:[%s11517_s12 + $0x68] sm:$0xff]   ;;  %v9083_v46 = vld [vmem:[%s11517_s12 + $0x70] sm:$0xff]  }
 0x46a   : > { %2676 = vmatpush1.bf16.msra.mxu0 %v2623_v30  ;;  %2509 = vst [vmem:[#allocation4 + $0x100] ss:$-12 sps:$4 sm:$0xcf] %v2505_v63   ;;  %2510 = vst [vmem:[#allocation4 + $0x108] ss:$-12 sps:$4 sm:$0xcf] %v2506_v40  }
 0x46b   : > { %2677 = vmatprep.subr.bf16.mxu0 %v2626_v10  ;;  %v2525_v36 = vpop.permute.xlu1 %2524  ;;  %v9080_v52 = vld [vmem:[%s11517_s12 + $0x20] sm:$0xff]   ;;  %v9082_v53 = vld [vmem:[%s11517_s12 + $0x28] sm:$0xff]   ;;  %v9084_v58 = vld [vmem:[%s11517_s12 + $0x30] sm:$0xff]  }
 0x46c   : > { %v2528_v0 = vsel %vm656_vm12, %v10141_v16, %v2525_v36  ;;  %v2529_v2 = vsel %vm656_vm12, %v2525_v36, %v10143_v1  ;;  %v2546_v22 = vpop.permute.xlu0 %2545  ;;  %v2604_v5 = vld [vmem:[#allocation4 + $0xd8] sm:$0xff]  ;;  %v2603_v9 = vld [vmem:[#allocation4 + $0xd0] sm:$0xff]  ;;  %vm11617_vm12 = vmmov %vm11616_vm11 }
 0x46d   : > { %2532 = vst [vmem:[#allocation4 + $0x110] ss:$-12 sps:$4 sm:$0xf3] %v2528_v0   ;;  %2533 = vst [vmem:[#allocation4 + $0x118] ss:$-12 sps:$4 sm:$0xf3] %v2529_v2   ;;  %v2628_v47 = vpack.c.bf16 %v2604_v5, %v2602_v19  ;;  %v2627_v7 = vpack.c.bf16 %v2603_v9, %v2601_v41 }
 0x46e   : > { %2678 = vmatpush1.bf16.msra.mxu0 %v2625_v57  ;;  %v2606_v13 = vld [vmem:[#allocation4 + $0xe8] sm:$0xff]  ;;  %v2605_v15 = vld [vmem:[#allocation4 + $0xe0] sm:$0xff]  ;;  %v9085_v54 = vld [vmem:[%s11517_s12 + $0x78] sm:$0xff]  }
 0x46f   : > { %v2548_v6 = vpop.permute.xlu1 %2547  ;;  %2679 = vmatprep.subr.bf16.mxu0 %v2628_v47  ;;  %v9086_v55 = vld [vmem:[%s11517_s12 + $0x38] sm:$0xff]   ;;  %v10230_v48 = vld [vmem:[%s11510_s5] ss:$16 sps:$4 sm:$0xff]  }
 0x470   : > { %v2551_v11 = vsel %vm11614_vm8, %v2546_v22, %v2548_v6  ;;  %v2552_v12 = vsel %vm11615_vm9, %v2548_v6, %v2550_v17  ;;  %v2566_v16 = vpop.permute.xlu0 %2565  ;;  %v9072_v17 = vld [vmem:[%s11517_s12] sm:$0xff]   ;;  %4015 = vrot.lane.b32.xlu1 %v10230_v48, %s9277_s3 }
 0x471   : > { %2555 = vst [vmem:[#allocation4 + $0x110] sm:$0xfc] %v2551_v11  ;;  %2556 = vst [vmem:[#allocation4 + $0x118] sm:$0xfc] %v2552_v12  ;;  %v2569_v1 = vsel %vm11616_vm11, %v2564_v60, %v2566_v16  ;;  %v2608_v14 = vld [vmem:[#allocation4 + $0xf8] sm:$0xff]  ;;  %v2607_v18 = vld [vmem:[#allocation4 + $0xf0] sm:$0xff] }
 0x472   : > { %2680 = vmatpush1.bf16.msra.mxu0 %v2627_v7  ;;  %2573 = vst [vmem:[#allocation4 + $0x120] sm:$0x3f] %v2569_v1  ;;  %v2630_v21 = vpack.c.bf16 %v2608_v14, %v2606_v13  ;;  %v2629_v29 = vpack.c.bf16 %v2607_v18, %v2605_v15  ;;  %v10237_v56 = vld [vmem:[%s11510_s5 + $0x40] ss:$16 sps:$4 sm:$0xff]   ;;  %v10265_v14 = vld [vmem:[%s11510_s5 + $0x4] ss:$16 sps:$4 sm:$0xff]  }
 0x473   : > { %v2568_v23 = vpop.permute.xlu1 %2567  ;;  %v10244_v59 = vld [vmem:[%s11510_s5 + $0x80] ss:$16 sps:$4 sm:$0xff]   ;;  %v10281_v18 = vld [vmem:[%s11510_s5 + $0x44] ss:$16 sps:$4 sm:$0xff]  }
 0x474   : > { %v2570_v26 = vsel %vm11617_vm12, %v2566_v16, %v2568_v23  ;;  %2681 = vmatprep.subr.bf16.mxu0 %v2630_v21  ;;  %v2610_v3 = vld [vmem:[#allocation4 + $0x108] sm:$0xff]  ;;  %v2609_v24 = vld [vmem:[#allocation4 + $0x100] sm:$0xff]  ;;  %4019 = vrot.lane.b32.xlu1 %v10237_v56, %s9277_s3 }
 0x475   : > { %2574 = vst [vmem:[#allocation4 + $0x128] sm:$0x3f] %v2570_v26  ;;  %v10251_v47 = vld [vmem:[%s11510_s5 + $0xc0] ss:$16 sps:$4 sm:$0xff]   ;;  %v10313_v26 = vld [vmem:[%s11510_s5 + $0xc4] ss:$16 sps:$4 sm:$0xff]  }
 0x476   : > { %2682 = vmatpush1.bf16.msra.mxu0 %v2629_v29  ;;  %v10270_v15 = vld [vmem:[%s11510_s5 + $0x20] ss:$16 sps:$4 sm:$0xff]   ;;  %v10299_v29 = vld [vmem:[%s11510_s5 + $0x84] ss:$16 sps:$4 sm:$0xff]  }
 0x477   : > { %v10286_v21 = vld [vmem:[%s11510_s5 + $0x60] ss:$16 sps:$4 sm:$0xff]  }
 0x478   : > { %v2612_v32 = vld [vmem:[#allocation4 + $0x118] sm:$0xff]  ;;  %v2611_v33 = vld [vmem:[#allocation4 + $0x110] sm:$0xff]  ;;  %4023 = vrot.lane.b32.xlu1 %v10244_v59, %s9277_s3 }
 0x479   : > { %v2632_v20 = vpack.c.bf16 %v2612_v32, %v2610_v3  ;;  %v2631_v34 = vpack.c.bf16 %v2611_v33, %v2609_v24  ;;  %v2613_v37 = vld [vmem:[#allocation4 + $0x120] sm:$0x3f] }
 0x47a   : > { %v2633_v28 = vpack.c.bf16 %v2613_v37, %v2613_v37  ;;  %v10304_v23 = vld [vmem:[%s11510_s5 + $0xa0] ss:$16 sps:$4 sm:$0xff]   ;;  %v10333_v32 = vld [vmem:[%s11510_s5 + $0x24] ss:$16 sps:$4 sm:$0xff]  }
 0x47b   : > { %2683 = vmatprep.subr.bf16.mxu0 %v2632_v20  ;;  %v10318_v3 = vld [vmem:[%s11510_s5 + $0xe0] ss:$0 sps:$4 sm:$0xff]   ;;  %v10346_v24 = vld [vmem:[%s11510_s5 + $0x64] ss:$16 sps:$4 sm:$0xff]  }
 0x47c   : > { %2684 = vmatpush1.bf16.msra.mxu0 %v2631_v34  ;;  %v2614_v38 = vld [vmem:[#allocation4 + $0x128] sm:$0x3f]  ;;  %v2662_v42 = vsel %vm2660_vm13, %v2633_v28, 0  ;;  %4027 = vrot.lane.b32.xlu1 %v10251_v47, %s9277_s3  ;;  %v10355_v33 = vld [vmem:[%s11510_s5 + $0xa4] ss:$16 sps:$4 sm:$0xff]  }
 0x47d   : > { %v2634_v25 = vpack.c.bf16 %v2614_v38, %v2614_v38  ;;  %v10366_v20 = vld [vmem:[%s11510_s5 + $0xe4] ss:$0 sps:$4 sm:$0xff]  }
 0x47f   : > { %7362 = vmatprep.subr.msk.bf16.mxu0 %vm2660_vm13, %v2634_v25 }
 0x480   : > { %2686 = vmatpush1.bf16.msra.mxu0 %v2662_v42 }
 0x481   : > { %7629 = vmatprep.subr.bf16.mxu0 %v9071_v39  ;;  %v2640_v30 = vpop.permute.xlu0 %2639 }
 0x483   : > { %2700 = vmatmul.mubr.bf16.vlgmr.msra.gmra.mrb[12].mxu0 %v9070_v43 }
 0x484   : > { %7630 = vmatpush3.bf16.msra.mxu0 %v9072_v17  ;;  %v2645_v49 = vpop.permute.xlu1 %2644 }
 0x485   : > { %7631 = vmatprep.subr.bf16.mxu0 %v9073_v44 }
 0x488   : > { %7632 = vmatpush3.bf16.msra.mxu0 %v9074_v27 }
 0x489   : > { %7633 = vmatprep.subr.bf16.mxu0 %v9075_v35  ;;  %v10470_v35 = vld [vmem:[%s11510_s5 + $0x8] ss:$16 sps:$4 sm:$0xff]  }
 0x48c   : > { %7634 = vmatpush3.bf16.msra.mxu0 %v9076_v4 }
 0x48d   : > { %7635 = vmatprep.subr.bf16.mxu0 %v9077_v45 }
 0x490   : > { %7636 = vmatpush3.bf16.msra.mxu0 %v9078_v51  ;;  %v10481_v51 = vld [vmem:[%s11510_s5 + $0x48] ss:$16 sps:$4 sm:$0xff]  }
 0x491   : > { %7637 = vmatprep.subr.bf16.mxu0 %v9079_v50 }
 0x494   : > { %7638 = vmatpush3.bf16.msra.mxu0 %v9080_v52 }
 0x495   : > { %7639 = vmatprep.subr.bf16.mxu0 %v9081_v31  ;;  %v10493_v31 = vld [vmem:[%s11510_s5 + $0x88] ss:$16 sps:$4 sm:$0xff]  }
 0x498   : > { %7640 = vmatpush3.bf16.msra.mxu0 %v9082_v53 }
 0x499   : > { %7641 = vmatprep.subr.bf16.mxu0 %v9083_v46 }
 0x49c   : > { %7642 = vmatpush3.bf16.msra.mxu0 %v9084_v58  ;;  %v10505_v58 = vld [vmem:[%s11510_s5 + $0xc8] ss:$16 sps:$4 sm:$0xff]  }
 0x49d   : > { %7643 = vmatprep.subr.bf16.mxu0 %v9085_v54 }
 0x4a0   : > { %7644 = vmatpush3.bf16.msra.mxu0 %v9086_v55 }
 0x4e2   : > { %v4016_v41 = vpop.permute.xlu1 %4015 }
 0x4e3   : > { %8025 = vmatprep.mubr.msk.bf16.mxu1 %vm2954_vm4, %v4016_v41 }
 0x4e6   : > { %v4020_v34 = vpop.permute.xlu1 %4019 }
 0x4ea   : > { %v4024_v37 = vpop.permute.xlu1 %4023 }
 0x4ee   : > { %v4028_v28 = vpop.permute.xlu1 %4027 }
 0x556   : > { %v2701_v60 = vpop.f32.mrb[12].mxu0 }
 0x557   : > { %v2702_v10 = vadd.f32 %v2701_v60, %v2640_v30  ;;  %v2703_v61 = vpop.f32.mrb[13].mxu0 }
 0x558   : > { %v2704_v62 = vadd.f32 %v2703_v61, %v2640_v30  ;;  %v2705_v63 = vpop.f32.mrb[14].mxu0  ;;  %v10519_v30 = vld [vmem:[%s11510_s5 + $0x28] ss:$16 sps:$4 sm:$0xff]  }
 0x559   : > { %9142 = vtanh.f32 %v2702_v10  ;;  %v2706_v40 = vadd.f32 %v2705_v63, %v2645_v49  ;;  %v2707_v36 = vpop.f32.mrb[15].mxu0  ;;  %v10534_v10 = vld [vmem:[%s11510_s5 + $0x68] ss:$16 sps:$4 sm:$0xff]  }
 0x55a   : > { %9144 = vtanh.f32 %v2704_v62  ;;  %v2708_v57 = vadd.f32 %v2707_v36, %v2645_v49  ;;  %v10560_v36 = vld [vmem:[%s11510_s5 + $0xa8] ss:$16 sps:$4 sm:$0xff]  }
 0x55b   : > { %9146 = vtanh.f32 %v2706_v40 }
 0x55c   : > { %9148 = vtanh.f32 %v2708_v57 }
 0x563   : > { %v9143_v0 = vpop.eup %9142 }
 0x564   : > { %v9145_v2 = vpop.eup %9144 }
 0x565   : > { %v9147_v22 = vpop.eup %9146 }
 0x566   : > { %v9149_v19 = vpop.eup %9148  ;;  %v2714_v5 = vpack.c.bf16 %v9147_v22, %v9143_v0 }
 0x567   : > { %v2715_v9 = vpack.c.bf16 %v9149_v19, %v9145_v2  ;;  %v10575_v2 = vld [vmem:[%s11510_s5 + $0xe8] ss:$0 sps:$4 sm:$0xff]  }
 0x569   : > { %2876 = vmatprep.mubr.bf16.mxu0 %v2715_v9 }
 0x56a   : > { %2877 = vmatmul.mubr.bf16.vlgmr.msra.gmra.mrb[16].mxu0 %v2714_v5 }
 0x56b   : > { %7899 = vmatprep.mubr.msk.bf16.mxu0 %vm2954_vm4, %v10230_v48 }
 0x63d   : > { %v7645_v6 = vpop.f32.mrb[16].mxu0 }
 0x63e   : > { %v7646_v7 = vpop.f32.mrb[17].mxu0 }
 0x63f   : > { %v7647_v11 = vadd.f32 %v7646_v7, %v7645_v6  ;;  %v7648_v12 = vpop.f32.mrb[18].mxu0 }
 0x640   : > { %v7649_v16 = vpop.f32.mrb[19].mxu0 }
 0x641   : > { %v7650_v13 = vadd.f32 %v7649_v16, %v7648_v12 }
 0x643   : > { %v10258_v1 = vpack.c.bf16 %v7650_v13, %v7647_v11 }
 0x645   : > { %4222 = vrot.lane.b32.xlu1 %v10258_v1, %s9278_s2  ;;  %4031 = vrot.lane.b32.xlu0 %v10258_v1, %s9279_s9  ;;  %s9280_s2 = smov 118   ;;  %s9281_s9 = smov 119  }
 0x646   : > { %7897 = vmatprep.subr.bf16.mxu0 %v10258_v1 }
 0x647   : > { %7898 = vmatpush3.bf16.msra.mxu0 %v10258_v1 }
 0x649   : > { %4360 = vrot.lane.b32.xlu1 %v10265_v14, %s11599_s29  ;;  %4017 = vrot.lane.b32.xlu0 %v10270_v15, %s9277_s3 }
 0x64a   : > { %7900 = vmatmul.mubr.msk.bf16.vlgmr.msra.gmra.mrb[20].mxu0 %vm2954_vm4, %v10270_v15 }
 0x64b   : > { %7903 = vmatprep.mubr.msk.bf16.mxu0 %vm2954_vm4, %v10237_v56 }
 0x64d   : > { %4364 = vrot.lane.b32.xlu1 %v10281_v18, %s11599_s29  ;;  %4021 = vrot.lane.b32.xlu0 %v10286_v21, %s9277_s3 }
 0x651   : > { %4368 = vrot.lane.b32.xlu1 %v10299_v29, %s11599_s29  ;;  %4025 = vrot.lane.b32.xlu0 %v10304_v23, %s9277_s3 }
 0x652   : > { %7904 = vmatmul.mubr.msk.bf16.gmra.mrb[24].mxu0 %vm2954_vm4, %v10286_v21 }
 0x653   : > { %7907 = vmatprep.mubr.msk.bf16.mxu0 %vm2954_vm4, %v10244_v59 }
 0x655   : > { %4372 = vrot.lane.b32.xlu1 %v10313_v26, %s11599_s29  ;;  %4029 = vrot.lane.b32.xlu0 %v10318_v3, %s9277_s3 }
 0x659   : > { %4530 = vrot.lane.b32.xlu1 %v10258_v1, %s9280_s2  ;;  %4376 = vrot.lane.b32.xlu0 %v10258_v1, %s9281_s9  ;;  %s9282_s9 = smov 116   ;;  %s9287_s2 = smov 113  }
 0x65a   : > { %7908 = vmatmul.mubr.msk.bf16.gmra.mrb[28].mxu0 %vm2954_vm4, %v10304_v23 }
 0x65b   : > { %7911 = vmatprep.mubr.msk.bf16.mxu0 %vm2954_vm4, %v10251_v47 }
 0x65d   : > { %4516 = vrot.lane.b32.xlu1 %v10333_v32, %s11604_s20  ;;  %4362 = vrot.lane.b32.xlu0 %v10333_v32, %s11599_s29 }
 0x661   : > { %4520 = vrot.lane.b32.xlu1 %v10346_v24, %s11604_s20  ;;  %4366 = vrot.lane.b32.xlu0 %v10346_v24, %s11599_s29 }
 0x662   : > { %7912 = vmatmul.mubr.msk.bf16.gmra.mrb[32].mxu0 %vm2954_vm4, %v10318_v3 }
 0x665   : > { %4524 = vrot.lane.b32.xlu1 %v10355_v33, %s11604_s20  ;;  %4370 = vrot.lane.b32.xlu0 %v10355_v33, %s11599_s29 }
 0x669   : > { %4528 = vrot.lane.b32.xlu1 %v10366_v20, %s11604_s20  ;;  %4374 = vrot.lane.b32.xlu0 %v10366_v20, %s11599_s29 }
 0x66d   : > { %4668 = vrot.lane.b32.xlu1 %v10265_v14, %s11605_s28  ;;  %4514 = vrot.lane.b32.xlu0 %v10265_v14, %s11604_s20 }
 0x671   : > { %4672 = vrot.lane.b32.xlu1 %v10281_v18, %s11605_s28  ;;  %4518 = vrot.lane.b32.xlu0 %v10281_v18, %s11604_s20 }
 0x675   : > { %4676 = vrot.lane.b32.xlu1 %v10299_v29, %s11605_s28  ;;  %4522 = vrot.lane.b32.xlu0 %v10299_v29, %s11604_s20 }
 0x679   : > { %4680 = vrot.lane.b32.xlu1 %v10313_v26, %s11605_s28  ;;  %4526 = vrot.lane.b32.xlu0 %v10313_v26, %s11604_s20 }
 0x67d   : > { %4838 = vrot.lane.b32.xlu1 %v10258_v1, %s9282_s9  ;;  %4684 = vrot.lane.b32.xlu0 %v10258_v1, %s9283_s15 }
 0x681   : > { %4824 = vrot.lane.b32.xlu1 %v10333_v32, %s11593_s19  ;;  %4670 = vrot.lane.b32.xlu0 %v10333_v32, %s11605_s28 }
 0x685   : > { %4828 = vrot.lane.b32.xlu1 %v10346_v24, %s11593_s19  ;;  %4674 = vrot.lane.b32.xlu0 %v10346_v24, %s11605_s28 }
 0x689   : > { %4832 = vrot.lane.b32.xlu1 %v10355_v33, %s11593_s19  ;;  %4678 = vrot.lane.b32.xlu0 %v10355_v33, %s11605_s28 }
 0x68d   : > { %4836 = vrot.lane.b32.xlu1 %v10366_v20, %s11593_s19  ;;  %4682 = vrot.lane.b32.xlu0 %v10366_v20, %s11605_s28 }
 0x691   : > { %4976 = vrot.lane.b32.xlu1 %v10265_v14, %s9284_s24  ;;  %4822 = vrot.lane.b32.xlu0 %v10265_v14, %s11593_s19 }
 0x695   : > { %4980 = vrot.lane.b32.xlu1 %v10281_v18, %s9284_s24  ;;  %4826 = vrot.lane.b32.xlu0 %v10281_v18, %s11593_s19 }
 0x699   : > { %4984 = vrot.lane.b32.xlu1 %v10299_v29, %s9284_s24  ;;  %4830 = vrot.lane.b32.xlu0 %v10299_v29, %s11593_s19 }
 0x69d   : > { %4988 = vrot.lane.b32.xlu1 %v10313_v26, %s9284_s24  ;;  %4834 = vrot.lane.b32.xlu0 %v10313_v26, %s11593_s19 }
 0x6a1   : > { %5146 = vrot.lane.b32.xlu1 %v10258_v1, %s9285_s21  ;;  %4992 = vrot.lane.b32.xlu0 %v10258_v1, %s9286_s4 }
 0x6a5   : > { %5132 = vrot.lane.b32.xlu1 %v10333_v32, %s11618_s22  ;;  %4978 = vrot.lane.b32.xlu0 %v10333_v32, %s9284_s24 }
 0x6a9   : > { %5136 = vrot.lane.b32.xlu1 %v10346_v24, %s11618_s22  ;;  %4982 = vrot.lane.b32.xlu0 %v10346_v24, %s9284_s24 }
 0x6ad   : > { %5140 = vrot.lane.b32.xlu1 %v10355_v33, %s11618_s22  ;;  %4986 = vrot.lane.b32.xlu0 %v10355_v33, %s9284_s24 }
 0x6b1   : > { %5144 = vrot.lane.b32.xlu1 %v10366_v20, %s11618_s22  ;;  %4990 = vrot.lane.b32.xlu0 %v10366_v20, %s9284_s24 }
 0x6b5   : > { %5284 = vrot.lane.b32.xlu1 %v10265_v14, %s9277_s3  ;;  %5130 = vrot.lane.b32.xlu0 %v10265_v14, %s11618_s22 }
 0x6b7   : > { %v4223_v38 = vpop.permute.xlu1 %4222  ;;  %v4032_v25 = vpop.permute.xlu0 %4031 }
 0x6b8   : > { %8023 = vmatprep.subr.bf16.mxu1 %v4032_v25 }
 0x6b9   : > { %5288 = vrot.lane.b32.xlu1 %v10281_v18, %s9277_s3  ;;  %5134 = vrot.lane.b32.xlu0 %v10281_v18, %s11618_s22 }
 0x6ba   : > { %8024 = vmatpush3.bf16.msra.mxu1 %v4032_v25 }
 0x6bb   : > { %8041 = vmatprep.subr.bf16.mxu1 %v4223_v38  ;;  %v10448_v39 = vpop.permute.xlu1 %4360  ;;  %v4018_v42 = vpop.permute.xlu0 %4017 }
 0x6bd   : > { %8026 = vmatmul.mubr.msk.bf16.vlgmr.msra.gmra.mrb[8].mxu1 %vm2954_vm4, %v4018_v42  ;;  %5292 = vrot.lane.b32.xlu1 %v10299_v29, %s9277_s3 }
 0x6be   : > { %5138 = vrot.lane.b32.xlu0 %v10299_v29, %s11618_s22  ;;  %8029 = vmatprep.mubr.msk.bf16.mxu1 %vm2954_vm4, %v4020_v34 }
 0x6bf   : > { %8042 = vmatpush3.bf16.msra.mxu1 %v4223_v38  ;;  %v10456_v43 = vpop.permute.xlu1 %4364  ;;  %v4022_v17 = vpop.permute.xlu0 %4021 }
 0x6c1   : > { %5296 = vrot.lane.b32.xlu1 %v10313_v26, %s9277_s3 }
 0x6c2   : > { %5142 = vrot.lane.b32.xlu0 %v10313_v26, %s11618_s22 }
 0x6c3   : > { %v10462_v44 = vpop.permute.xlu1 %4368  ;;  %v4026_v27 = vpop.permute.xlu0 %4025 }
 0x6c5   : > { %8030 = vmatmul.mubr.msk.bf16.gmra.mrb[12].mxu1 %vm2954_vm4, %v4022_v17  ;;  %5491 = vrot.lane.b32.xlu1 %v10258_v1, %s11599_s29 }
 0x6c6   : > { %5300 = vrot.lane.b32.xlu0 %v10258_v1, %s9287_s2  ;;  %8033 = vmatprep.mubr.msk.bf16.mxu1 %vm2954_vm4, %v4024_v37 }
 0x6c7   : > { %v10474_v4 = vpop.permute.xlu1 %4372  ;;  %v4030_v45 = vpop.permute.xlu0 %4029 }
 0x6c9   : > { %5629 = vrot.lane.b32.xlu1 %v10470_v35, %s11599_s29 }
 0x6ca   : > { %5286 = vrot.lane.b32.xlu0 %v10333_v32, %s9277_s3 }
 0x6cb   : > { %v10485_v50 = vpop.permute.xlu1 %4530  ;;  %v4377_v52 = vpop.permute.xlu0 %4376 }
 0x6cc   : > { %8059 = vmatprep.subr.bf16.mxu1 %v4377_v52 }
 0x6cd   : > { %8034 = vmatmul.mubr.msk.bf16.gmra.mrb[16].mxu1 %vm2954_vm4, %v4026_v27  ;;  %5633 = vrot.lane.b32.xlu1 %v10481_v51, %s11599_s29 }
 0x6ce   : > { %5290 = vrot.lane.b32.xlu0 %v10346_v24, %s9277_s3  ;;  %8037 = vmatprep.mubr.msk.bf16.mxu1 %vm2954_vm4, %v4028_v28 }
 0x6cf   : > { %v10498_v53 = vpop.permute.xlu1 %4516  ;;  %v4363_v46 = vpop.permute.xlu0 %4362 }
 0x6d1   : > { %5637 = vrot.lane.b32.xlu1 %v10493_v31, %s11599_s29 }
 0x6d2   : > { %5294 = vrot.lane.b32.xlu0 %v10355_v33, %s9277_s3 }
 0x6d3   : > { %v10509_v54 = vpop.permute.xlu1 %4520  ;;  %v10511_v55 = vpop.permute.xlu0 %4366 }
 0x6d5   : > { %8038 = vmatmul.mubr.msk.bf16.gmra.mrb[20].mxu1 %vm2954_vm4, %v4030_v45  ;;  %5641 = vrot.lane.b32.xlu1 %v10505_v58, %s11599_s29 }
 0x6d6   : > { %5298 = vrot.lane.b32.xlu0 %v10366_v20, %s9277_s3  ;;  %8043 = vmatprep.mubr.msk.bf16.mxu1 %vm2954_vm4, %v10265_v14 }
 0x6d7   : > { %v10525_v60 = vpop.permute.xlu1 %4524  ;;  %v10527_v49 = vpop.permute.xlu0 %4370 }
 0x6d9   : > { %5785 = vrot.lane.b32.xlu1 %v10519_v30, %s11604_s20 }
 0x6da   : > { %5645 = vrot.lane.b32.xlu0 %v10258_v1, %s11603_s14 }
 0x6db   : > { %v10538_v61 = vpop.permute.xlu1 %4528  ;;  %v10540_v62 = vpop.permute.xlu0 %4374 }
 0x6dd   : > { %8044 = vmatmul.mubr.msk.bf16.vlgmr.msra.gmra.mrb[8].mxu1 %vm2954_vm4, %v10333_v32  ;;  %5789 = vrot.lane.b32.xlu1 %v10534_v10, %s11604_s20 }
 0x6de   : > { %8060 = vmatpush3.bf16.msra.mxu1 %v4377_v52  ;;  %5631 = vrot.lane.b32.xlu0 %v10519_v30, %s11599_s29 }
 0x6df   : > { %8077 = vmatprep.subr.bf16.mxu1 %v10485_v50  ;;  %v10549_v63 = vpop.permute.xlu1 %4668  ;;  %v10551_v40 = vpop.permute.xlu0 %4514  ;;  %8047 = vmatprep.mubr.msk.bf16.mxu1 %vm2954_vm4, %v10281_v18 }
 0x6e1   : > { %5799 = vrot.lane.b32.xlu1 %v10258_v1, %s11600_s16 }
 0x6e2   : > { %5635 = vrot.lane.b32.xlu0 %v10534_v10, %s11599_s29 }
 0x6e3   : > { %v10564_v57 = vpop.permute.xlu1 %4672  ;;  %v10566_v0 = vpop.permute.xlu0 %4518 }
 0x6e5   : > { %8048 = vmatmul.mubr.msk.bf16.gmra.mrb[12].mxu1 %vm2954_vm4, %v10346_v24  ;;  %5793 = vrot.lane.b32.xlu1 %v10560_v36, %s11604_s20 }
 0x6e6   : > { %5639 = vrot.lane.b32.xlu0 %v10560_v36, %s11599_s29  ;;  %8051 = vmatprep.mubr.msk.bf16.mxu1 %vm2954_vm4, %v10299_v29 }
 0x6e7   : > { %v10581_v22 = vpop.permute.xlu1 %4676  ;;  %v10583_v19 = vpop.permute.xlu0 %4522 }
 0x6e9   : > { %5797 = vrot.lane.b32.xlu1 %v10575_v2, %s11604_s20 }
 0x6ea   : > { %5643 = vrot.lane.b32.xlu0 %v10575_v2, %s11599_s29 }
 0x6eb   : > { %v10589_v5 = vpop.permute.xlu1 %4680  ;;  %v10591_v9 = vpop.permute.xlu0 %4526 }
 0x6ed   : > { %8052 = vmatmul.mubr.msk.bf16.gmra.mrb[16].mxu1 %vm2954_vm4, %v10355_v33  ;;  %3092 = vrot.lane.b32.xlu1 %v10270_v15, %s11599_s29 }
 0x6ee   : > { %5783 = vrot.lane.b32.xlu0 %v10470_v35, %s11604_s20  ;;  %8055 = vmatprep.mubr.msk.bf16.mxu1 %vm2954_vm4, %v10313_v26 }
 0x6ef   : > { %v10601_v41 = vpop.permute.xlu1 %4838  ;;  %v4685_v6 = vpop.permute.xlu0 %4684 }
 0x6f1   : > { %5939 = vrot.lane.b32.xlu1 %v10519_v30, %s11605_s28 }
 0x6f2   : > { %5787 = vrot.lane.b32.xlu0 %v10481_v51, %s11604_s20 }
 0x6f3   : > { %v10607_v7 = vpop.permute.xlu1 %4824  ;;  %v10609_v11 = vpop.permute.xlu0 %4670 }
 0x6f5   : > { %8056 = vmatmul.mubr.msk.bf16.gmra.mrb[20].mxu1 %vm2954_vm4, %v10366_v20  ;;  %3096 = vrot.lane.b32.xlu1 %v10286_v21, %s11599_s29 }
 0x6f6   : > { %5791 = vrot.lane.b32.xlu0 %v10493_v31, %s11604_s20  ;;  %8061 = vmatprep.mubr.msk.bf16.mxu1 %vm2954_vm4, %v10448_v39 }
 0x6f7   : > { %v10619_v12 = vpop.permute.xlu1 %4828  ;;  %v10621_v16 = vpop.permute.xlu0 %4674 }
 0x6f9   : > { %5943 = vrot.lane.b32.xlu1 %v10534_v10, %s11605_s28 }
 0x6fa   : > { %5795 = vrot.lane.b32.xlu0 %v10505_v58, %s11604_s20 }
 0x6fb   : > { %v10627_v13 = vpop.permute.xlu1 %4832  ;;  %v10629_v14 = vpop.permute.xlu0 %4678 }
 0x6fd   : > { %8062 = vmatmul.mubr.msk.bf16.vlgmr.msra.gmra.mrb[8].mxu1 %vm2954_vm4, %v4363_v46  ;;  %3100 = vrot.lane.b32.xlu1 %v10304_v23, %s11599_s29 }
 0x6fe   : > { %8078 = vmatpush3.bf16.msra.mxu1 %v10485_v50  ;;  %3090 = vrot.lane.b32.xlu0 %v10230_v48, %s11599_s29 }
 0x6ff   : > { %8065 = vmatprep.mubr.msk.bf16.mxu1 %vm2954_vm4, %v10456_v43  ;;  %8095 = vmatprep.subr.bf16.mxu1 %v4685_v6  ;;  %v10639_v18 = vpop.permute.xlu1 %4836  ;;  %v10641_v29 = vpop.permute.xlu0 %4682 }
 0x701   : > { %5953 = vrot.lane.b32.xlu1 %v10258_v1, %s11595_s27  ;;  %s9289_s27 = smov 106  }
 0x702   : > { %5937 = vrot.lane.b32.xlu0 %v10470_v35, %s11605_s28 }
 0x703   : > { %v10647_v26 = vpop.permute.xlu1 %4976  ;;  %v10649_v32 = vpop.permute.xlu0 %4822 }
 0x705   : > { %8066 = vmatmul.mubr.msk.bf16.gmra.mrb[12].mxu1 %vm2954_vm4, %v10511_v55  ;;  %5947 = vrot.lane.b32.xlu1 %v10560_v36, %s11605_s28 }
 0x706   : > { %3094 = vrot.lane.b32.xlu0 %v10237_v56, %s11599_s29  ;;  %8069 = vmatprep.mubr.msk.bf16.mxu1 %vm2954_vm4, %v10462_v44 }
 0x707   : > { %v10659_v24 = vpop.permute.xlu1 %4980  ;;  %v10661_v33 = vpop.permute.xlu0 %4826 }
 0x709   : > { %3104 = vrot.lane.b32.xlu1 %v10318_v3, %s11599_s29 }
 0x70a   : > { %5941 = vrot.lane.b32.xlu0 %v10481_v51, %s11605_s28 }
 0x70b   : > { %v10667_v20 = vpop.permute.xlu1 %4984  ;;  %v10669_v34 = vpop.permute.xlu0 %4830 }
 0x70d   : > { %8070 = vmatmul.mubr.msk.bf16.gmra.mrb[16].mxu1 %vm2954_vm4, %v10527_v49  ;;  %5951 = vrot.lane.b32.xlu1 %v10575_v2, %s11605_s28 }
 0x70e   : > { %3098 = vrot.lane.b32.xlu0 %v10244_v59, %s11599_s29  ;;  %8073 = vmatprep.mubr.msk.bf16.mxu1 %vm2954_vm4, %v10474_v4 }
 0x70f   : > { %v10679_v37 = vpop.permute.xlu1 %4988  ;;  %v10681_v28 = vpop.permute.xlu0 %4834 }
 0x711   : > { %3247 = vrot.lane.b32.xlu1 %v10270_v15, %s11604_s20 }
 0x712   : > { %3107 = vrot.lane.b32.xlu0 %v10258_v1, %s11597_s17  ;;  %s9290_s17 = smov 105  }
 0x713   : > { %v10687_v38 = vpop.permute.xlu1 %5146  ;;  %v10689_v25 = vpop.permute.xlu0 %4992 }
 0x715   : > { %8074 = vmatmul.mubr.msk.bf16.gmra.mrb[20].mxu1 %vm2954_vm4, %v10540_v62  ;;  %6093 = vrot.lane.b32.xlu1 %v10519_v30, %s11593_s19 }
 0x716   : > { %5945 = vrot.lane.b32.xlu0 %v10493_v31, %s11605_s28  ;;  %8079 = vmatprep.mubr.msk.bf16.mxu1 %vm2954_vm4, %v10551_v40 }
 0x717   : > { %v10699_v39 = vpop.permute.xlu1 %5132  ;;  %v10701_v42 = vpop.permute.xlu0 %4978 }
 0x719   : > { %3251 = vrot.lane.b32.xlu1 %v10286_v21, %s11604_s20 }
 0x71a   : > { %3102 = vrot.lane.b32.xlu0 %v10251_v47, %s11599_s29  ;;  %s9293_s29 = smov 122  }
 0x71b   : > { %v10707_v43 = vpop.permute.xlu1 %5136  ;;  %v10709_v17 = vpop.permute.xlu0 %4982 }
 0x71d   : > { %8080 = vmatmul.mubr.msk.bf16.vlgmr.msra.gmra.mrb[8].mxu1 %vm2954_vm4, %v10498_v53  ;;  %6097 = vrot.lane.b32.xlu1 %v10534_v10, %s11593_s19 }
 0x71e   : > { %8096 = vmatpush3.bf16.msra.mxu1 %v4685_v6  ;;  %5949 = vrot.lane.b32.xlu0 %v10505_v58, %s11605_s28 }
 0x71f   : > { %8083 = vmatprep.mubr.msk.bf16.mxu1 %vm2954_vm4, %v10566_v0  ;;  %8113 = vmatprep.subr.bf16.mxu1 %v10601_v41  ;;  %v10720_v44 = vpop.permute.xlu1 %5140  ;;  %v10722_v27 = vpop.permute.xlu0 %4986 }
 0x721   : > { %6107 = vrot.lane.b32.xlu1 %v10258_v1, %s11602_s18  ;;  %s9288_s18 = smov 107  }
 0x722   : > { %3245 = vrot.lane.b32.xlu0 %v10230_v48, %s11604_s20 }
 0x723   : > { %v10728_v4 = vpop.permute.xlu1 %5144  ;;  %v10730_v45 = vpop.permute.xlu0 %4990 }
 0x725   : > { %8084 = vmatmul.mubr.msk.bf16.gmra.mrb[12].mxu1 %vm2954_vm4, %v10509_v54  ;;  %3255 = vrot.lane.b32.xlu1 %v10304_v23, %s11604_s20 }
 0x726   : > { %6091 = vrot.lane.b32.xlu0 %v10470_v35, %s11593_s19  ;;  %8087 = vmatprep.mubr.msk.bf16.mxu1 %vm2954_vm4, %v10583_v19 }
 0x727   : > { %v10740_v50 = vpop.permute.xlu1 %5284  ;;  %v10742_v52 = vpop.permute.xlu0 %5130 }
 0x729   : > { %6101 = vrot.lane.b32.xlu1 %v10560_v36, %s11593_s19 }
 0x72a   : > { %3249 = vrot.lane.b32.xlu0 %v10237_v56, %s11604_s20 }
 0x72b   : > { %v10748_v53 = vpop.permute.xlu1 %5288  ;;  %v10750_v46 = vpop.permute.xlu0 %5134 }
 0x72d   : > { %8088 = vmatmul.mubr.msk.bf16.gmra.mrb[16].mxu1 %vm2954_vm4, %v10525_v60  ;;  %3259 = vrot.lane.b32.xlu1 %v10318_v3, %s11604_s20 }
 0x72e   : > { %6095 = vrot.lane.b32.xlu0 %v10481_v51, %s11593_s19  ;;  %8091 = vmatprep.mubr.msk.bf16.mxu1 %vm2954_vm4, %v10591_v9 }
 0x72f   : > { %v10760_v54 = vpop.permute.xlu1 %5292 }
 0x730   : > { %v10762_v55 = vpop.permute.xlu0 %5138 }
 0x731   : > { %6105 = vrot.lane.b32.xlu1 %v10575_v2, %s11593_s19 }
 0x732   : > { %3261 = vrot.lane.b32.xlu0 %v10258_v1, %s11601_s23 }
 0x733   : > { %v10768_v60 = vpop.permute.xlu1 %5296 }
 0x734   : > { %v10770_v49 = vpop.permute.xlu0 %5142 }
 0x735   : > { %8092 = vmatmul.mubr.msk.bf16.gmra.mrb[20].mxu1 %vm2954_vm4, %v10538_v61  ;;  %3401 = vrot.lane.b32.xlu1 %v10270_v15, %s11605_s28 }
 0x736   : > { %3253 = vrot.lane.b32.xlu0 %v10244_v59, %s11604_s20  ;;  %8097 = vmatprep.mubr.msk.bf16.mxu1 %vm2954_vm4, %v10549_v63 }
 0x737   : > { %v10780_v62 = vpop.permute.xlu1 %5491 }
 0x738   : > { %v10782_v40 = vpop.permute.xlu0 %5300 }
 0x739   : > { %6247 = vrot.lane.b32.xlu1 %v10519_v30, %s9284_s24 }
 0x73a   : > { %6099 = vrot.lane.b32.xlu0 %v10493_v31, %s11593_s19 }
 0x73b   : > { %v10788_v61 = vpop.permute.xlu1 %5629 }
 0x73c   : > { %v10790_v0 = vpop.permute.xlu0 %5286 }
 0x73d   : > { %8098 = vmatmul.mubr.msk.bf16.vlgmr.msra.gmra.mrb[8].mxu1 %vm2954_vm4, %v10609_v11  ;;  %3405 = vrot.lane.b32.xlu1 %v10286_v21, %s11605_s28 }
 0x73e   : > { %8114 = vmatpush3.bf16.msra.mxu1 %v10601_v41  ;;  %3257 = vrot.lane.b32.xlu0 %v10251_v47, %s11604_s20 }
 0x73f   : > { %8101 = vmatprep.mubr.msk.bf16.mxu1 %vm2954_vm4, %v10564_v57  ;;  %8131 = vmatprep.subr.bf16.mxu1 %v10689_v25  ;;  %v10802_v63 = vpop.permute.xlu1 %5633 }
 0x740   : > { %v10804_v19 = vpop.permute.xlu0 %5290 }
 0x741   : > { %6261 = vrot.lane.b32.xlu1 %v10258_v1, %s9288_s18 }
 0x742   : > { %6103 = vrot.lane.b32.xlu0 %v10505_v58, %s11593_s19 }
 0x743   : > { %v10809_v9 = vpop.permute.xlu1 %5637 }
 0x744   : > { %v10811_v41 = vpop.permute.xlu0 %5294 }
 0x745   : > { %8102 = vmatmul.mubr.msk.bf16.gmra.mrb[12].mxu1 %vm2954_vm4, %v10621_v16  ;;  %6251 = vrot.lane.b32.xlu1 %v10534_v10, %s9284_s24 }
 0x746   : > { %3399 = vrot.lane.b32.xlu0 %v10230_v48, %s11605_s28  ;;  %8105 = vmatprep.mubr.msk.bf16.mxu1 %vm2954_vm4, %v10581_v22 }
 0x747   : > { %v10821_v57 = vpop.permute.xlu1 %5641 }
 0x748   : > { %11619 = vst [vmem:[#allocation8_spill] sm:$0xff] %v10821_v57  ;;  %v10823_v6 = vpop.permute.xlu0 %5298 }
 0x749   : > { %3409 = vrot.lane.b32.xlu1 %v10304_v23, %s11605_s28 }
 0x74a   : > { %6245 = vrot.lane.b32.xlu0 %v10470_v35, %s9284_s24 }
 0x74b   : > { %v10829_v11 = vpop.permute.xlu1 %5785 }
 0x74c   : > { %11620 = vst [vmem:[#allocation9_spill] sm:$0xff] %v10829_v11  ;;  %v10831_v16 = vpop.permute.xlu0 %5645 }
 0x74d   : > { %8106 = vmatmul.mubr.msk.bf16.gmra.mrb[16].mxu1 %vm2954_vm4, %v10629_v14  ;;  %6255 = vrot.lane.b32.xlu1 %v10560_v36, %s9284_s24 }
 0x74e   : > { %8109 = vmatprep.mubr.msk.bf16.mxu1 %vm2954_vm4, %v10589_v5  ;;  %3403 = vrot.lane.b32.xlu0 %v10237_v56, %s11605_s28 }
 0x74f   : > { %v10841_v22 = vpop.permute.xlu1 %5789 }
 0x750   : > { %11621 = vst [vmem:[#allocation10_spill] sm:$0xff] %v10841_v22  ;;  %v10843_v8 = vpop.permute.xlu0 %5631 }
 0x751   : > { %3413 = vrot.lane.b32.xlu1 %v10318_v3, %s11605_s28 }
 0x752   : > { %3415 = vrot.lane.b32.xlu0 %v10258_v1, %s11598_s30  ;;  %s9292_s30 = smov 104  }
 0x753   : > { %v10849_v14 = vpop.permute.xlu1 %5799 }
 0x754   : > { %v10851_v11 = vpop.permute.xlu0 %5635 }
 0x755   : > { %8110 = vmatmul.mubr.msk.bf16.gmra.mrb[20].mxu1 %vm2954_vm4, %v10641_v29  ;;  %6259 = vrot.lane.b32.xlu1 %v10575_v2, %s9284_s24 }
 0x756   : > { %8115 = vmatprep.mubr.msk.bf16.mxu1 %vm2954_vm4, %v10649_v32  ;;  %6249 = vrot.lane.b32.xlu0 %v10481_v51, %s9284_s24 }
 0x757   : > { %v10861_v5 = vpop.permute.xlu1 %5793 }
 0x758   : > { %11622 = vst [vmem:[#allocation11_spill] sm:$0xff] %v10861_v5  ;;  %v10863_v22 = vpop.permute.xlu0 %5639 }
 0x759   : > { %3555 = vrot.lane.b32.xlu1 %v10270_v15, %s11593_s19 }
 0x75a   : > { %3407 = vrot.lane.b32.xlu0 %v10244_v59, %s11605_s28 }
 0x75b   : > { %v10869_v29 = vpop.permute.xlu1 %5797 }
 0x75c   : > { %11623 = vst [vmem:[#allocation12_spill] sm:$0xff] %v10869_v29  ;;  %v10871_v57 = vpop.permute.xlu0 %5643 }
 0x75d   : > { %8116 = vmatmul.mubr.msk.bf16.vlgmr.msra.gmra.mrb[8].mxu1 %vm2954_vm4, %v10607_v7  ;;  %6401 = vrot.lane.b32.xlu1 %v10519_v30, %s11618_s22 }
 0x75e   : > { %8132 = vmatpush3.bf16.msra.mxu1 %v10689_v25  ;;  %8119 = vmatprep.mubr.msk.bf16.mxu1 %vm2954_vm4, %v10661_v33 }
 0x75f   : > { %6253 = vrot.lane.b32.xlu0 %v10493_v31, %s9284_s24  ;;  %8149 = vmatprep.subr.bf16.mxu1 %v10687_v38  ;;  %v3093_v32 = vpop.permute.xlu1 %3092 }
 0x760   : > { %v10883_v29 = vpop.permute.xlu0 %5783 }
 0x761   : > { %6415 = vrot.lane.b32.xlu1 %v10258_v1, %s9289_s27 }
 0x763   : > { %3411 = vrot.lane.b32.xlu0 %v10251_v47, %s11605_s28  ;;  %v10888_v7 = vpop.permute.xlu1 %5939  ;;  %s11627_s28 = smov 124  }
 0x764   : > { %11624 = vst [vmem:[#allocation13_spill] sm:$0xff] %v10888_v7  ;;  %v10890_v25 = vpop.permute.xlu0 %5787 }
 0x765   : > { %8120 = vmatmul.mubr.msk.bf16.gmra.mrb[12].mxu1 %vm2954_vm4, %v10619_v12  ;;  %3559 = vrot.lane.b32.xlu1 %v10286_v21, %s11593_s19 }
 0x766   : > { %8123 = vmatprep.mubr.msk.bf16.mxu1 %vm2954_vm4, %v10669_v34 }
 0x767   : > { %6257 = vrot.lane.b32.xlu0 %v10505_v58, %s9284_s24  ;;  %v3097_v33 = vpop.permute.xlu1 %3096 }
 0x768   : > { %v10900_v5 = vpop.permute.xlu0 %5791 }
 0x769   : > { %11625 = vst [vmem:[#allocation14_spill] sm:$0xff] %v10900_v5  ;;  %6405 = vrot.lane.b32.xlu1 %v10534_v10, %s11618_s22 }
 0x76b   : > { %3553 = vrot.lane.b32.xlu0 %v10230_v48, %s11593_s19  ;;  %v10906_v7 = vpop.permute.xlu1 %5943 }
 0x76c   : > { %11626 = vst [vmem:[#allocation15_spill] sm:$0xff] %v10906_v7  ;;  %v10908_v12 = vpop.permute.xlu0 %5795 }
 0x76d   : > { %8124 = vmatmul.mubr.msk.bf16.gmra.mrb[16].mxu1 %vm2954_vm4, %v10627_v13  ;;  %3563 = vrot.lane.b32.xlu1 %v10304_v23, %s11593_s19 }
 0x76e   : > { %8127 = vmatprep.mubr.msk.bf16.mxu1 %vm2954_vm4, %v10681_v28 }
 0x76f   : > { %6399 = vrot.lane.b32.xlu0 %v10470_v35, %s11618_s22  ;;  %v10918_v34 = vpop.permute.xlu1 %3100 }
 0x770   : > { %v3091_v5 = vpop.permute.xlu0 %3090 }
 0x771   : > { %6409 = vrot.lane.b32.xlu1 %v10560_v36, %s11618_s22  ;;  %7917 = vmatprep.mubr.msk.bf16.mxu0 %vm2954_vm4, %v3091_v5 }
 0x773   : > { %3569 = vrot.lane.b32.xlu0 %v10258_v1, %s11627_s28  ;;  %v10925_v13 = vpop.permute.xlu1 %5953 }
 0x774   : > { %v10927_v7 = vpop.permute.xlu0 %5937 }
 0x775   : > { %11628 = vst [vmem:[#allocation16_spill] sm:$0xff] %v10927_v7  ;;  %8128 = vmatmul.mubr.msk.bf16.gmra.mrb[20].mxu1 %vm2954_vm4, %v10639_v18  ;;  %3567 = vrot.lane.b32.xlu1 %v10318_v3, %s11593_s19 }
 0x776   : > { %8133 = vmatprep.mubr.msk.bf16.mxu1 %vm2954_vm4, %v10647_v26 }
 0x777   : > { %3557 = vrot.lane.b32.xlu0 %v10237_v56, %s11593_s19  ;;  %v10937_v28 = vpop.permute.xlu1 %5947 }
 0x778   : > { %11629 = vst [vmem:[#allocation17_spill] sm:$0xff] %v10937_v28  ;;  %v3095_v5 = vpop.permute.xlu0 %3094 }
 0x779   : > { %6413 = vrot.lane.b32.xlu1 %v10575_v2, %s11618_s22 }
 0x77b   : > { %6403 = vrot.lane.b32.xlu0 %v10481_v51, %s11618_s22  ;;  %v10943_v7 = vpop.permute.xlu1 %3104 }
 0x77c   : > { %v10945_v18 = vpop.permute.xlu0 %5941 }
 0x77d   : > { %8134 = vmatmul.mubr.msk.bf16.vlgmr.msra.gmra.mrb[8].mxu1 %vm2954_vm4, %v10701_v42  ;;  %3709 = vrot.lane.b32.xlu1 %v10270_v15, %s9284_s24 }
 0x77e   : > { %8150 = vmatpush3.bf16.msra.mxu1 %v10687_v38  ;;  %8137 = vmatprep.mubr.msk.bf16.mxu1 %vm2954_vm4, %v10659_v24 }
 0x77f   : > { %3561 = vrot.lane.b32.xlu0 %v10244_v59, %s11593_s19  ;;  %8167 = vmatprep.subr.bf16.mxu1 %v10782_v40  ;;  %v10957_v26 = vpop.permute.xlu1 %5951 }
 0x780   : > { %11630 = vst [vmem:[#allocation18_spill] sm:$0xff] %v10957_v26  ;;  %v3099_v28 = vpop.permute.xlu0 %3098 }
 0x781   : > { %6569 = vrot.lane.b32.xlu1 %v10258_v1, %s9290_s17  ;;  %s7628_s17 = sshll.u32 %s11644_s26, 4 }
 0x782   : > { %s452_s20 = scalar_lea.vmem %s11518_s13, %s7628_s17 }
 0x783   : > { %6407 = vrot.lane.b32.xlu0 %v10493_v31, %s11618_s22  ;;  %v10962_v42 = vpop.permute.xlu1 %3247 }
 0x784   : > { %v3108_v38 = vpop.permute.xlu0 %3107 }
 0x785   : > { %7915 = vmatprep.subr.bf16.mxu0 %v3108_v38  ;;  %8138 = vmatmul.mubr.msk.bf16.gmra.mrb[12].mxu1 %vm2954_vm4, %v10709_v17 }
 0x786   : > { %6555 = vrot.lane.b32.xlu1 %v10519_v30, %s9277_s3  ;;  %8141 = vmatprep.mubr.msk.bf16.mxu1 %vm2954_vm4, %v10667_v20 }
 0x787   : > { %3565 = vrot.lane.b32.xlu0 %v10251_v47, %s11593_s19  ;;  %7916 = vmatpush3.bf16.msra.mxu0 %v3108_v38  ;;  %v10972_v24 = vpop.permute.xlu1 %6093  ;;  %s9291_s19 = smov 123  }
 0x788   : > { %v10974_v26 = vpop.permute.xlu0 %5945 }
 0x78a   : > { %3713 = vrot.lane.b32.xlu1 %v10286_v21, %s9284_s24  ;;  %7918 = vmatmul.mubr.msk.bf16.vlgmr.msra.gmra.mrb[20].mxu0 %vm2954_vm4, %v3093_v32 }
 0x78b   : > { %6411 = vrot.lane.b32.xlu0 %v10505_v58, %s11618_s22  ;;  %v10981_v17 = vpop.permute.xlu1 %3251  ;;  %7921 = vmatprep.mubr.msk.bf16.mxu0 %vm2954_vm4, %v3095_v5 }
 0x78c   : > { %v3103_v20 = vpop.permute.xlu0 %3102 }
 0x78d   : > { %8142 = vmatmul.mubr.msk.bf16.gmra.mrb[16].mxu1 %vm2954_vm4, %v10722_v27 }
 0x78e   : > { %6559 = vrot.lane.b32.xlu1 %v10534_v10, %s9277_s3  ;;  %8145 = vmatprep.mubr.msk.bf16.mxu1 %vm2954_vm4, %v10679_v37 }
 0x78f   : > { %3707 = vrot.lane.b32.xlu0 %v10230_v48, %s9284_s24  ;;  %v10992_v32 = vpop.permute.xlu1 %6097 }
 0x790   : > { %v10994_v38 = vpop.permute.xlu0 %5949 }
 0x792   : > { %3717 = vrot.lane.b32.xlu1 %v10304_v23, %s9284_s24  ;;  %7922 = vmatmul.mubr.msk.bf16.gmra.mrb[24].mxu0 %vm2954_vm4, %v3097_v33 }
 0x793   : > { %3723 = vrot.lane.b32.xlu0 %v10258_v1, %s9291_s19  ;;  %v11000_v27 = vpop.permute.xlu1 %6107  ;;  %7925 = vmatprep.mubr.msk.bf16.mxu0 %vm2954_vm4, %v3099_v28 }
 0x794   : > { %v3246_v37 = vpop.permute.xlu0 %3245 }
 0x795   : > { %8146 = vmatmul.mubr.msk.bf16.gmra.mrb[20].mxu1 %vm2954_vm4, %v10730_v45 }
 0x796   : > { %6563 = vrot.lane.b32.xlu1 %v10560_v36, %s9277_s3  ;;  %8151 = vmatprep.mubr.msk.bf16.mxu1 %vm2954_vm4, %v10742_v52 }
 0x797   : > { %6553 = vrot.lane.b32.xlu0 %v10470_v35, %s9277_s3  ;;  %v3256_v33 = vpop.permute.xlu1 %3255 }
 0x798   : > { %v11011_v5 = vpop.permute.xlu0 %6091 }
 0x79a   : > { %3721 = vrot.lane.b32.xlu1 %v10318_v3, %s9284_s24  ;;  %7926 = vmatmul.mubr.msk.bf16.gmra.mrb[28].mxu0 %vm2954_vm4, %v10918_v34 }
 0x79b   : > { %3711 = vrot.lane.b32.xlu0 %v10237_v56, %s9284_s24  ;;  %v11019_v45 = vpop.permute.xlu1 %6101  ;;  %7929 = vmatprep.mubr.msk.bf16.mxu0 %vm2954_vm4, %v3103_v20 }
 0x79c   : > { %v3250_v52 = vpop.permute.xlu0 %3249 }
 0x79d   : > { %8152 = vmatmul.mubr.msk.bf16.vlgmr.msra.gmra.mrb[8].mxu1 %vm2954_vm4, %v10699_v39 }
 0x79e   : > { %8168 = vmatpush3.bf16.msra.mxu1 %v10782_v40  ;;  %6567 = vrot.lane.b32.xlu1 %v10575_v2, %s9277_s3 }
 0x79f   : > { %8155 = vmatprep.mubr.msk.bf16.mxu1 %vm2954_vm4, %v10750_v46  ;;  %8185 = vmatprep.subr.bf16.mxu1 %v10780_v62  ;;  %v3260_v34 = vpop.permute.xlu1 %3259 }
 0x7a0   : > { %6557 = vrot.lane.b32.xlu0 %v10481_v51, %s9277_s3  ;;  %v11032_v28 = vpop.permute.xlu0 %6095 }
 0x7a2   : > { %6760 = vrot.lane.b32.xlu1 %v10258_v1, %s9292_s30  ;;  %7930 = vmatmul.mubr.msk.bf16.gmra.mrb[32].mxu0 %vm2954_vm4, %v10943_v7 }
 0x7a3   : > { %v11037_v39 = vpop.permute.xlu1 %6105  ;;  %7935 = vmatprep.mubr.msk.bf16.mxu0 %vm2954_vm4, %v3246_v37 }
 0x7a4   : > { %3715 = vrot.lane.b32.xlu0 %v10244_v59, %s9284_s24  ;;  %v3262_v46 = vpop.permute.xlu0 %3261 }
 0x7a5   : > { %7933 = vmatprep.subr.bf16.mxu0 %v3262_v46  ;;  %8156 = vmatmul.mubr.msk.bf16.gmra.mrb[12].mxu1 %vm2954_vm4, %v10707_v43 }
 0x7a6   : > { %8159 = vmatprep.mubr.msk.bf16.mxu1 %vm2954_vm4, %v10762_v55  ;;  %7934 = vmatpush3.bf16.msra.mxu0 %v3262_v46 }
 0x7a7   : > { %v3402_v40 = vpop.permute.xlu1 %3401  ;;  %3863 = vrot.lane.b32.xlu1 %v10270_v15, %s11618_s22 }
 0x7a8   : > { %6561 = vrot.lane.b32.xlu0 %v10493_v31, %s9277_s3  ;;  %v3254_v7 = vpop.permute.xlu0 %3253 }
 0x7aa   : > { %7936 = vmatmul.mubr.msk.bf16.vlgmr.msra.gmra.mrb[20].mxu0 %vm2954_vm4, %v10962_v42 }
 0x7ab   : > { %v11052_v20 = vpop.permute.xlu1 %6247  ;;  %7939 = vmatprep.mubr.msk.bf16.mxu0 %vm2954_vm4, %v3250_v52  ;;  %3867 = vrot.lane.b32.xlu1 %v10286_v21, %s11618_s22 }
 0x7ac   : > { %3719 = vrot.lane.b32.xlu0 %v10251_v47, %s9284_s24  ;;  %v11059_v43 = vpop.permute.xlu0 %6099 }
 0x7ad   : > { %8160 = vmatmul.mubr.msk.bf16.gmra.mrb[16].mxu1 %vm2954_vm4, %v10720_v44 }
 0x7ae   : > { %8163 = vmatprep.mubr.msk.bf16.mxu1 %vm2954_vm4, %v10770_v49 }
 0x7af   : > { %v3406_v15 = vpop.permute.xlu1 %3405  ;;  %3871 = vrot.lane.b32.xlu1 %v10304_v23, %s11618_s22 }
 0x7b0   : > { %6565 = vrot.lane.b32.xlu0 %v10505_v58, %s9277_s3  ;;  %v3258_v55 = vpop.permute.xlu0 %3257 }
 0x7b2   : > { %7940 = vmatmul.mubr.msk.bf16.gmra.mrb[24].mxu0 %vm2954_vm4, %v10981_v17 }
 0x7b3   : > { %v11071_v21 = vpop.permute.xlu1 %6261  ;;  %7943 = vmatprep.mubr.msk.bf16.mxu0 %vm2954_vm4, %v3254_v7  ;;  %3875 = vrot.lane.b32.xlu1 %v10318_v3, %s11618_s22 }
 0x7b4   : > { %3877 = vrot.lane.b32.xlu0 %v10258_v1, %s9293_s29  ;;  %v11077_v44 = vpop.permute.xlu0 %6103 }
 0x7b5   : > { %8164 = vmatmul.mubr.msk.bf16.gmra.mrb[20].mxu1 %vm2954_vm4, %v10728_v4 }
 0x7b6   : > { %8169 = vmatprep.mubr.msk.bf16.mxu1 %vm2954_vm4, %v10740_v50 }
 0x7b7   : > { %v11083_v23 = vpop.permute.xlu1 %6251 }
 0x7b8   : > { %3861 = vrot.lane.b32.xlu0 %v10230_v48, %s11618_s22  ;;  %v3400_v49 = vpop.permute.xlu0 %3399 }
 0x7ba   : > { %7944 = vmatmul.mubr.msk.bf16.gmra.mrb[28].mxu0 %vm2954_vm4, %v3256_v33 }
 0x7bb   : > { %v3410_v3 = vpop.permute.xlu1 %3409  ;;  %7947 = vmatprep.mubr.msk.bf16.mxu0 %vm2954_vm4, %v3258_v55 }
 0x7bc   : > { %v11089_v1 = vpop.permute.xlu0 %6245  ;;  %3865 = vrot.lane.b32.xlu0 %v10237_v56, %s11618_s22 }
 0x7bd   : > { %8170 = vmatmul.mubr.msk.bf16.vlgmr.msra.gmra.mrb[8].mxu1 %vm2954_vm4, %v10790_v0 }
 0x7be   : > { %8186 = vmatpush3.bf16.msra.mxu1 %v10780_v62  ;;  %8173 = vmatprep.mubr.msk.bf16.mxu1 %vm2954_vm4, %v10748_v53 }
 0x7bf   : > { %8203 = vmatprep.subr.bf16.mxu1 %v10831_v16  ;;  %v11099_v48 = vpop.permute.xlu1 %6255 }
 0x7c0   : > { %v3404_v4 = vpop.permute.xlu0 %3403  ;;  %3869 = vrot.lane.b32.xlu0 %v10244_v59, %s11618_s22 }
 0x7c2   : > { %7948 = vmatmul.mubr.msk.bf16.gmra.mrb[32].mxu0 %vm2954_vm4, %v3260_v34 }
 0x7c3   : > { %v3414_v50 = vpop.permute.xlu1 %3413  ;;  %7953 = vmatprep.mubr.msk.bf16.mxu0 %vm2954_vm4, %v3400_v49  ;;  %v11631_v49 = vld [vmem:[#allocation8_spill] sm:$0xff] }
 0x7c4   : > { %v3416_v56 = vpop.permute.xlu0 %3415  ;;  %3873 = vrot.lane.b32.xlu0 %v10251_v47, %s11618_s22 }
 0x7c5   : > { %7951 = vmatprep.subr.bf16.mxu0 %v3416_v56  ;;  %8174 = vmatmul.mubr.msk.bf16.gmra.mrb[12].mxu1 %vm2954_vm4, %v10804_v19 }
 0x7c6   : > { %8177 = vmatprep.mubr.msk.bf16.mxu1 %vm2954_vm4, %v10760_v54  ;;  %7952 = vmatpush3.bf16.msra.mxu0 %v3416_v56 }
 0x7c7   : > { %v11111_v53 = vpop.permute.xlu1 %6259 }
 0x7c8   : > { %v11113_v59 = vpop.permute.xlu0 %6249 }
 0x7ca   : > { %7954 = vmatmul.mubr.msk.bf16.vlgmr.msra.gmra.mrb[20].mxu0 %vm2954_vm4, %v3402_v40 }
 0x7cb   : > { %v3556_v62 = vpop.permute.xlu1 %3555  ;;  %7957 = vmatprep.mubr.msk.bf16.mxu0 %vm2954_vm4, %v3404_v4 }
 0x7cc   : > { %v3408_v0 = vpop.permute.xlu0 %3407 }
 0x7cd   : > { %8178 = vmatmul.mubr.msk.bf16.gmra.mrb[16].mxu1 %vm2954_vm4, %v10811_v41 }
 0x7ce   : > { %8181 = vmatprep.mubr.msk.bf16.mxu1 %vm2954_vm4, %v10768_v60 }
 0x7cf   : > { %v11121_v47 = vpop.permute.xlu1 %6401 }
 0x7d1   : > { %v11123_v54 = vpop.permute.xlu0 %6253 }
 0x7d2   : > { %7958 = vmatmul.mubr.msk.bf16.gmra.mrb[24].mxu0 %vm2954_vm4, %v3406_v15 }
 0x7d3   : > { %v11126_v19 = vpop.permute.xlu1 %6415  ;;  %7961 = vmatprep.mubr.msk.bf16.mxu0 %vm2954_vm4, %v3408_v0  ;;  %v11633_v0 = vld [vmem:[#allocation10_spill] sm:$0xff] }
 0x7d5   : > { %v3412_v42 = vpop.permute.xlu0 %3411  ;;  %8182 = vmatmul.mubr.msk.bf16.gmra.mrb[20].mxu1 %vm2954_vm4, %v10823_v6 }
 0x7d6   : > { %8187 = vmatprep.mubr.msk.bf16.mxu1 %vm2954_vm4, %v10470_v35 }
 0x7d7   : > { %v3560_v41 = vpop.permute.xlu1 %3559 }
 0x7d9   : > { %v11133_v17 = vpop.permute.xlu0 %6257 }
 0x7da   : > { %7962 = vmatmul.mubr.msk.bf16.gmra.mrb[28].mxu0 %vm2954_vm4, %v3410_v3 }
 0x7db   : > { %v11136_v60 = vpop.permute.xlu1 %6405  ;;  %7965 = vmatprep.mubr.msk.bf16.mxu0 %vm2954_vm4, %v3412_v42 }
 0x7dd   : > { %v3554_v37 = vpop.permute.xlu0 %3553  ;;  %8188 = vmatmul.mubr.msk.bf16.vlgmr.msra.gmra.mrb[8].mxu1 %vm2954_vm4, %v10519_v30 }
 0x7de   : > { %8204 = vmatpush3.bf16.msra.mxu1 %v10831_v16  ;;  %8191 = vmatprep.mubr.msk.bf16.mxu1 %vm2954_vm4, %v10481_v51 }
 0x7df   : > { %8221 = vmatprep.subr.bf16.mxu1 %v10849_v14  ;;  %v3564_v35 = vpop.permute.xlu1 %3563 }
 0x7e1   : > { %v11145_v6 = vpop.permute.xlu0 %6399 }
 0x7e2   : > { %7966 = vmatmul.mubr.msk.bf16.gmra.mrb[32].mxu0 %vm2954_vm4, %v3414_v50  ;;  %v11632_v50 = vld [vmem:[#allocation9_spill] sm:$0xff] }
 0x7e3   : > { %v11148_v33 = vpop.permute.xlu1 %6409  ;;  %7971 = vmatprep.mubr.msk.bf16.mxu0 %vm2954_vm4, %v3554_v37  ;;  %v11635_v37 = vld [vmem:[#allocation11_spill] sm:$0xff] }
 0x7e5   : > { %v3570_v52 = vpop.permute.xlu0 %3569  ;;  %8192 = vmatmul.mubr.msk.bf16.gmra.mrb[12].mxu1 %vm2954_vm4, %v10534_v10 }
 0x7e6   : > { %7969 = vmatprep.subr.bf16.mxu0 %v3570_v52  ;;  %8195 = vmatprep.mubr.msk.bf16.mxu1 %vm2954_vm4, %v10493_v31 }
 0x7e7   : > { %7970 = vmatpush3.bf16.msra.mxu0 %v3570_v52  ;;  %v3568_v51 = vpop.permute.xlu1 %3567 }
 0x7e9   : > { %v3558_v30 = vpop.permute.xlu0 %3557 }
 0x7ea   : > { %7972 = vmatmul.mubr.msk.bf16.vlgmr.msra.gmra.mrb[20].mxu0 %vm2954_vm4, %v3556_v62 }
 0x7eb   : > { %v11156_v16 = vpop.permute.xlu1 %6413  ;;  %7975 = vmatprep.mubr.msk.bf16.mxu0 %vm2954_vm4, %v3558_v30  ;;  %v11636_v30 = vld [vmem:[#allocation12_spill] sm:$0xff] }
 0x7ed   : > { %v11159_v34 = vpop.permute.xlu0 %6403  ;;  %8196 = vmatmul.mubr.msk.bf16.gmra.mrb[16].mxu1 %vm2954_vm4, %v10560_v36 }
 0x7ee   : > { %8199 = vmatprep.mubr.msk.bf16.mxu1 %vm2954_vm4, %v10505_v58 }
 0x7ef   : > { %v3710_v10 = vpop.permute.xlu1 %3709 }
 0x7f1   : > { %v3562_v46 = vpop.permute.xlu0 %3561 }
 0x7f2   : > { %7976 = vmatmul.mubr.msk.bf16.gmra.mrb[24].mxu0 %vm2954_vm4, %v3560_v41 }
 0x7f3   : > { %7979 = vmatprep.mubr.msk.bf16.mxu0 %vm2954_vm4, %v3562_v46  ;;  %v11167_v31 = vpop.permute.xlu1 %6569 }
 0x7f5   : > { %v11169_v40 = vpop.permute.xlu0 %6407  ;;  %8200 = vmatmul.mubr.msk.bf16.gmra.mrb[20].mxu1 %vm2954_vm4, %v10575_v2 }
 0x7f6   : > { %8205 = vmatprep.mubr.msk.bf16.mxu1 %vm2954_vm4, %v10788_v61 }
 0x7f8   : > { %v11176_v58 = vpop.permute.xlu1 %6555 }
 0x7f9   : > { %v3566_v36 = vpop.permute.xlu0 %3565 }
 0x7fa   : > { %7980 = vmatmul.mubr.msk.bf16.gmra.mrb[28].mxu0 %vm2954_vm4, %v3564_v35 }
 0x7fb   : > { %7983 = vmatprep.mubr.msk.bf16.mxu0 %vm2954_vm4, %v3566_v36 }
 0x7fc   : > { %v3714_v2 = vpop.permute.xlu1 %3713 }
 0x7fd   : > { %v11179_v7 = vpop.permute.xlu0 %6411  ;;  %8206 = vmatmul.mubr.msk.bf16.vlgmr.msra.gmra.mrb[8].mxu1 %vm2954_vm4, %v10843_v8 }
 0x7fe   : > { %8222 = vmatpush3.bf16.msra.mxu1 %v10849_v14  ;;  %8209 = vmatprep.mubr.msk.bf16.mxu1 %vm2954_vm4, %v10802_v63 }
 0x7ff   : > { %8239 = vmatprep.subr.bf16.mxu1 %v10925_v13 }
 0x800   : > { %v11193_v8 = vpop.permute.xlu1 %6559 }
 0x801   : > { %v3708_v61 = vpop.permute.xlu0 %3707 }
 0x802   : > { %7984 = vmatmul.mubr.msk.bf16.gmra.mrb[32].mxu0 %vm2954_vm4, %v3568_v51 }
 0x803   : > { %7989 = vmatprep.mubr.msk.bf16.mxu0 %vm2954_vm4, %v3708_v61  ;;  %v11639_v61 = vld [vmem:[#allocation15_spill] sm:$0xff] }
 0x804   : > { %v3718_v14 = vpop.permute.xlu1 %3717 }
 0x805   : > { %v3724_v15 = vpop.permute.xlu0 %3723  ;;  %8210 = vmatmul.mubr.msk.bf16.gmra.mrb[12].mxu1 %vm2954_vm4, %v10851_v11 }
 0x806   : > { %7987 = vmatprep.subr.bf16.mxu0 %v3724_v15  ;;  %8213 = vmatprep.mubr.msk.bf16.mxu1 %vm2954_vm4, %v10809_v9 }
 0x807   : > { %7988 = vmatpush3.bf16.msra.mxu0 %v3724_v15  ;;  %v11640_v15 = vld [vmem:[#allocation17_spill] sm:$0xff] }
 0x808   : > { %v11206_v9 = vpop.permute.xlu1 %6563 }
 0x809   : > { %v11195_v63 = vpop.permute.xlu0 %6553 }
 0x80a   : > { %7990 = vmatmul.mubr.msk.bf16.vlgmr.msra.gmra.mrb[20].mxu0 %vm2954_vm4, %v3710_v10  ;;  %v11637_v10 = vld [vmem:[#allocation16_spill] sm:$0xff] }
 0x80d   : > { %v3712_v55 = vpop.permute.xlu0 %3711  ;;  %8214 = vmatmul.mubr.msk.bf16.gmra.mrb[16].mxu1 %vm2954_vm4, %v10863_v22  ;;  %v3722_v22 = vpop.permute.xlu1 %3721 }
 0x80e   : > { %8217 = vmatprep.mubr.msk.bf16.mxu1 %vm2954_vm4, %v11631_v49  ;;  %7993 = vmatprep.mubr.msk.bf16.mxu0 %vm2954_vm4, %v3712_v55 }
 0x812   : > { %v11203_v11 = vpop.permute.xlu0 %6557  ;;  %7994 = vmatmul.mubr.msk.bf16.gmra.mrb[24].mxu0 %vm2954_vm4, %v3714_v2 }
 0x815   : > { %8218 = vmatmul.mubr.msk.bf16.gmra.mrb[20].mxu1 %vm2954_vm4, %v10871_v57  ;;  %v11221_v57 = vpop.permute.xlu1 %6567 }
 0x816   : > { %v3716_v3 = vpop.permute.xlu0 %3715  ;;  %8223 = vmatprep.mubr.msk.bf16.mxu1 %vm2954_vm4, %v10883_v29 }
 0x817   : > { %7997 = vmatprep.mubr.msk.bf16.mxu0 %vm2954_vm4, %v3716_v3 }
 0x819   : > { %v11228_v62 = vpop.permute.xlu1 %6760 }
 0x81a   : > { %v11213_v4 = vpop.permute.xlu0 %6561  ;;  %7998 = vmatmul.mubr.msk.bf16.gmra.mrb[28].mxu0 %vm2954_vm4, %v3718_v14 }
 0x81d   : > { %8224 = vmatmul.mubr.msk.bf16.vlgmr.msra.gmra.mrb[8].mxu1 %vm2954_vm4, %v11632_v50 }
 0x81e   : > { %v3720_v56 = vpop.permute.xlu0 %3719  ;;  %8240 = vmatpush3.bf16.msra.mxu1 %v10925_v13  ;;  %8227 = vmatprep.mubr.msk.bf16.mxu1 %vm2954_vm4, %v10890_v25  ;;  %v11634_v13 = vld [vmem:[#allocation14_spill] sm:$0xff]  ;;  %v3864_v25 = vpop.permute.xlu1 %3863 }
 0x81f   : > { %8257 = vmatprep.subr.bf16.mxu1 %v11000_v27  ;;  %8001 = vmatprep.mubr.msk.bf16.mxu0 %vm2954_vm4, %v3720_v56  ;;  %v2890_v56 = vld [vmem:[%s11511_s6 + $0x20] sm:$0xff] }
 0x822   : > { %v11225_v29 = vpop.permute.xlu0 %6565  ;;  %8002 = vmatmul.mubr.msk.bf16.gmra.mrb[32].mxu0 %vm2954_vm4, %v3722_v22  ;;  %v3868_v52 = vpop.permute.xlu1 %3867 }
 0x825   : > { %8228 = vmatmul.mubr.msk.bf16.gmra.mrb[12].mxu1 %vm2954_vm4, %v11633_v0 }
 0x826   : > { %v3878_v42 = vpop.permute.xlu0 %3877  ;;  %8231 = vmatprep.mubr.msk.bf16.mxu1 %vm2954_vm4, %v11634_v13  ;;  %v3872_v46 = vpop.permute.xlu1 %3871 }
 0x827   : > { %8005 = vmatprep.subr.bf16.mxu0 %v3878_v42 }
 0x828   : > { %8006 = vmatpush3.bf16.msra.mxu0 %v3878_v42 }
 0x82a   : > { %v3862_v41 = vpop.permute.xlu0 %3861  ;;  %v3876_v2 = vpop.permute.xlu1 %3875 }
 0x82b   : > { %8007 = vmatprep.mubr.msk.bf16.mxu0 %vm2954_vm4, %v3862_v41 }
 0x82c   : > { %8008 = vmatmul.mubr.msk.bf16.vlgmr.msra.gmra.mrb[20].mxu0 %vm2954_vm4, %v3864_v25 }
 0x82d   : > { %8232 = vmatmul.mubr.msk.bf16.gmra.mrb[16].mxu1 %vm2954_vm4, %v11635_v37 }
 0x82e   : > { %8235 = vmatprep.mubr.msk.bf16.mxu1 %vm2954_vm4, %v10908_v12  ;;  %v3866_v35 = vpop.permute.xlu0 %3865  ;;  %v11638_v12 = vld [vmem:[#allocation13_spill] sm:$0xff] }
 0x82f   : > { %8011 = vmatprep.mubr.msk.bf16.mxu0 %vm2954_vm4, %v3866_v35 }
 0x832   : > { %v3870_v51 = vpop.permute.xlu0 %3869 }
 0x834   : > { %8012 = vmatmul.mubr.msk.bf16.gmra.mrb[24].mxu0 %vm2954_vm4, %v3868_v52 }
 0x835   : > { %8236 = vmatmul.mubr.msk.bf16.gmra.mrb[20].mxu1 %vm2954_vm4, %v11636_v30  ;;  %8015 = vmatprep.mubr.msk.bf16.mxu0 %vm2954_vm4, %v3870_v51 }
 0x836   : > { %8241 = vmatprep.mubr.msk.bf16.mxu1 %vm2954_vm4, %v11637_v10  ;;  %v3874_v36 = vpop.permute.xlu0 %3873  ;;  %v2896_v10 = vld [vmem:[%s11511_s6 + $0x50] sm:$0xff] }
 0x83c   : > { %8016 = vmatmul.mubr.msk.bf16.gmra.mrb[28].mxu0 %vm2954_vm4, %v3872_v46 }
 0x83d   : > { %8242 = vmatmul.mubr.msk.bf16.vlgmr.msra.gmra.mrb[8].mxu1 %vm2954_vm4, %v11638_v12  ;;  %8019 = vmatprep.mubr.msk.bf16.mxu0 %vm2954_vm4, %v3874_v36  ;;  %v2894_v12 = vld [vmem:[%s11511_s6 + $0x40] sm:$0xff] }
 0x83e   : > { %8258 = vmatpush3.bf16.msra.mxu1 %v11000_v27  ;;  %8245 = vmatprep.mubr.msk.bf16.mxu1 %vm2954_vm4, %v10945_v18  ;;  %v11641_v27 = vld [vmem:[#allocation18_spill] sm:$0xff] }
 0x83f   : > { %8275 = vmatprep.subr.bf16.mxu1 %v11071_v21  ;;  %v9111_v18 = vld [vmem:[%s11510_s5 + $0xc] ss:$16 sps:$4 sm:$0xff]  }
 0x844   : > { %8020 = vmatmul.mubr.msk.bf16.gmra.mrb[32].mxu0 %vm2954_vm4, %v3876_v2 }
 0x845   : > { %8246 = vmatmul.mubr.msk.bf16.gmra.mrb[12].mxu1 %vm2954_vm4, %v11639_v61  ;;  %v2897_v61 = vld [vmem:[%s11511_s6 + $0x58] sm:$0xff] }
 0x846   : > { %8249 = vmatprep.mubr.msk.bf16.mxu1 %vm2954_vm4, %v10974_v26  ;;  %v9112_v26 = vld [vmem:[%s11510_s5 + $0x2c] ss:$16 sps:$4 sm:$0xff]  }
 0x84d   : > { %8250 = vmatmul.mubr.msk.bf16.gmra.mrb[16].mxu1 %vm2954_vm4, %v11640_v15 }
 0x84e   : > { %8253 = vmatprep.mubr.msk.bf16.mxu1 %vm2954_vm4, %v10994_v38  ;;  %v9115_v38 = vld [vmem:[%s11510_s5 + $0x8c] ss:$16 sps:$4 sm:$0xff]  }
 0x855   : > { %8254 = vmatmul.mubr.msk.bf16.gmra.mrb[20].mxu1 %vm2954_vm4, %v11641_v27 }
 0x856   : > { %8259 = vmatprep.mubr.msk.bf16.mxu1 %vm2954_vm4, %v11011_v5  ;;  %v9116_v5 = vld [vmem:[%s11510_s5 + $0xac] ss:$16 sps:$4 sm:$0xff]  }
 0x85d   : > { %8260 = vmatmul.mubr.msk.bf16.vlgmr.msra.gmra.mrb[8].mxu1 %vm2954_vm4, %v10972_v24  ;;  %v9113_v24 = vld [vmem:[%s11510_s5 + $0x4c] ss:$16 sps:$4 sm:$0xff]  }
 0x85e   : > { %8276 = vmatpush3.bf16.msra.mxu1 %v11071_v21  ;;  %8263 = vmatprep.mubr.msk.bf16.mxu1 %vm2954_vm4, %v11032_v28  ;;  %v9118_v28 = vld [vmem:[%s11510_s5 + $0xec] ss:$0 sps:$4 sm:$0xff]  }
 0x85f   : > { %8293 = vmatprep.subr.bf16.mxu1 %v11126_v19 }
 0x865   : > { %8264 = vmatmul.mubr.msk.bf16.gmra.mrb[12].mxu1 %vm2954_vm4, %v10992_v32  ;;  %v9114_v32 = vld [vmem:[%s11510_s5 + $0x6c] ss:$16 sps:$4 sm:$0xff]  }
 0x866   : > { %8267 = vmatprep.mubr.msk.bf16.mxu1 %vm2954_vm4, %v11059_v43 }
 0x86d   : > { %8268 = vmatmul.mubr.msk.bf16.gmra.mrb[16].mxu1 %vm2954_vm4, %v11019_v45  ;;  %v9117_v45 = vld [vmem:[%s11510_s5 + $0xcc] ss:$16 sps:$4 sm:$0xff]  }
 0x86e   : > { %8271 = vmatprep.mubr.msk.bf16.mxu1 %vm2954_vm4, %v11077_v44 }
 0x875   : > { %8272 = vmatmul.mubr.msk.bf16.gmra.mrb[20].mxu1 %vm2954_vm4, %v11037_v39 }
 0x876   : > { %8277 = vmatprep.mubr.msk.bf16.mxu1 %vm2954_vm4, %v11089_v1 }
 0x87d   : > { %8278 = vmatmul.mubr.msk.bf16.vlgmr.msra.gmra.mrb[8].mxu1 %vm2954_vm4, %v11052_v20 }
 0x87e   : > { %8294 = vmatpush3.bf16.msra.mxu1 %v11126_v19  ;;  %8281 = vmatprep.mubr.msk.bf16.mxu1 %vm2954_vm4, %v11113_v59 }
 0x87f   : > { %8311 = vmatprep.subr.bf16.mxu1 %v11167_v31 }
 0x885   : > { %8282 = vmatmul.mubr.msk.bf16.gmra.mrb[12].mxu1 %vm2954_vm4, %v11083_v23 }
 0x886   : > { %8285 = vmatprep.mubr.msk.bf16.mxu1 %vm2954_vm4, %v11123_v54 }
 0x88d   : > { %8286 = vmatmul.mubr.msk.bf16.gmra.mrb[16].mxu1 %vm2954_vm4, %v11099_v48 }
 0x88e   : > { %8289 = vmatprep.mubr.msk.bf16.mxu1 %vm2954_vm4, %v11133_v17 }
 0x895   : > { %8290 = vmatmul.mubr.msk.bf16.gmra.mrb[20].mxu1 %vm2954_vm4, %v11111_v53 }
 0x896   : > { %8295 = vmatprep.mubr.msk.bf16.mxu1 %vm2954_vm4, %v11145_v6 }
 0x89d   : > { %8296 = vmatmul.mubr.msk.bf16.vlgmr.msra.gmra.mrb[8].mxu1 %vm2954_vm4, %v11121_v47 }
 0x89e   : > { %8312 = vmatpush3.bf16.msra.mxu1 %v11167_v31  ;;  %8299 = vmatprep.mubr.msk.bf16.mxu1 %vm2954_vm4, %v11159_v34  ;;  %v2886_v34 = vld [vmem:[%s11511_s6] sm:$0xff]  ;;  %v2889_v31 = vld [vmem:[%s11511_s6 + $0x18] sm:$0xff] }
 0x89f   : > { %8329 = vmatprep.subr.bf16.mxu1 %v11228_v62 }
 0x8a5   : > { %8300 = vmatmul.mubr.msk.bf16.gmra.mrb[12].mxu1 %vm2954_vm4, %v11136_v60 }
 0x8a6   : > { %8303 = vmatprep.mubr.msk.bf16.mxu1 %vm2954_vm4, %v11169_v40 }
 0x8ad   : > { %8304 = vmatmul.mubr.msk.bf16.gmra.mrb[16].mxu1 %vm2954_vm4, %v11148_v33  ;;  %v9119_v33 = vld [vmem:[%s11512_s7] sm:$0xff]  }
 0x8ae   : > { %8307 = vmatprep.mubr.msk.bf16.mxu1 %vm2954_vm4, %v11179_v7  ;;  %8363 = vmatprep.mubr.msk.bf16.mxu0 %vm6971_vm7, %v9119_v33  ;;  %v2899_v33 = vld [vmem:[%s11511_s6 + $0x68] sm:$0xff] }
 0x8b5   : > { %8308 = vmatmul.mubr.msk.bf16.gmra.mrb[20].mxu1 %vm2954_vm4, %v11156_v16  ;;  %v2888_v16 = vld [vmem:[%s11511_s6 + $0x10] sm:$0xff] }
 0x8b6   : > { %8313 = vmatprep.mubr.msk.bf16.mxu1 %vm2954_vm4, %v11195_v63 }
 0x8bd   : > { %8314 = vmatmul.mubr.msk.bf16.vlgmr.msra.gmra.mrb[8].mxu1 %vm2954_vm4, %v11176_v58  ;;  %v2887_v58 = vld [vmem:[%s11511_s6 + $0x8] sm:$0xff] }
 0x8be   : > { %8330 = vmatpush3.bf16.msra.mxu1 %v11228_v62  ;;  %8317 = vmatprep.mubr.msk.bf16.mxu1 %vm2954_vm4, %v11203_v11  ;;  %v2891_v62 = vld [vmem:[%s11511_s6 + $0x28] sm:$0xff] }
 0x8c5   : > { %8318 = vmatmul.mubr.msk.bf16.gmra.mrb[12].mxu1 %vm2954_vm4, %v11193_v8 }
 0x8c6   : > { %8321 = vmatprep.mubr.msk.bf16.mxu1 %vm2954_vm4, %v11213_v4  ;;  %v2892_v4 = vld [vmem:[%s11511_s6 + $0x30] sm:$0xff] }
 0x8cd   : > { %8322 = vmatmul.mubr.msk.bf16.gmra.mrb[16].mxu1 %vm2954_vm4, %v11206_v9 }
 0x8ce   : > { %8325 = vmatprep.mubr.msk.bf16.mxu1 %vm2954_vm4, %v11225_v29 }
 0x8d5   : > { %8326 = vmatmul.mubr.msk.bf16.gmra.mrb[20].mxu1 %vm2954_vm4, %v11221_v57  ;;  %v2893_v57 = vld [vmem:[%s11511_s6 + $0x38] sm:$0xff] }
 0x8d6   : > { %8331 = vmatprep.mubr.msk.bf16.mxu1 %vm2954_vm4, %v9111_v18  ;;  %v2895_v18 = vld [vmem:[%s11511_s6 + $0x48] sm:$0xff] }
 0x8dd   : > { %8332 = vmatmul.mubr.msk.bf16.vlgmr.msra.gmra.mrb[8].mxu1 %vm2954_vm4, %v9112_v26 }
 0x8de   : > { %8335 = vmatprep.mubr.msk.bf16.mxu1 %vm2954_vm4, %v9113_v24 }
 0x8e5   : > { %8336 = vmatmul.mubr.msk.bf16.gmra.mrb[12].mxu1 %vm2954_vm4, %v9114_v32 }
 0x8e6   : > { %8339 = vmatprep.mubr.msk.bf16.mxu1 %vm2954_vm4, %v9115_v38 }
 0x8ed   : > { %8340 = vmatmul.mubr.msk.bf16.gmra.mrb[16].mxu1 %vm2954_vm4, %v9116_v5 }
 0x8ee   : > { %8343 = vmatprep.mubr.msk.bf16.mxu1 %vm2954_vm4, %v9117_v45 }
 0x8f5   : > { %8344 = vmatmul.mubr.msk.bf16.gmra.mrb[20].mxu1 %vm2954_vm4, %v9118_v28 }
 0x8ff   : > { %v8009_v39 = vpop.f32.mrb[20].mxu0 }
 0x900   : > { %v3938_v20 = vpop.f32.mrb[21].mxu0  ;;  %v8391_v40 = vadd.f32 %v8009_v39, %v2888_v16 }
 0x901   : > { %v8010_v43 = vpop.f32.mrb[22].mxu0  ;;  %v8393_v7 = vadd.f32 %v3938_v20, %v2886_v34 }
 0x902   : > { %v3941_v21 = vpop.f32.mrb[23].mxu0  ;;  %v8395_v63 = vadd.f32 %v8010_v43, %v2889_v31 }
 0x903   : > { %v8397_v49 = vadd.f32 %v3941_v21, %v2887_v58 }
 0x907   : > { %v8013_v44 = vpop.f32.mrb[24].mxu0 }
 0x908   : > { %v3954_v23 = vpop.f32.mrb[25].mxu0  ;;  %v8399_v29 = vadd.f32 %v8013_v44, %v2892_v4 }
 0x909   : > { %v8014_v1 = vpop.f32.mrb[26].mxu0  ;;  %v8401_v0 = vadd.f32 %v3954_v23, %v2890_v56 }
 0x90a   : > { %v3957_v48 = vpop.f32.mrb[27].mxu0  ;;  %v8403_v13 = vadd.f32 %v8014_v1, %v2893_v57  ;;  %v2900_v1 = vld [vmem:[%s11511_s6 + $0x70] sm:$0xff] }
 0x90b   : > { %v8405_v37 = vadd.f32 %v3957_v48, %v2891_v62 }
 0x90f   : > { %v8017_v53 = vpop.f32.mrb[28].mxu0 }
 0x910   : > { %v3970_v59 = vpop.f32.mrb[29].mxu0  ;;  %v8407_v27 = vadd.f32 %v8017_v53, %v2896_v10 }
 0x911   : > { %v8018_v47 = vpop.f32.mrb[30].mxu0  ;;  %v8409_v24 = vadd.f32 %v3970_v59, %v2894_v12  ;;  %v2898_v59 = vld [vmem:[%s11511_s6 + $0x60] sm:$0xff] }
 0x912   : > { %v11369_v54 = vpop.f32.mrb[31].mxu0  ;;  %v8411_v5 = vadd.f32 %v8018_v47, %v2897_v61 }
 0x913   : > { %v8413_v20 = vadd.f32 %v11369_v54, %v2895_v18  ;;  %v6938_v18 = vld [vmem:[%s11513_s8 + $0x30] sm:$0xff] }
 0x917   : > { %v11371_v19 = vpop.f32.mrb[32].mxu0 }
 0x918   : > { %v11373_v17 = vpop.f32.mrb[33].mxu0 }
 0x919   : > { %v8022_v60 = vpop.f32.mrb[34].mxu0  ;;  %v8417_v34 = vadd.f32 %v11373_v17, %v2898_v59 }
 0x91a   : > { %v11375_v6 = vpop.f32.mrb[35].mxu0  ;;  %v8415_v60 = vadd.f32 %v11371_v19, %v2900_v1  ;;  %v6942_v1 = vld [vmem:[%s11513_s8 + $0x50] sm:$0xf] }
 0x9b0   : > { %v8333_v8 = vpop.f32.mrb[8].mxu1 }
 0x9b1   : > { %v8392_v14 = vadd.f32 %v8391_v40, %v8333_v8  ;;  %v6821_v55 = vpop.f32.mrb[9].mxu1 }
 0x9b2   : > { %v8394_v11 = vadd.f32 %v8393_v7, %v6821_v55  ;;  %v8334_v9 = vpop.f32.mrb[10].mxu1 }
 0x9b3   : > { %9150 = vtanh.f32 %v8392_v14  ;;  %v8396_v3 = vadd.f32 %v8395_v63, %v8334_v9  ;;  %v6824_v22 = vpop.f32.mrb[11].mxu1  ;;  %v8419_v63 = vadd.f32 %v11375_v6, %v2899_v33 }
 0x9b4   : > { %9152 = vtanh.f32 %v8394_v11  ;;  %v8398_v50 = vadd.f32 %v8397_v49, %v6824_v22 }
 0x9b5   : > { %9154 = vtanh.f32 %v8396_v3 }
 0x9b6   : > { %9156 = vtanh.f32 %v8398_v50 }
 0x9b8   : > { %v8337_v42 = vpop.f32.mrb[12].mxu1 }
 0x9b9   : > { %v8400_v25 = vadd.f32 %v8399_v29, %v8337_v42  ;;  %v6837_v41 = vpop.f32.mrb[13].mxu1  ;;  %v9121_v42 = vld [vmem:[%s11512_s7 + $0x10] sm:$0xff]  }
 0x9ba   : > { %v8402_v35 = vadd.f32 %v8401_v0, %v6837_v41  ;;  %v8338_v52 = vpop.f32.mrb[14].mxu1  ;;  %v9120_v0 = vld [vmem:[%s11512_s7 + $0x8] sm:$0xff]   ;;  %v9123_v41 = vld [vmem:[%s11512_s7 + $0x20] sm:$0xff]  }
 0x9bb   : > { %9158 = vtanh.f32 %v8400_v25  ;;  %v8404_v51 = vadd.f32 %v8403_v13, %v8338_v52  ;;  %v6840_v30 = vpop.f32.mrb[15].mxu1  ;;  %v11642_v13 = vmov 0.0   ;;  %v9122_v25 = vld [vmem:[%s11512_s7 + $0x18] sm:$0xff]   ;;  %v6932_v52 = vld [vmem:[%s11513_s8] sm:$0xff] }
 0x9bc   : > { %9160 = vtanh.f32 %v8402_v35  ;;  %v8406_v46 = vadd.f32 %v8405_v37, %v6840_v30  ;;  %v9124_v37 = vld [vmem:[%s11512_s7 + $0x28] ss:$0 sps:$4 sm:$0x33]   ;;  %v6934_v35 = vld [vmem:[%s11513_s8 + $0x10] sm:$0xff]  ;;  %v6935_v30 = vld [vmem:[%s11513_s8 + $0x18] sm:$0xff] }
 0x9bd   : > { %v9151_v36 = vpop.eup %9150  ;;  %9162 = vtanh.f32 %v8404_v51 }
 0x9be   : > { %v9153_v2 = vpop.eup %9152  ;;  %9164 = vtanh.f32 %v8406_v46 }
 0x9bf   : > { %v9155_v15 = vpop.eup %9154 }
 0x9c0   : > { %v9157_v26 = vpop.eup %9156  ;;  %v8341_v32 = vpop.f32.mrb[16].mxu1  ;;  %v6925_v38 = vpack.c.bf16 %v9155_v15, %v9151_v36  ;;  %v6933_v36 = vld [vmem:[%s11513_s8 + $0x8] sm:$0xff] }
 0x9c1   : > { %v8408_v45 = vadd.f32 %v8407_v27, %v8341_v32  ;;  %v6853_v28 = vpop.f32.mrb[17].mxu1  ;;  %v6924_v39 = vpack.c.bf16 %v9157_v26, %v9153_v2  ;;  %v6936_v26 = vld [vmem:[%s11513_s8 + $0x20] sm:$0xff]  ;;  %v6939_v32 = vld [vmem:[%s11513_s8 + $0x38] sm:$0xff] }
 0x9c2   : > { %v8410_v43 = vadd.f32 %v8409_v24, %v6853_v28  ;;  %v8342_v21 = vpop.f32.mrb[18].mxu1 }
 0x9c3   : > { %9166 = vtanh.f32 %v8408_v45  ;;  %v8412_v44 = vadd.f32 %v8411_v5, %v8342_v21  ;;  %v6856_v23 = vpop.f32.mrb[19].mxu1  ;;  %8347 = vmatprep.subr.bf16.mxu0 %v6924_v39  ;;  %v6937_v45 = vld [vmem:[%s11513_s8 + $0x28] sm:$0xff] }
 0x9c4   : > { %9168 = vtanh.f32 %v8410_v43  ;;  %v8414_v48 = vadd.f32 %v8413_v20, %v6856_v23  ;;  %8348 = vmatpush3.bf16.msra.mxu0 %v6924_v39 }
 0x9c5   : > { %v9159_v53 = vpop.eup %9158  ;;  %9170 = vtanh.f32 %v8412_v44  ;;  %8349 = vmatprep.subr.bf16.mxu0 %v6925_v38 }
 0x9c6   : > { %v9161_v47 = vpop.eup %9160  ;;  %9172 = vtanh.f32 %v8414_v48 }
 0x9c7   : > { %v9163_v54 = vpop.eup %9162 }
 0x9c8   : > { %v9165_v16 = vpop.eup %9164  ;;  %v8345_v31 = vpop.f32.mrb[20].mxu1  ;;  %8350 = vmatpush3.bf16.msra.mxu0 %v6925_v38  ;;  %v6927_v40 = vpack.c.bf16 %v9163_v54, %v9159_v53  ;;  %v6940_v53 = vld [vmem:[%s11513_s8 + $0x40] sm:$0xff] }
 0x9c9   : > { %v8416_v58 = vadd.f32 %v8415_v60, %v8345_v31  ;;  %v6869_v7 = vpop.f32.mrb[21].mxu1  ;;  %v6926_v8 = vpack.c.bf16 %v9165_v16, %v9161_v47  ;;  %v6941_v16 = vld [vmem:[%s11513_s8 + $0x48] sm:$0xff] }
 0x9ca   : > { %v8418_v14 = vadd.f32 %v8417_v34, %v6869_v7  ;;  %v8346_v55 = vpop.f32.mrb[22].mxu1 }
 0x9cb   : > { %v6872_v49 = vpop.f32.mrb[23].mxu1  ;;  %8351 = vmatprep.subr.bf16.mxu0 %v6926_v8  ;;  %9174 = vtanh.f32 %v8416_v58 }
 0x9cc   : > { %v8420_v19 = vadd.f32 %v8419_v63, %v6872_v49  ;;  %8352 = vmatpush3.bf16.msra.mxu0 %v6926_v8  ;;  %9176 = vtanh.f32 %v8418_v14 }
 0x9cd   : > { %v9167_v11 = vpop.eup %9166  ;;  %8353 = vmatprep.subr.bf16.mxu0 %v6927_v40 }
 0x9ce   : > { %v9169_v9 = vpop.eup %9168  ;;  %9178 = vtanh.f32 %v8420_v19 }
 0x9cf   : > { %v9171_v17 = vpop.eup %9170 }
 0x9d0   : > { %v9173_v3 = vpop.eup %9172  ;;  %8354 = vmatpush3.bf16.msra.mxu0 %v6927_v40  ;;  %v6929_v22 = vpack.c.bf16 %v9171_v17, %v9167_v11 }
 0x9d1   : > { %v6928_v4 = vpack.c.bf16 %v9173_v3, %v9169_v9 }
 0x9d3   : > { %8355 = vmatprep.subr.bf16.mxu0 %v6928_v4 }
 0x9d4   : > { %8356 = vmatpush3.bf16.msra.mxu0 %v6928_v4 }
 0x9d5   : > { %8357 = vmatprep.subr.bf16.mxu0 %v6929_v22  ;;  %v9175_v6 = vpop.eup %9174 }
 0x9d6   : > { %v9177_v50 = vpop.eup %9176  ;;  %v6931_v29 = vpack.c.bf16 %v9175_v6, %v9175_v6  ;;  %v9125_v6 = vld [vmem:[#allocation5] sm:$0x1f]  }
 0x9d8   : > { %v9179_v56 = vpop.eup %9178  ;;  %8358 = vmatpush3.bf16.msra.mxu0 %v6929_v22  ;;  %v6991_v62 = vsel %vm908_vm14, %v6931_v29, 0 }
 0x9d9   : > { %v6930_v57 = vpack.c.bf16 %v9179_v56, %v9177_v50  ;;  %v7092_v50 = vld [vmem:[%s11515_s10] sm:$0xff] }
 0x9db   : > { %8359 = vmatprep.subr.bf16.mxu0 %v6930_v57 }
 0x9dc   : > { %8360 = vmatpush3.bf16.msra.mxu0 %v6930_v57  ;;  %v7093_v57 = vld [vmem:[%s11515_s10 + $0x8] sm:$0x3] }
 0x9dd   : > { %8801 = vmatprep.subr.msk.bf16.mxu0 %vm908_vm14, %v6931_v29  ;;  %vm9294_vm14 = vmmov 0  }
 0x9e0   : > { %8362 = vmatpush3.bf16.msra.mxu0 %v6991_v62 }
 0x9e1   : > { %8375 = vmatprep.subr.bf16.mxu0 %v11642_v13 }
 0x9e3   : > { %8364 = vmatmul.mubr.msk.bf16.vlgmr.msra.gmra.mrb[36].mxu0 %vm6971_vm7, %v9120_v0 }
 0x9e4   : > { %8367 = vmatprep.mubr.msk.bf16.mxu0 %vm6971_vm7, %v9121_v42 }
 0x9eb   : > { %8368 = vmatmul.mubr.msk.bf16.gmra.mrb[40].mxu0 %vm6971_vm7, %v9122_v25 }
 0x9ec   : > { %8371 = vmatprep.mubr.msk.bf16.mxu0 %vm6971_vm7, %v9123_v41 }
 0x9f3   : > { %8372 = vmatmul.mubr.msk.bf16.gmra.mrb[44].mxu0 %vm6971_vm7, %v9124_v37 }
 0x9f4   : > { %8387 = vmatprep.mubr.msk.bf16.mxu0 %vm9294_vm14, %v11642_v13 }
 0xab6   : > { %v8365_v51 = vpop.f32.mrb[36].mxu0 }
 0xab7   : > { %v7036_v10 = vadd.f32 %v8365_v51, %v6934_v35  ;;  %v7027_v46 = vpop.f32.mrb[37].mxu0 }
 0xab8   : > { %v7028_v12 = vadd.f32 %v7027_v46, %v6932_v52  ;;  %v8366_v2 = vpop.f32.mrb[38].mxu0 }
 0xab9   : > { %9180 = vtanh.f32 %v7036_v10  ;;  %v7039_v61 = vadd.f32 %v8366_v2, %v6935_v30  ;;  %v7030_v15 = vpop.f32.mrb[39].mxu0 }
 0xaba   : > { %9182 = vtanh.f32 %v7028_v12  ;;  %v7031_v27 = vadd.f32 %v7030_v15, %v6933_v36 }
 0xabb   : > { %9184 = vtanh.f32 %v7039_v61 }
 0xabc   : > { %9186 = vtanh.f32 %v7031_v27 }
 0xabe   : > { %v8369_v24 = vpop.f32.mrb[40].mxu0 }
 0xabf   : > { %v7052_v38 = vadd.f32 %v8369_v24, %v6938_v18  ;;  %v7043_v5 = vpop.f32.mrb[41].mxu0 }
 0xac0   : > { %v7044_v28 = vadd.f32 %v7043_v5, %v6936_v26  ;;  %v8370_v39 = vpop.f32.mrb[42].mxu0 }
 0xac1   : > { %9188 = vtanh.f32 %v7052_v38  ;;  %v7055_v20 = vadd.f32 %v8370_v39, %v6939_v32  ;;  %v7046_v43 = vpop.f32.mrb[43].mxu0 }
 0xac2   : > { %9190 = vtanh.f32 %v7044_v28  ;;  %v7047_v21 = vadd.f32 %v7046_v43, %v6937_v45 }
 0xac3   : > { %v9181_v44 = vpop.eup %9180  ;;  %9192 = vtanh.f32 %v7055_v20 }
 0xac4   : > { %v9183_v23 = vpop.eup %9182  ;;  %9194 = vtanh.f32 %v7047_v21 }
 0xac5   : > { %v9185_v48 = vpop.eup %9184 }
 0xac6   : > { %v9187_v59 = vpop.eup %9186  ;;  %v8373_v47 = vpop.f32.mrb[44].mxu0  ;;  %v7087_v54 = vpack.c.bf16 %v9185_v48, %v9181_v44 }
 0xac7   : > { %v7068_v60 = vadd.f32 %v8373_v47, %v6942_v1  ;;  %v7059_v33 = vpop.f32.mrb[45].mxu0  ;;  %v7086_v34 = vpack.c.bf16 %v9187_v59, %v9183_v23 }
 0xac8   : > { %v7060_v31 = vadd.f32 %v7059_v33, %v6940_v53  ;;  %v8374_v40 = vpop.f32.mrb[46].mxu0 }
 0xac9   : > { %v7062_v58 = vpop.f32.mrb[47].mxu0  ;;  %8376 = vmatpush3.bf16.msra.mxu0 %v7086_v34  ;;  %9196 = vtanh.f32 %v7068_v60 }
 0xaca   : > { %v7063_v7 = vadd.f32 %v7062_v58, %v6941_v16  ;;  %8377 = vmatprep.subr.bf16.mxu0 %v11642_v13  ;;  %9198 = vtanh.f32 %v7060_v31 }
 0xacb   : > { %v9189_v8 = vpop.eup %9188 }
 0xacc   : > { %v9191_v63 = vpop.eup %9190  ;;  %9200 = vtanh.f32 %v7063_v7 }
 0xacd   : > { %v9193_v14 = vpop.eup %9192  ;;  %8378 = vmatpush3.bf16.msra.mxu0 %v7087_v54 }
 0xace   : > { %v9195_v55 = vpop.eup %9194  ;;  %8379 = vmatprep.subr.bf16.mxu0 %v11642_v13  ;;  %v7089_v49 = vpack.c.bf16 %v9193_v14, %v9189_v8 }
 0xacf   : > { %v7088_v19 = vpack.c.bf16 %v9195_v55, %v9191_v63 }
 0xad1   : > { %8380 = vmatpush3.bf16.msra.mxu0 %v7088_v19 }
 0xad2   : > { %8381 = vmatprep.subr.bf16.mxu0 %v11642_v13 }
 0xad3   : > { %v9197_v11 = vpop.eup %9196 }
 0xad4   : > { %v9199_v9 = vpop.eup %9198  ;;  %v7091_v22 = vpack.c.bf16 %v9197_v11, %v9197_v11 }
 0xad5   : > { %8382 = vmatpush3.bf16.msra.mxu0 %v7089_v49 }
 0xad6   : > { %v9201_v17 = vpop.eup %9200  ;;  %8383 = vmatprep.subr.bf16.mxu0 %v11642_v13  ;;  %v7105_v4 = vsel %vm7103_vm10, %v7091_v22, 0 }
 0xad7   : > { %v7090_v3 = vpack.c.bf16 %v9201_v17, %v9199_v9 }
 0xad9   : > { %8384 = vmatpush3.bf16.msra.mxu0 %v7090_v3 }
 0xada   : > { %8385 = vmatprep.subr.bf16.mxu0 %v11642_v13 }
 0xadd   : > { %8386 = vmatpush3.bf16.msra.mxu0 %v7105_v4 }
 0xae0   : > { %8388 = vmatmul.mubr.msk.bf16.vlgmr.msra.gmra.mrb[48].mxu0 %vm7099_vm15, %v9125_v6 }
 0xbb3   : > { %v7141_v56 = vpop.f32.mrb[48].mxu0 }
 0xbb4   : > { %v7142_v29 = vadd.f32 %v7141_v56, %v7092_v50  ;;  %v8389_v62 = vpop.f32.mrb[49].mxu0 }
 0xbb5   : > { %v7144_v0 = vpop.f32.mrb[50].mxu0 }
 0xbb6   : > { %7149 = vst.msk [vmem:[%s452_s20] sm:$0xff] %vm7148_vm2, %v7142_v29  ;;  %v7145_v42 = vadd.f32 %v7144_v0, %v7093_v57  ;;  %v8390_v13 = vpop.f32.mrb[51].mxu0 }
 0xbb8   : > { %7151 = vst.msk [vmem:[%s452_s20 + $0x8] sm:$0x3] %vm7150_vm0, %v7145_v42 }
 0xbb9 PF: > { %s24_s25 = sadd.s32 1, %s9240_s25  }
 0xbba   : > { %p21_p3 = scmp.ge.s32.totalorder %s24_s25, 4  }
 0xbbc   :  { %23 = sbr.rel (!%p21_p3) target bundleno = 8 (0x8), region = 131 }
 0xbc3   :  { %7173 = vsyncpa [#allocation6], 1 }
 0xbc4   :  { %7175 = vsyncpa [#allocation6 + $0x1], 1 }

</bundles_post_ra>
